<compile_context>
chip_gen: v7x
topology: tpu7x:2x2x1
jax: 0.10.0
libtpu: 0.0.40
codegen_flags: <defaults>
</compile_context>

<pallas_src>
import jax
import jax.numpy as jnp
from jax.experimental import pallas as pl
from jax.experimental.pallas import tpu as pltpu

HIDDEN_STATE_SIZE = 768
SPAN_EMB = 512
IN_FEATS = 3 + 2 * HIDDEN_STATE_SIZE  # 1539
SC_PAD = 8          # scalar feature block padded 3 -> 8
OUT_PAD = 128       # lane-dense output width (real output is column 0)


# --------------------------------------------------------------------------- #
# Kernel
# --------------------------------------------------------------------------- #
def _span_pair_kernel(sc1_ref, h1s_ref, h1e_ref, sc2_ref, h2s_ref, h2e_ref,
                      wsc_ref, whs_ref, whe_ref, be_ref,
                      w1a_ref, w1b_ref, b1_ref,
                      w2_ref, b2_ref,
                      w3_ref, b3_ref,
                      w4_ref, b4_ref,
                      out_ref):
    # span embedding: Linear(1539 -> 512) + ReLU, expressed as 3 lane-aligned dots
    def span_embed(sc_ref, hs_ref, he_ref):
        acc = jnp.dot(hs_ref[...], whs_ref[...], preferred_element_type=jnp.float32)
        acc = acc + jnp.dot(he_ref[...], whe_ref[...],
                            preferred_element_type=jnp.float32)
        acc = acc + jnp.dot(sc_ref[...], wsc_ref[...],
                            preferred_element_type=jnp.float32)
        return jnp.maximum(acc + be_ref[...], 0.0)

    e1 = span_embed(sc1_ref, h1s_ref, h1e_ref).astype(jnp.bfloat16)
    e2 = span_embed(sc2_ref, h2s_ref, h2e_ref).astype(jnp.bfloat16)

    # classifier layer 1: Linear(1024 -> 256) + ReLU  (concat expressed as 2 dots)
    h = jnp.maximum(
        jnp.dot(e1, w1a_ref[...], preferred_element_type=jnp.float32)
        + jnp.dot(e2, w1b_ref[...], preferred_element_type=jnp.float32)
        + b1_ref[...], 0.0)

    # classifier layer 2: Linear(256 -> 64) + ReLU
    h = jnp.maximum(
        jnp.dot(h, w2_ref[...], preferred_element_type=jnp.float32) + b2_ref[...],
        0.0)

    # classifier layer 3: Linear(64 -> 16) + ReLU  (padded to 128 lanes)
    h = jnp.maximum(
        jnp.dot(h, w3_ref[...], preferred_element_type=jnp.float32) + b3_ref[...],
        0.0)

    # classifier layer 4: Linear(16 -> 1), padded to a lane-dense (TB, 128) store.
    out_ref[...] = (
        jnp.dot(h, w4_ref[...], preferred_element_type=jnp.float32) + b4_ref[...])


# --------------------------------------------------------------------------- #
# Parameter / input preparation (plain JAX glue)
# --------------------------------------------------------------------------- #
def init_params(key):
    """Deterministic init mimicking PyTorch's default U(-1/sqrt(fan_in), +)."""
    def linear(key, fan_in, fan_out):
        kw, kb = jax.random.split(key)
        bound = 1.0 / jnp.sqrt(float(fan_in))
        w = jax.random.uniform(kw, (fan_in, fan_out), jnp.float32, -bound, bound)
        b = jax.random.uniform(kb, (fan_out,), jnp.float32, -bound, bound)
        return w, b

    k = jax.random.split(key, 5)
    we, be = linear(k[0], IN_FEATS, SPAN_EMB)          # span_embedding
    w1, b1 = linear(k[1], SPAN_EMB * 2, 256)           # classifier[0]
    w2, b2 = linear(k[2], 256, 64)                     # classifier[2]
    w3, b3 = linear(k[3], 64, 16)                      # classifier[4]
    w4, b4 = linear(k[4], 16, 1)                       # classifier[6]
    return dict(we=we, be=be, w1=w1, b1=b1, w2=w2, b2=b2,
                w3=w3, b3=b3, w4=w4, b4=b4)


def prepare_params(params):
    """Split / pad / cast parameters into the kernel-ready layout."""
    we = params["we"]
    wsc = jnp.zeros((SC_PAD, SPAN_EMB), jnp.float32).at[:3].set(we[:3])
    whs = we[3:3 + HIDDEN_STATE_SIZE].astype(jnp.bfloat16)
    whe = we[3 + HIDDEN_STATE_SIZE:].astype(jnp.bfloat16)
    be = params["be"][None, :].astype(jnp.float32)

    w1a = params["w1"][:SPAN_EMB].astype(jnp.bfloat16)
    w1b = params["w1"][SPAN_EMB:].astype(jnp.bfloat16)
    b1 = params["b1"][None, :].astype(jnp.float32)

    w2 = params["w2"].astype(jnp.float32)
    b2 = params["b2"][None, :].astype(jnp.float32)

    w3 = jnp.zeros((64, OUT_PAD), jnp.float32).at[:, :16].set(params["w3"])
    b3 = jnp.zeros((1, OUT_PAD), jnp.float32).at[:, :16].set(params["b3"][None, :])
    w4 = jnp.zeros((OUT_PAD, OUT_PAD), jnp.float32).at[:16, :1].set(params["w4"])
    b4 = jnp.zeros((1, OUT_PAD), jnp.float32).at[:, :1].set(params["b4"][None, :])

    return (wsc, whs, whe, be, w1a, w1b, b1, w2, b2, w3, b3, w4, b4)


def _round_up(x, m):
    return ((x + m - 1) // m) * m


def _choose_tb(batch):
    # one tile for small batches; 512-row tiles otherwise (fits v7x 64 MiB VMEM
    # comfortably: ~3.2 MB/buffer of streamed inputs + ~2.3 MB resident weights)
    if batch <= 512:
        return _round_up(batch, 16)
    return 512


def _scalar_block(start, end, length):
    b = start.shape[0]
    sc = jnp.zeros((b, SC_PAD), jnp.float32)
    sc = sc.at[:, 0].set(start.astype(jnp.float32))
    sc = sc.at[:, 1].set(end.astype(jnp.float32))
    sc = sc.at[:, 2].set(length.astype(jnp.float32))
    return sc


def _pad_rows(x, rows):
    if x.shape[0] == rows:
        return x
    return jnp.pad(x, ((0, rows - x.shape[0]), (0, 0)))


# --------------------------------------------------------------------------- #
# Forward
# --------------------------------------------------------------------------- #
def span_pair_classifier(params,
                         span1_start_pos, span1_end_pos, span1_len,
                         hidden_state_start_span1, hidden_state_end_span1,
                         span2_start_pos, span2_end_pos, span2_len,
                         hidden_state_start_span2, hidden_state_end_span2):
    B = hidden_state_start_span1.shape[0]
    TB = _choose_tb(B)
    Bp = _round_up(B, TB)
    num_blocks = Bp // TB

    # streamed per-batch inputs (scalar features stay f32; hidden states -> bf16)
    sc1 = _pad_rows(_scalar_block(span1_start_pos, span1_end_pos, span1_len), Bp)
    sc2 = _pad_rows(_scalar_block(span2_start_pos, span2_end_pos, span2_len), Bp)
    h1s = _pad_rows(hidden_state_start_span1.astype(jnp.bfloat16), Bp)
    h1e = _pad_rows(hidden_state_end_span1.astype(jnp.bfloat16), Bp)
    h2s = _pad_rows(hidden_state_start_span2.astype(jnp.bfloat16), Bp)
    h2e = _pad_rows(hidden_state_end_span2.astype(jnp.bfloat16), Bp)

    batch_args = (sc1, h1s, h1e, sc2, h2s, h2e)
    weight_args = prepare_params(params)
    args = batch_args + weight_args

    batch_specs = [pl.BlockSpec((TB, a.shape[1]), lambda i: (i, 0))
                   for a in batch_args]
    # weights: full-array blocks with a constant index map -> resident in VMEM
    weight_specs = [pl.BlockSpec(w.shape, lambda i: (0, 0)) for w in weight_args]
    out_spec = pl.BlockSpec((TB, OUT_PAD), lambda i: (i, 0))

    flops_per_row = 2 * (2 * IN_FEATS * SPAN_EMB          # span embedding x2
                         + 2 * SPAN_EMB * 256              # classifier layer 1
                         + 256 * 64 + 64 * 16 + 16 * 1)    # tail
    bytes_accessed = (sum(int(a.size) * a.dtype.itemsize for a in args)
                      + Bp * OUT_PAD * 4)

    out = pl.pallas_call(
        _span_pair_kernel,
        out_shape=jax.ShapeDtypeStruct((Bp, OUT_PAD), jnp.float32),
        grid=(num_blocks,),
        in_specs=batch_specs + weight_specs,
        out_specs=out_spec,
        compiler_params=pltpu.CompilerParams(
            dimension_semantics=("parallel",),
            vmem_limit_bytes=32 * 1024 * 1024),
        cost_estimate=pl.CostEstimate(
            flops=int(Bp * flops_per_row),
            transcendentals=0,
            bytes_accessed=int(bytes_accessed)),
    )(*args)

    return out[:B, :1]


# --------------------------------------------------------------------------- #
# References
# --------------------------------------------------------------------------- #
def _reference_f32(params, inputs):
    """Pure-JAX f32 reference mirroring the PyTorch forward exactly."""
    (s1s, s1e, s1l, h1s, h1e, s2s, s2e, s2l, h2s, h2e) = inputs

    def cat(a, b, c, hs, he):
        return jnp.concatenate([a.astype(jnp.float32)[:, None],
                                b.astype(jnp.float32)[:, None],
                                c.astype(jnp.float32)[:, None],
                                hs.astype(jnp.float32),
                                he.astype(jnp.float32)], axis=1)

    s1 = cat(s1s, s1e, s1l, h1s, h1e)
    s2 = cat(s2s, s2e, s2l, h2s, h2e)
    emb = lambda x: jnp.maximum(x @ params["we"] + params["be"], 0.0)
    e = jnp.concatenate([emb(s1), emb(s2)], axis=1)
    h = jnp.maximum(e @ params["w1"] + params["b1"], 0.0)
    h = jnp.maximum(h @ params["w2"] + params["b2"], 0.0)
    h = jnp.maximum(h @ params["w3"] + params["b3"], 0.0)
    return h @ params["w4"] + params["b4"]


def _reference_mirror(params, inputs):
    """Plain-JAX reference with the same bf16/f32 mixed precision as the kernel."""
    (s1s, s1e, s1l, h1s, h1e, s2s, s2e, s2l, h2s, h2e) = inputs
    (wsc, whs, whe, be, w1a, w1b, b1, w2, b2, w3, b3, w4, b4) = prepare_params(params)

    def emb(sc, hs, he_):
        acc = jnp.dot(hs.astype(jnp.bfloat16), whs, preferred_element_type=jnp.float32)
        acc = acc + jnp.dot(he_.astype(jnp.bfloat16), whe,
                            preferred_element_type=jnp.float32)
        acc = acc + jnp.dot(sc, wsc, preferred_element_type=jnp.float32)
        return jnp.maximum(acc + be, 0.0)

    e1 = emb(_scalar_block(s1s, s1e, s1l), h1s, h1e).astype(jnp.bfloat16)
    e2 = emb(_scalar_block(s2s, s2e, s2l), h2s, h2e).astype(jnp.bfloat16)
    h = jnp.maximum(jnp.dot(e1, w1a, preferred_element_type=jnp.float32)
                    + jnp.dot(e2, w1b, preferred_element_type=jnp.float32) + b1, 0.0)
    h = jnp.maximum(jnp.dot(h, w2, preferred_element_type=jnp.float32) + b2, 0.0)
    h = jnp.maximum(jnp.dot(h, w3, preferred_element_type=jnp.float32) + b3, 0.0)
    out = jnp.dot(h, w4, preferred_element_type=jnp.float32) + b4
    return out[:, :1]


# --------------------------------------------------------------------------- #
# Demo / self-test
# --------------------------------------------------------------------------- #
if __name__ == "__main__":
    key = jax.random.PRNGKey(0)
    kp, k1, k2, k3, k4, k5, k6, k7, k8 = jax.random.split(key, 9)

    B = 16  # small demo batch (sublane aligned)
    params = init_params(kp)

    span1_start = jax.random.randint(k1, (B,), 0, 100)
    span1_end = span1_start + jax.random.randint(k2, (B,), 1, 10)
    span1_len = span1_end - span1_start
    hs_start_1 = jax.random.normal(k3, (B, HIDDEN_STATE_SIZE), jnp.float32)
    hs_end_1 = jax.random.normal(k4, (B, HIDDEN_STATE_SIZE), jnp.float32)

    span2_start = jax.random.randint(k5, (B,), 0, 100)
    span2_end = span2_start + jax.random.randint(k6, (B,), 1, 10)
    span2_len = span2_end - span2_start
    hs_start_2 = jax.random.normal(k7, (B, HIDDEN_STATE_SIZE), jnp.float32) * 0.5
    hs_end_2 = jax.random.normal(k8, (B, HIDDEN_STATE_SIZE), jnp.float32) * 0.5

    inputs = (span1_start, span1_end, span1_len, hs_start_1, hs_end_1,
              span2_start, span2_end, span2_len, hs_start_2, hs_end_2)

    out = span_pair_classifier(params, *inputs)
    out = jax.block_until_ready(out)
    assert out.shape == (B, 1), out.shape

    # Correctness of kernel plumbing (tiling, splits, padding) vs. identical-precision ref.
    mirror = _reference_mirror(params, inputs)
    assert jnp.allclose(out, mirror, atol=2e-3, rtol=2e-3), (
        float(jnp.max(jnp.abs(out - mirror))))

    # Agreement with the full-f32 PyTorch-equivalent forward (bf16 MXU inputs).
    ref = _reference_f32(params, inputs)
    assert jnp.allclose(out, ref, atol=5e-2, rtol=5e-2), (
        float(jnp.max(jnp.abs(out - ref))))

    print("KERNEL_OK")
</pallas_src>

<mosaic_0001>
module attributes {stable_mosaic.version = 11 : i64} {
  func.func @_span_pair_kernel(%arg0: i32, %arg1: memref<16x8xf32, #tpu.memory_space<vmem>>, %arg2: memref<16x768xbf16, #tpu.memory_space<vmem>>, %arg3: memref<16x768xbf16, #tpu.memory_space<vmem>>, %arg4: memref<16x8xf32, #tpu.memory_space<vmem>>, %arg5: memref<16x768xbf16, #tpu.memory_space<vmem>>, %arg6: memref<16x768xbf16, #tpu.memory_space<vmem>>, %arg7: memref<8x512xf32, #tpu.memory_space<vmem>>, %arg8: memref<768x512xbf16, #tpu.memory_space<vmem>>, %arg9: memref<768x512xbf16, #tpu.memory_space<vmem>>, %arg10: memref<1x512xf32, #tpu.memory_space<vmem>>, %arg11: memref<512x256xbf16, #tpu.memory_space<vmem>>, %arg12: memref<512x256xbf16, #tpu.memory_space<vmem>>, %arg13: memref<1x256xf32, #tpu.memory_space<vmem>>, %arg14: memref<256x64xf32, #tpu.memory_space<vmem>>, %arg15: memref<1x64xf32, #tpu.memory_space<vmem>>, %arg16: memref<64x128xf32, #tpu.memory_space<vmem>>, %arg17: memref<1x128xf32, #tpu.memory_space<vmem>>, %arg18: memref<128x128xf32, #tpu.memory_space<vmem>>, %arg19: memref<1x128xf32, #tpu.memory_space<vmem>>, %arg20: memref<16x128xf32, #tpu.memory_space<vmem>>) attributes {dimension_semantics = [#tpu.dimension_semantics<parallel>], iteration_bounds = array<i64: 1>, scalar_prefetch = 0 : i64, scratch_operands = 0 : i64, tpu.core_type = #tpu.core_type<tc>, window_params = [{transform_indices = @transform_0, window_bounds = array<i64: 16, 8>}, {transform_indices = @transform_1, window_bounds = array<i64: 16, 768>}, {transform_indices = @transform_2, window_bounds = array<i64: 16, 768>}, {transform_indices = @transform_3, window_bounds = array<i64: 16, 8>}, {transform_indices = @transform_4, window_bounds = array<i64: 16, 768>}, {transform_indices = @transform_5, window_bounds = array<i64: 16, 768>}, {pipeline_mode = #tpu.pipeline_mode<synchronous>, transform_indices = @transform_6, window_bounds = array<i64: 8, 512>}, {pipeline_mode = #tpu.pipeline_mode<synchronous>, transform_indices = @transform_7, window_bounds = array<i64: 768, 512>}, {pipeline_mode = #tpu.pipeline_mode<synchronous>, transform_indices = @transform_8, window_bounds = array<i64: 768, 512>}, {pipeline_mode = #tpu.pipeline_mode<synchronous>, transform_indices = @transform_9, window_bounds = array<i64: 1, 512>}, {pipeline_mode = #tpu.pipeline_mode<synchronous>, transform_indices = @transform_10, window_bounds = array<i64: 512, 256>}, {pipeline_mode = #tpu.pipeline_mode<synchronous>, transform_indices = @transform_11, window_bounds = array<i64: 512, 256>}, {pipeline_mode = #tpu.pipeline_mode<synchronous>, transform_indices = @transform_12, window_bounds = array<i64: 1, 256>}, {pipeline_mode = #tpu.pipeline_mode<synchronous>, transform_indices = @transform_13, window_bounds = array<i64: 256, 64>}, {pipeline_mode = #tpu.pipeline_mode<synchronous>, transform_indices = @transform_14, window_bounds = array<i64: 1, 64>}, {pipeline_mode = #tpu.pipeline_mode<synchronous>, transform_indices = @transform_15, window_bounds = array<i64: 64, 128>}, {pipeline_mode = #tpu.pipeline_mode<synchronous>, transform_indices = @transform_16, window_bounds = array<i64: 1, 128>}, {pipeline_mode = #tpu.pipeline_mode<synchronous>, transform_indices = @transform_17, window_bounds = array<i64: 128, 128>}, {pipeline_mode = #tpu.pipeline_mode<synchronous>, transform_indices = @transform_18, window_bounds = array<i64: 1, 128>}, {transform_indices = @transform_19, window_bounds = array<i64: 16, 128>}]} {
    %c0 = arith.constant 0 : index
    %c0_0 = arith.constant 0 : index
    %0 = vector.load %arg2[%c0, %c0_0] : memref<16x768xbf16, #tpu.memory_space<vmem>>, vector<16x768xbf16>
    %c0_1 = arith.constant 0 : index
    %c0_2 = arith.constant 0 : index
    %1 = vector.load %arg8[%c0_1, %c0_2] : memref<768x512xbf16, #tpu.memory_space<vmem>>, vector<768x512xbf16>
    %cst = arith.constant dense<0.000000e+00> : vector<16x512xf32>
    %2 = tpu.matmul %0, %1, %cst {dimension_numbers = #tpu.dot_dimension_numbers<[1], [0], [0], [1], [0, 0, 1, 1], [], []>} : vector<16x768xbf16>, vector<768x512xbf16>, vector<16x512xf32> -> vector<16x512xf32>
    %c0_3 = arith.constant 0 : index
    %c0_4 = arith.constant 0 : index
    %3 = vector.load %arg3[%c0_3, %c0_4] : memref<16x768xbf16, #tpu.memory_space<vmem>>, vector<16x768xbf16>
    %c0_5 = arith.constant 0 : index
    %c0_6 = arith.constant 0 : index
    %4 = vector.load %arg9[%c0_5, %c0_6] : memref<768x512xbf16, #tpu.memory_space<vmem>>, vector<768x512xbf16>
    %cst_7 = arith.constant dense<0.000000e+00> : vector<16x512xf32>
    %5 = tpu.matmul %3, %4, %cst_7 {dimension_numbers = #tpu.dot_dimension_numbers<[1], [0], [0], [1], [0, 0, 1, 1], [], []>} : vector<16x768xbf16>, vector<768x512xbf16>, vector<16x512xf32> -> vector<16x512xf32>
    %6 = arith.addf %2, %5 : vector<16x512xf32>
    %c0_8 = arith.constant 0 : index
    %c0_9 = arith.constant 0 : index
    %7 = vector.load %arg1[%c0_8, %c0_9] : memref<16x8xf32, #tpu.memory_space<vmem>>, vector<16x8xf32>
    %c0_10 = arith.constant 0 : index
    %c0_11 = arith.constant 0 : index
    %8 = vector.load %arg7[%c0_10, %c0_11] : memref<8x512xf32, #tpu.memory_space<vmem>>, vector<8x512xf32>
    %cst_12 = arith.constant dense<0.000000e+00> : vector<16x512xf32>
    %9 = tpu.matmul %7, %8, %cst_12 {dimension_numbers = #tpu.dot_dimension_numbers<[1], [0], [0], [1], [0, 0, 1, 1], [], []>} : vector<16x8xf32>, vector<8x512xf32>, vector<16x512xf32> -> vector<16x512xf32>
    %10 = arith.addf %6, %9 : vector<16x512xf32>
    %c0_13 = arith.constant 0 : index
    %c0_14 = arith.constant 0 : index
    %11 = vector.load %arg10[%c0_13, %c0_14] : memref<1x512xf32, #tpu.memory_space<vmem>>, vector<1x512xf32>
    %12 = vector.broadcast %11 : vector<1x512xf32> to vector<16x512xf32>
    %13 = arith.addf %10, %12 : vector<16x512xf32>
    %cst_15 = arith.constant 0.000000e+00 : f32
    %14 = vector.broadcast %cst_15 : f32 to vector<16x512xf32>
    %15 = arith.maximumf %13, %14 : vector<16x512xf32>
    %16 = arith.truncf %15 : vector<16x512xf32> to vector<16x512xbf16>
    %c0_16 = arith.constant 0 : index
    %c0_17 = arith.constant 0 : index
    %17 = vector.load %arg5[%c0_16, %c0_17] : memref<16x768xbf16, #tpu.memory_space<vmem>>, vector<16x768xbf16>
    %c0_18 = arith.constant 0 : index
    %c0_19 = arith.constant 0 : index
    %18 = vector.load %arg8[%c0_18, %c0_19] : memref<768x512xbf16, #tpu.memory_space<vmem>>, vector<768x512xbf16>
    %cst_20 = arith.constant dense<0.000000e+00> : vector<16x512xf32>
    %19 = tpu.matmul %17, %18, %cst_20 {dimension_numbers = #tpu.dot_dimension_numbers<[1], [0], [0], [1], [0, 0, 1, 1], [], []>} : vector<16x768xbf16>, vector<768x512xbf16>, vector<16x512xf32> -> vector<16x512xf32>
    %c0_21 = arith.constant 0 : index
    %c0_22 = arith.constant 0 : index
    %20 = vector.load %arg6[%c0_21, %c0_22] : memref<16x768xbf16, #tpu.memory_space<vmem>>, vector<16x768xbf16>
    %c0_23 = arith.constant 0 : index
    %c0_24 = arith.constant 0 : index
    %21 = vector.load %arg9[%c0_23, %c0_24] : memref<768x512xbf16, #tpu.memory_space<vmem>>, vector<768x512xbf16>
    %cst_25 = arith.constant dense<0.000000e+00> : vector<16x512xf32>
    %22 = tpu.matmul %20, %21, %cst_25 {dimension_numbers = #tpu.dot_dimension_numbers<[1], [0], [0], [1], [0, 0, 1, 1], [], []>} : vector<16x768xbf16>, vector<768x512xbf16>, vector<16x512xf32> -> vector<16x512xf32>
    %23 = arith.addf %19, %22 : vector<16x512xf32>
    %c0_26 = arith.constant 0 : index
    %c0_27 = arith.constant 0 : index
    %24 = vector.load %arg4[%c0_26, %c0_27] : memref<16x8xf32, #tpu.memory_space<vmem>>, vector<16x8xf32>
    %c0_28 = arith.constant 0 : index
    %c0_29 = arith.constant 0 : index
    %25 = vector.load %arg7[%c0_28, %c0_29] : memref<8x512xf32, #tpu.memory_space<vmem>>, vector<8x512xf32>
    %cst_30 = arith.constant dense<0.000000e+00> : vector<16x512xf32>
    %26 = tpu.matmul %24, %25, %cst_30 {dimension_numbers = #tpu.dot_dimension_numbers<[1], [0], [0], [1], [0, 0, 1, 1], [], []>} : vector<16x8xf32>, vector<8x512xf32>, vector<16x512xf32> -> vector<16x512xf32>
    %27 = arith.addf %23, %26 : vector<16x512xf32>
    %c0_31 = arith.constant 0 : index
    %c0_32 = arith.constant 0 : index
    %28 = vector.load %arg10[%c0_31, %c0_32] : memref<1x512xf32, #tpu.memory_space<vmem>>, vector<1x512xf32>
    %29 = vector.broadcast %28 : vector<1x512xf32> to vector<16x512xf32>
    %30 = arith.addf %27, %29 : vector<16x512xf32>
    %cst_33 = arith.constant 0.000000e+00 : f32
    %31 = vector.broadcast %cst_33 : f32 to vector<16x512xf32>
    %32 = arith.maximumf %30, %31 : vector<16x512xf32>
    %33 = arith.truncf %32 : vector<16x512xf32> to vector<16x512xbf16>
    %c0_34 = arith.constant 0 : index
    %c0_35 = arith.constant 0 : index
    %34 = vector.load %arg11[%c0_34, %c0_35] : memref<512x256xbf16, #tpu.memory_space<vmem>>, vector<512x256xbf16>
    %cst_36 = arith.constant dense<0.000000e+00> : vector<16x256xf32>
    %35 = tpu.matmul %16, %34, %cst_36 {dimension_numbers = #tpu.dot_dimension_numbers<[1], [0], [0], [1], [0, 0, 1, 1], [], []>} : vector<16x512xbf16>, vector<512x256xbf16>, vector<16x256xf32> -> vector<16x256xf32>
    %c0_37 = arith.constant 0 : index
    %c0_38 = arith.constant 0 : index
    %36 = vector.load %arg12[%c0_37, %c0_38] : memref<512x256xbf16, #tpu.memory_space<vmem>>, vector<512x256xbf16>
    %cst_39 = arith.constant dense<0.000000e+00> : vector<16x256xf32>
    %37 = tpu.matmul %33, %36, %cst_39 {dimension_numbers = #tpu.dot_dimension_numbers<[1], [0], [0], [1], [0, 0, 1, 1], [], []>} : vector<16x512xbf16>, vector<512x256xbf16>, vector<16x256xf32> -> vector<16x256xf32>
    %38 = arith.addf %35, %37 : vector<16x256xf32>
    %c0_40 = arith.constant 0 : index
    %c0_41 = arith.constant 0 : index
    %39 = vector.load %arg13[%c0_40, %c0_41] : memref<1x256xf32, #tpu.memory_space<vmem>>, vector<1x256xf32>
    %40 = vector.broadcast %39 : vector<1x256xf32> to vector<16x256xf32>
    %41 = arith.addf %38, %40 : vector<16x256xf32>
    %cst_42 = arith.constant 0.000000e+00 : f32
    %42 = vector.broadcast %cst_42 : f32 to vector<16x256xf32>
    %43 = arith.maximumf %41, %42 : vector<16x256xf32>
    %c0_43 = arith.constant 0 : index
    %c0_44 = arith.constant 0 : index
    %44 = vector.load %arg14[%c0_43, %c0_44] : memref<256x64xf32, #tpu.memory_space<vmem>>, vector<256x64xf32>
    %cst_45 = arith.constant dense<0.000000e+00> : vector<16x64xf32>
    %45 = tpu.matmul %43, %44, %cst_45 {dimension_numbers = #tpu.dot_dimension_numbers<[1], [0], [0], [1], [0, 0, 1, 1], [], []>} : vector<16x256xf32>, vector<256x64xf32>, vector<16x64xf32> -> vector<16x64xf32>
    %c0_46 = arith.constant 0 : index
    %c0_47 = arith.constant 0 : index
    %46 = vector.load %arg15[%c0_46, %c0_47] : memref<1x64xf32, #tpu.memory_space<vmem>>, vector<1x64xf32>
    %47 = vector.broadcast %46 : vector<1x64xf32> to vector<16x64xf32>
    %48 = arith.addf %45, %47 : vector<16x64xf32>
    %cst_48 = arith.constant 0.000000e+00 : f32
    %49 = vector.broadcast %cst_48 : f32 to vector<16x64xf32>
    %50 = arith.maximumf %48, %49 : vector<16x64xf32>
    %c0_49 = arith.constant 0 : index
    %c0_50 = arith.constant 0 : index
    %51 = vector.load %arg16[%c0_49, %c0_50] : memref<64x128xf32, #tpu.memory_space<vmem>>, vector<64x128xf32>
    %cst_51 = arith.constant dense<0.000000e+00> : vector<16x128xf32>
    %52 = tpu.matmul %50, %51, %cst_51 {dimension_numbers = #tpu.dot_dimension_numbers<[1], [0], [0], [1], [0, 0, 1, 1], [], []>} : vector<16x64xf32>, vector<64x128xf32>, vector<16x128xf32> -> vector<16x128xf32>
    %c0_52 = arith.constant 0 : index
    %c0_53 = arith.constant 0 : index
    %53 = vector.load %arg17[%c0_52, %c0_53] : memref<1x128xf32, #tpu.memory_space<vmem>>, vector<1x128xf32>
    %54 = vector.broadcast %53 : vector<1x128xf32> to vector<16x128xf32>
    %55 = arith.addf %52, %54 : vector<16x128xf32>
    %cst_54 = arith.constant 0.000000e+00 : f32
    %56 = vector.broadcast %cst_54 : f32 to vector<16x128xf32>
    %57 = arith.maximumf %55, %56 : vector<16x128xf32>
    %c0_55 = arith.constant 0 : index
    %c0_56 = arith.constant 0 : index
    %58 = vector.load %arg18[%c0_55, %c0_56] : memref<128x128xf32, #tpu.memory_space<vmem>>, vector<128x128xf32>
    %cst_57 = arith.constant dense<0.000000e+00> : vector<16x128xf32>
    %59 = tpu.matmul %57, %58, %cst_57 {dimension_numbers = #tpu.dot_dimension_numbers<[1], [0], [0], [1], [0, 0, 1, 1], [], []>} : vector<16x128xf32>, vector<128x128xf32>, vector<16x128xf32> -> vector<16x128xf32>
    %c0_58 = arith.constant 0 : index
    %c0_59 = arith.constant 0 : index
    %60 = vector.load %arg19[%c0_58, %c0_59] : memref<1x128xf32, #tpu.memory_space<vmem>>, vector<1x128xf32>
    %61 = vector.broadcast %60 : vector<1x128xf32> to vector<16x128xf32>
    %62 = arith.addf %59, %61 : vector<16x128xf32>
    %c0_60 = arith.constant 0 : index
    %c0_61 = arith.constant 0 : index
    %63 = vector.load %arg20[%c0_60, %c0_61] : memref<16x128xf32, #tpu.memory_space<vmem>>, vector<16x128xf32>
    tpu.vector_store %arg20[%c0_60, %c0_61], %62 {strides = array<i32>} : memref<16x128xf32, #tpu.memory_space<vmem>>, vector<16x128xf32>,
    return
  }
  func.func @transform_0(%arg0: i32) -> (i32, i32) {
    %c0_i32 = arith.constant 0 : i32
    %c0_i32_0 = arith.constant 0 : i32
    return %arg0, %c0_i32 : i32, i32
  }
  func.func @transform_1(%arg0: i32) -> (i32, i32) {
    %c0_i32 = arith.constant 0 : i32
    %c0_i32_0 = arith.constant 0 : i32
    return %arg0, %c0_i32 : i32, i32
  }
  func.func @transform_2(%arg0: i32) -> (i32, i32) {
    %c0_i32 = arith.constant 0 : i32
    %c0_i32_0 = arith.constant 0 : i32
    return %arg0, %c0_i32 : i32, i32
  }
  func.func @transform_3(%arg0: i32) -> (i32, i32) {
    %c0_i32 = arith.constant 0 : i32
    %c0_i32_0 = arith.constant 0 : i32
    return %arg0, %c0_i32 : i32, i32
  }
  func.func @transform_4(%arg0: i32) -> (i32, i32) {
    %c0_i32 = arith.constant 0 : i32
    %c0_i32_0 = arith.constant 0 : i32
    return %arg0, %c0_i32 : i32, i32
  }
  func.func @transform_5(%arg0: i32) -> (i32, i32) {
    %c0_i32 = arith.constant 0 : i32
    %c0_i32_0 = arith.constant 0 : i32
    return %arg0, %c0_i32 : i32, i32
  }
  func.func @transform_6(%arg0: i32) -> (i32, i32) {
    %c0_i32 = arith.constant 0 : i32
    %c0_i32_0 = arith.constant 0 : i32
    %c0_i32_1 = arith.constant 0 : i32
    return %c0_i32, %c0_i32_0 : i32, i32
  }
  func.func @transform_7(%arg0: i32) -> (i32, i32) {
    %c0_i32 = arith.constant 0 : i32
    %c0_i32_0 = arith.constant 0 : i32
    %c0_i32_1 = arith.constant 0 : i32
    return %c0_i32, %c0_i32_0 : i32, i32
  }
  func.func @transform_8(%arg0: i32) -> (i32, i32) {
    %c0_i32 = arith.constant 0 : i32
    %c0_i32_0 = arith.constant 0 : i32
    %c0_i32_1 = arith.constant 0 : i32
    return %c0_i32, %c0_i32_0 : i32, i32
  }
  func.func @transform_9(%arg0: i32) -> (i32, i32) {
    %c0_i32 = arith.constant 0 : i32
    %c0_i32_0 = arith.constant 0 : i32
    %c0_i32_1 = arith.constant 0 : i32
    return %c0_i32, %c0_i32_0 : i32, i32
  }
  func.func @transform_10(%arg0: i32) -> (i32, i32) {
    %c0_i32 = arith.constant 0 : i32
    %c0_i32_0 = arith.constant 0 : i32
    %c0_i32_1 = arith.constant 0 : i32
    return %c0_i32, %c0_i32_0 : i32, i32
  }
  func.func @transform_11(%arg0: i32) -> (i32, i32) {
    %c0_i32 = arith.constant 0 : i32
    %c0_i32_0 = arith.constant 0 : i32
    %c0_i32_1 = arith.constant 0 : i32
    return %c0_i32, %c0_i32_0 : i32, i32
  }
  func.func @transform_12(%arg0: i32) -> (i32, i32) {
    %c0_i32 = arith.constant 0 : i32
    %c0_i32_0 = arith.constant 0 : i32
    %c0_i32_1 = arith.constant 0 : i32
    return %c0_i32, %c0_i32_0 : i32, i32
  }
  func.func @transform_13(%arg0: i32) -> (i32, i32) {
    %c0_i32 = arith.constant 0 : i32
    %c0_i32_0 = arith.constant 0 : i32
    %c0_i32_1 = arith.constant 0 : i32
    return %c0_i32, %c0_i32_0 : i32, i32
  }
  func.func @transform_14(%arg0: i32) -> (i32, i32) {
    %c0_i32 = arith.constant 0 : i32
    %c0_i32_0 = arith.constant 0 : i32
    %c0_i32_1 = arith.constant 0 : i32
    return %c0_i32, %c0_i32_0 : i32, i32
  }
  func.func @transform_15(%arg0: i32) -> (i32, i32) {
    %c0_i32 = arith.constant 0 : i32
    %c0_i32_0 = arith.constant 0 : i32
    %c0_i32_1 = arith.constant 0 : i32
    return %c0_i32, %c0_i32_0 : i32, i32
  }
  func.func @transform_16(%arg0: i32) -> (i32, i32) {
    %c0_i32 = arith.constant 0 : i32
    %c0_i32_0 = arith.constant 0 : i32
    %c0_i32_1 = arith.constant 0 : i32
    return %c0_i32, %c0_i32_0 : i32, i32
  }
  func.func @transform_17(%arg0: i32) -> (i32, i32) {
    %c0_i32 = arith.constant 0 : i32
    %c0_i32_0 = arith.constant 0 : i32
    %c0_i32_1 = arith.constant 0 : i32
    return %c0_i32, %c0_i32_0 : i32, i32
  }
  func.func @transform_18(%arg0: i32) -> (i32, i32) {
    %c0_i32 = arith.constant 0 : i32
    %c0_i32_0 = arith.constant 0 : i32
    %c0_i32_1 = arith.constant 0 : i32
    return %c0_i32, %c0_i32_0 : i32, i32
  }
  func.func @transform_19(%arg0: i32) -> (i32, i32) {
    %c0_i32 = arith.constant 0 : i32
    %c0_i32_0 = arith.constant 0 : i32
    return %arg0, %c0_i32 : i32, i32
  }
}

</mosaic_0001>

<bundles_post_ra>
// kernel: tpu_custom_call.1
= control target key start
LH: loop header
LB: loop body
LE: loop exit
PB: predicated region body
PF: predicated region fallthrough
CT: control target
= control target key end

     0   :  { %s8248_s0 = inlined_call_operand.vmem [shape: f32[16,8], index: 0, kind: input, shape index: {}]   ;;  %s8249_s1 = inlined_call_operand.vmem [shape: bf16[16,768], index: 1, kind: input, shape index: {}]   ;;  %s8250_s2 = inlined_call_operand.vmem [shape: bf16[16,768], index: 2, kind: input, shape index: {}]   ;;  %s8251_s3 = inlined_call_operand.vmem [shape: f32[16,8], index: 3, kind: input, shape index: {}]   ;;  %s8252_s4 = inlined_call_operand.vmem [shape: bf16[16,768], index: 4, kind: input, shape index: {}]   ;;  %s8253_s5 = inlined_call_operand.vmem [shape: bf16[16,768], index: 5, kind: input, shape index: {}]   ;;  %s8254_s6 = inlined_call_operand.vmem [shape: f32[8,512], index: 6, kind: input, shape index: {}]   ;;  %s8255_s7 = inlined_call_operand.hbm [shape: bf16[768,512], index: 7, kind: input, shape index: {}]   ;;  %s8256_s8 = inlined_call_operand.hbm [shape: bf16[768,512], index: 8, kind: input, shape index: {}]   ;;  %s8257_s9 = inlined_call_operand.vmem [shape: f32[1,512], index: 9, kind: input, shape index: {}]   ;;  %s8258_s10 = inlined_call_operand.hbm [shape: bf16[512,256], index: 10, kind: input, shape index: {}]   ;;  %s8259_s11 = inlined_call_operand.hbm [shape: bf16[512,256], index: 11, kind: input, shape index: {}]   ;;  %s8260_s12 = inlined_call_operand.vmem [shape: f32[1,256], index: 12, kind: input, shape index: {}]   ;;  %s8261_s13 = inlined_call_operand.vmem [shape: f32[256,64], index: 13, kind: input, shape index: {}]   ;;  %s8262_s14 = inlined_call_operand.vmem [shape: f32[1,64], index: 14, kind: input, shape index: {}]   ;;  %s8263_s15 = inlined_call_operand.vmem [shape: f32[64,128], index: 15, kind: input, shape index: {}]   ;;  %s8264_s16 = inlined_call_operand.vmem [shape: f32[1,128], index: 16, kind: input, shape index: {}]   ;;  %s8265_s17 = inlined_call_operand.vmem [shape: f32[128,128], index: 17, kind: input, shape index: {}]   ;;  %s8266_s18 = inlined_call_operand.vmem [shape: f32[1,128], index: 18, kind: input, shape index: {}]   ;;  %s8267_s19 = inlined_call_operand.hbm [shape: f32[16,128], index: 19, kind: output, shape index: {}]  }
   0x1   :  { %8287 = sst [smem:[#allocation25_spill]] %s8248_s0 }
   0x2   :  { %8288 = sst [smem:[#allocation26_spill]] %s8249_s1 }
   0x3   :  { %8289 = sst [smem:[#allocation27_spill]] %s8250_s2 }
   0x4   :  { %8290 = sst [smem:[#allocation28_spill]] %s8251_s3 }
   0x5   :  { %24 = vsyncpa [#allocation3], 0 }
   0x6   :  { %25 = vsyncpa [#allocation6], 0 }
   0x7   :  { %26 = vsyncpa [#allocation9], 0 }
   0x8   :  { %27 = vsyncpa [#allocation4], 0  ;;  %s7420_s0 = smov [#allocation5]   ;;  %s7421_s20 = smov [#allocation2]  }
   0x9   :  { %s59_s30 = sshll.u32 %s7420_s0, 4  ;;  %s47_s21 = sshll.u32 %s7421_s20, 4  ;;  %s60_s30 = int_to_ptr.vmem [resolvable:$true] %s59_s30  ;;  %s7530_s21 = int_to_ptr.vmem [resolvable:$true] %s47_s21 }
   0xa   :  { %s7302_s2 = scalar_lea.hbm %s8256_s8, 24576 }
   0xb   :  { %p7303_p0 = scmp.ne.s32.totalorder %s8256_s8, %s7302_s2  ;;  %p7306_p1 = scmp.lt.u32.totalorder %s7302_s2, %s8256_s8 }
   0xd   :  { %p7308_p2 = pnand %p7306_p1, %p7303_p0 }
   0xf   :  { %7311 = shalt.err (!%p7308_p2)
}
  0x10   :  { %s7312_s26 = scalar_lea.vmem %s60_s30, 24576  ;;  %p7317_p4 = scmp.lt.s32.totalorder %s60_s30, %s60_s30 }
  0x11   :  { %p7313_p3 = scmp.ne.s32.totalorder %s60_s30, %s7312_s26  ;;  %p7318_p5 = scmp.lt.s32.totalorder %s7312_s26, %s7312_s26 }
  0x13   :  { %p7319_p6 = por %p7318_p5, %p7317_p4 }
  0x15   :  { %p7320_p7 = pnand %p7319_p6, %p7313_p3 }
  0x17   :  { %7323 = shalt.err (!%p7320_p7)
}
  0x18   :  { %s7422_s27 = smov 256   ;;  %s7423_s28 = smov 16  }
  0x19   :  { %65 = dma.hbm_to_vmem [thread:$0]  %s8256_s8, 24576, %s60_s30, [#allocation6], %s7422_s27, %s7422_s27, %s7423_s28  }
  0x1a   :  { %s7324_s22 = scalar_lea.hbm %s8255_s7, 24576 }
  0x1b   :  { %p7325_p8 = scmp.ne.s32.totalorder %s8255_s7, %s7324_s22  ;;  %p7328_p9 = scmp.lt.u32.totalorder %s7324_s22, %s8255_s7 }
  0x1d   :  { %p7330_p10 = pnand %p7328_p9, %p7325_p8 }
  0x1f   :  { %7333 = shalt.err (!%p7330_p10)
}
  0x20   :  { %s7334_s3 = scalar_lea.vmem %s7530_s21, 24576  ;;  %p7339_p12 = scmp.lt.s32.totalorder %s7530_s21, %s7530_s21 }
  0x21   :  { %p7335_p11 = scmp.ne.s32.totalorder %s7530_s21, %s7334_s3  ;;  %p7340_p13 = scmp.lt.s32.totalorder %s7334_s3, %s7334_s3 }
  0x23   :  { %p7341_p0 = por %p7340_p13, %p7339_p12 }
  0x25   :  { %p7342_p1 = pnand %p7341_p0, %p7335_p11 }
  0x27   :  { %7345 = shalt.err (!%p7342_p1)
}
  0x28   :  { %53 = dma.hbm_to_vmem [thread:$0]  %s8255_s7, 24576, %s7530_s21, [#allocation3], %s7422_s27, %s7422_s27, %s7423_s28  }
  0x29   :  { %s7424_s26 = smov [#allocation7]   ;;  %s7346_s1 = scalar_lea.hbm %s8258_s10, 8192 }
  0x2a   :  { %s73_s29 = sshll.u32 %s7424_s26, 4  ;;  %p7347_p2 = scmp.ne.s32.totalorder %s8258_s10, %s7346_s1  ;;  %s74_s29 = int_to_ptr.vmem [resolvable:$true] %s73_s29 }
  0x2b   :  { %p7350_p3 = scmp.lt.u32.totalorder %s7346_s1, %s8258_s10 }
  0x2d   :  { %p7352_p4 = pnand %p7350_p3, %p7347_p2 }
  0x2f   :  { %7355 = shalt.err (!%p7352_p4)
}
  0x30   :  { %s7356_s25 = scalar_lea.vmem %s74_s29, 8192  ;;  %p7361_p6 = scmp.lt.s32.totalorder %s74_s29, %s74_s29 }
  0x31   :  { %p7357_p5 = scmp.ne.s32.totalorder %s74_s29, %s7356_s25  ;;  %p7362_p7 = scmp.lt.s32.totalorder %s7356_s25, %s7356_s25 }
  0x33   :  { %p7363_p8 = por %p7362_p7, %p7361_p6 }
  0x35   :  { %p7364_p9 = pnand %p7363_p8, %p7357_p5 }
  0x37   :  { %7367 = shalt.err (!%p7364_p9)
}
  0x38   :  { %s7425_s7 = smov 128   ;;  %s7426_s21 = smov 8  }
  0x39   :  { %79 = dma.hbm_to_vmem [thread:$0]  %s8258_s10, 8192, %s74_s29, [#allocation6], %s7425_s7, %s7425_s7, %s7426_s21  }
  0x3a   :  { %s7427_s3 = smov [#allocation8]   ;;  %s7368_s0 = scalar_lea.hbm %s8259_s11, 8192 }
  0x3b   :  { %s85_s8 = sshll.u32 %s7427_s3, 4  ;;  %p7369_p10 = scmp.ne.s32.totalorder %s8259_s11, %s7368_s0  ;;  %s86_s8 = int_to_ptr.vmem [resolvable:$true] %s85_s8 }
  0x3c   :  { %p7372_p11 = scmp.lt.u32.totalorder %s7368_s0, %s8259_s11 }
  0x3e   :  { %p7374_p12 = pnand %p7372_p11, %p7369_p10 }
  0x40   :  { %7377 = shalt.err (!%p7374_p12)
}
  0x41   :  { %s7378_s23 = scalar_lea.vmem %s86_s8, 8192  ;;  %p7383_p0 = scmp.lt.s32.totalorder %s86_s8, %s86_s8 }
  0x42   :  { %p7379_p13 = scmp.ne.s32.totalorder %s86_s8, %s7378_s23  ;;  %p7384_p1 = scmp.lt.s32.totalorder %s7378_s23, %s7378_s23 }
  0x44   :  { %p7385_p2 = por %p7384_p1, %p7383_p0 }
  0x46   :  { %p7386_p3 = pnand %p7385_p2, %p7379_p13 }
  0x48   :  { %7389 = shalt.err (!%p7386_p3)
}
  0x49   :  { %91 = dma.hbm_to_vmem [thread:$0]  %s8259_s11, 8192, %s86_s8, [#allocation9], %s7425_s7, %s7425_s7, %s7426_s21  }
  0x4a   :  { %7412 = dma.done.wait [#allocation3], 24576  }
  0x4b   :  { %7413 = vsyncadd [#allocation3], 4294942720 }
  0x4c   :  { %7414 = dma.done.wait [#allocation6], 32768  }
  0x4d   :  { %7415 = vsyncadd [#allocation6], 4294934528 }
  0x4e   :  { %7416 = dma.done.wait [#allocation9], 8192  }
  0x4f   :  { %7417 = vsyncadd [#allocation9], 4294959104  ;;  %v6150_v0 = vld [vmem:[#allocation5 + $0x4] ss:$16 sps:$4 sm:$0xff]   ;;  %v6154_v2 = vld [vmem:[#allocation5] ss:$16 sps:$4 sm:$0xff]  }
  0x50   :  { %v6152_v1 = vld [vmem:[#allocation5 + $0x204] ss:$16 sps:$4 sm:$0xff]   ;;  %1504 = vmatprep.subr.bf16.mxu1 %v6150_v0  ;;  %v6155_v3 = vld [vmem:[#allocation5 + $0x200] ss:$16 sps:$4 sm:$0xff]   ;;  %s8291_s25 = sld [smem:[#allocation27_spill]]  ;;  %s8292_s10 = sld [smem:[#allocation26_spill]] }
  0x51   :  { %1547 = vmatprep.subr.bf16.mxu0 %v6152_v1  ;;  %v6156_v4 = vld [vmem:[#allocation5 + $0x24] ss:$16 sps:$4 sm:$0xff]   ;;  %1505 = vmatpush1.bf16.msra.mxu1 %v6154_v2  ;;  %v6160_v6 = vld [vmem:[#allocation5 + $0x20] ss:$16 sps:$4 sm:$0xff]   ;;  %s8301_s23 = sld [smem:[#allocation25_spill]]  ;;  %vm3016_vm0 = vcmask 64512  }
  0x52   :  { %1548 = vmatpush1.bf16.msra.mxu0 %v6155_v3  ;;  %v6158_v5 = vld [vmem:[#allocation5 + $0x224] ss:$16 sps:$4 sm:$0xff]   ;;  %1506 = vmatprep.subr.bf16.mxu1 %v6156_v4  ;;  %v6161_v7 = vld [vmem:[#allocation5 + $0x220] ss:$16 sps:$4 sm:$0xff]   ;;  %v6257_v3 = vld [vmem:[#allocation5 + $0xc] ss:$16 sps:$4 sm:$0xff]  }
  0x53   :  { %1549 = vmatprep.subr.bf16.mxu0 %v6158_v5  ;;  %v6162_v8 = vld [vmem:[#allocation5 + $0x44] ss:$16 sps:$4 sm:$0xff]   ;;  %v6166_v10 = vld [vmem:[#allocation5 + $0x40] ss:$16 sps:$4 sm:$0xff]   ;;  %s8313_s29 = sld [smem:[#allocation28_spill]]  ;;  %vm5096_vm1 = vcmask 523264  }
  0x54   :  { %v6164_v9 = vld [vmem:[#allocation5 + $0x244] ss:$16 sps:$4 sm:$0xff]   ;;  %v6167_v11 = vld [vmem:[#allocation5 + $0x240] ss:$16 sps:$4 sm:$0xff]  }
  0x55   :  { %1507 = vmatpush1.bf16.msra.mxu1 %v6160_v6  ;;  %v6168_v12 = vld [vmem:[#allocation5 + $0x64] ss:$16 sps:$4 sm:$0xff]   ;;  %v6172_v14 = vld [vmem:[#allocation5 + $0x60] ss:$16 sps:$4 sm:$0xff]  }
  0x56   :  { %1550 = vmatpush1.bf16.msra.mxu0 %v6161_v7  ;;  %1508 = vmatprep.subr.bf16.mxu1 %v6162_v8  ;;  %v6170_v13 = vld [vmem:[#allocation5 + $0x264] ss:$16 sps:$4 sm:$0xff]   ;;  %v6173_v15 = vld [vmem:[#allocation5 + $0x260] ss:$16 sps:$4 sm:$0xff]   ;;  %v6255_v7 = vld [vmem:[#allocation5 + $0x8] ss:$16 sps:$4 sm:$0xff]  }
  0x57   :  { %1551 = vmatprep.subr.bf16.mxu0 %v6164_v9  ;;  %v6174_v16 = vld [vmem:[#allocation5 + $0x84] ss:$16 sps:$4 sm:$0xff]   ;;  %v6178_v18 = vld [vmem:[#allocation5 + $0x80] ss:$16 sps:$4 sm:$0xff]   ;;  %v6263_v9 = vld [vmem:[#allocation5 + $0x2c] ss:$16 sps:$4 sm:$0xff]  }
  0x58   :  { %v6176_v17 = vld [vmem:[#allocation5 + $0x284] ss:$16 sps:$4 sm:$0xff]   ;;  %v6179_v19 = vld [vmem:[#allocation5 + $0x280] ss:$16 sps:$4 sm:$0xff]  }
  0x59   :  { %1509 = vmatpush1.bf16.msra.mxu1 %v6166_v10  ;;  %v6180_v20 = vld [vmem:[#allocation5 + $0xa4] ss:$16 sps:$4 sm:$0xff]   ;;  %v6184_v22 = vld [vmem:[#allocation5 + $0xa0] ss:$16 sps:$4 sm:$0xff]  }
  0x5a   :  { %1552 = vmatpush1.bf16.msra.mxu0 %v6167_v11  ;;  %1510 = vmatprep.subr.bf16.mxu1 %v6168_v12  ;;  %v6182_v21 = vld [vmem:[#allocation5 + $0x2a4] ss:$16 sps:$4 sm:$0xff]   ;;  %v6185_v23 = vld [vmem:[#allocation5 + $0x2a0] ss:$16 sps:$4 sm:$0xff]   ;;  %v6261_v11 = vld [vmem:[#allocation5 + $0x28] ss:$16 sps:$4 sm:$0xff]  }
  0x5b   :  { %1553 = vmatprep.subr.bf16.mxu0 %v6170_v13  ;;  %v6186_v24 = vld [vmem:[#allocation5 + $0xc4] ss:$16 sps:$4 sm:$0xff]   ;;  %v6190_v26 = vld [vmem:[#allocation5 + $0xc0] ss:$16 sps:$4 sm:$0xff]   ;;  %v6269_v13 = vld [vmem:[#allocation5 + $0x4c] ss:$16 sps:$4 sm:$0xff]  }
  0x5c   :  { %v6188_v25 = vld [vmem:[#allocation5 + $0x2c4] ss:$16 sps:$4 sm:$0xff]   ;;  %v6191_v27 = vld [vmem:[#allocation5 + $0x2c0] ss:$16 sps:$4 sm:$0xff]  }
  0x5d   :  { %1511 = vmatpush1.bf16.msra.mxu1 %v6172_v14  ;;  %v6192_v28 = vld [vmem:[#allocation5 + $0xe4] ss:$16 sps:$4 sm:$0xff]   ;;  %v6196_v30 = vld [vmem:[#allocation5 + $0xe0] ss:$16 sps:$4 sm:$0xff]  }
  0x5e   :  { %1554 = vmatpush1.bf16.msra.mxu0 %v6173_v15  ;;  %1512 = vmatprep.subr.bf16.mxu1 %v6174_v16  ;;  %v6194_v29 = vld [vmem:[#allocation5 + $0x2e4] ss:$16 sps:$4 sm:$0xff]   ;;  %v6197_v31 = vld [vmem:[#allocation5 + $0x2e0] ss:$16 sps:$4 sm:$0xff]   ;;  %v6267_v15 = vld [vmem:[#allocation5 + $0x48] ss:$16 sps:$4 sm:$0xff]  }
  0x5f   :  { %1555 = vmatprep.subr.bf16.mxu0 %v6176_v17  ;;  %v6198_v32 = vld [vmem:[#allocation5 + $0x104] ss:$16 sps:$4 sm:$0xff]   ;;  %v6202_v34 = vld [vmem:[#allocation5 + $0x100] ss:$16 sps:$4 sm:$0xff]   ;;  %v6275_v17 = vld [vmem:[#allocation5 + $0x6c] ss:$16 sps:$4 sm:$0xff]  }
  0x60   :  { %v6200_v33 = vld [vmem:[#allocation5 + $0x304] ss:$16 sps:$4 sm:$0xff]   ;;  %v6203_v35 = vld [vmem:[#allocation5 + $0x300] ss:$16 sps:$4 sm:$0xff]  }
  0x61   :  { %1513 = vmatpush1.bf16.msra.mxu1 %v6178_v18  ;;  %v6204_v36 = vld [vmem:[#allocation5 + $0x124] ss:$16 sps:$4 sm:$0xff]   ;;  %v6208_v38 = vld [vmem:[#allocation5 + $0x120] ss:$16 sps:$4 sm:$0xff]  }
  0x62   :  { %1556 = vmatpush1.bf16.msra.mxu0 %v6179_v19  ;;  %1514 = vmatprep.subr.bf16.mxu1 %v6180_v20  ;;  %v6206_v37 = vld [vmem:[#allocation5 + $0x324] ss:$16 sps:$4 sm:$0xff]   ;;  %v6209_v39 = vld [vmem:[#allocation5 + $0x320] ss:$16 sps:$4 sm:$0xff]   ;;  %v6273_v19 = vld [vmem:[#allocation5 + $0x68] ss:$16 sps:$4 sm:$0xff]  }
  0x63   :  { %1557 = vmatprep.subr.bf16.mxu0 %v6182_v21  ;;  %v6210_v40 = vld [vmem:[#allocation5 + $0x144] ss:$16 sps:$4 sm:$0xff]   ;;  %v6214_v42 = vld [vmem:[#allocation5 + $0x140] ss:$16 sps:$4 sm:$0xff]   ;;  %v6281_v21 = vld [vmem:[#allocation5 + $0x8c] ss:$16 sps:$4 sm:$0xff]  }
  0x64   :  { %v6212_v41 = vld [vmem:[#allocation5 + $0x344] ss:$16 sps:$4 sm:$0xff]   ;;  %v6215_v43 = vld [vmem:[#allocation5 + $0x340] ss:$16 sps:$4 sm:$0xff]  }
  0x65   :  { %1515 = vmatpush1.bf16.msra.mxu1 %v6184_v22  ;;  %v6216_v44 = vld [vmem:[#allocation5 + $0x164] ss:$16 sps:$4 sm:$0xff]   ;;  %v6220_v46 = vld [vmem:[#allocation5 + $0x160] ss:$16 sps:$4 sm:$0xff]  }
  0x66   :  { %1558 = vmatpush1.bf16.msra.mxu0 %v6185_v23  ;;  %1516 = vmatprep.subr.bf16.mxu1 %v6186_v24  ;;  %v6218_v45 = vld [vmem:[#allocation5 + $0x364] ss:$16 sps:$4 sm:$0xff]   ;;  %v6221_v47 = vld [vmem:[#allocation5 + $0x360] ss:$16 sps:$4 sm:$0xff]   ;;  %v6279_v23 = vld [vmem:[#allocation5 + $0x88] ss:$16 sps:$4 sm:$0xff]  }
  0x67   :  { %1559 = vmatprep.subr.bf16.mxu0 %v6188_v25  ;;  %v6222_v48 = vld [vmem:[#allocation5 + $0x184] ss:$16 sps:$4 sm:$0xff]   ;;  %v6226_v52 = vld [vmem:[#allocation5 + $0x180] ss:$16 sps:$4 sm:$0xff]   ;;  %v6287_v25 = vld [vmem:[#allocation5 + $0xac] ss:$16 sps:$4 sm:$0xff]  }
  0x68   :  { %v6248_v49 = vld [vmem:[%s8291_s25 + $0x4] ss:$24 sps:$4 sm:$0xff]   ;;  %v6227_v53 = vld [vmem:[#allocation5 + $0x380] ss:$16 sps:$4 sm:$0xff]  }
  0x69   :  { %1517 = vmatpush1.bf16.msra.mxu1 %v6190_v26  ;;  %v6224_v50 = vld [vmem:[#allocation5 + $0x384] ss:$16 sps:$4 sm:$0xff]   ;;  %1536 = vmatprep.mubr.bf16.mxu1 %v6248_v49  ;;  %v6232_v56 = vld [vmem:[#allocation5 + $0x1a0] ss:$16 sps:$4 sm:$0xff]  }
  0x6a   :  { %1560 = vmatpush1.bf16.msra.mxu0 %v6191_v27  ;;  %1518 = vmatprep.subr.bf16.mxu1 %v6192_v28  ;;  %v7597_v51 = vld [vmem:[%s8291_s25 + $0xc] ss:$24 sps:$4 sm:$0xff]   ;;  %v6233_v57 = vld [vmem:[#allocation5 + $0x3a0] ss:$16 sps:$4 sm:$0xff]   ;;  %v6285_v27 = vld [vmem:[#allocation5 + $0xa8] ss:$16 sps:$4 sm:$0xff]  }
  0x6b   :  { %1561 = vmatprep.subr.bf16.mxu0 %v6194_v29  ;;  %1579 = vmatprep.mubr.bf16.mxu0 %v7597_v51  ;;  %v6228_v54 = vld [vmem:[#allocation5 + $0x1a4] ss:$16 sps:$4 sm:$0xff]   ;;  %v6238_v60 = vld [vmem:[#allocation5 + $0x1c0] ss:$16 sps:$4 sm:$0xff]   ;;  %v6293_v29 = vld [vmem:[#allocation5 + $0xcc] ss:$16 sps:$4 sm:$0xff]  }
  0x6c   :  { %v6230_v55 = vld [vmem:[#allocation5 + $0x3a4] ss:$16 sps:$4 sm:$0xff]   ;;  %v6239_v61 = vld [vmem:[#allocation5 + $0x3c0] ss:$16 sps:$4 sm:$0xff]  }
  0x6d   :  { %1519 = vmatpush1.bf16.msra.mxu1 %v6196_v30  ;;  %v6234_v58 = vld [vmem:[#allocation5 + $0x1c4] ss:$16 sps:$4 sm:$0xff]   ;;  %v6244_v0 = vld [vmem:[#allocation5 + $0x1e0] ss:$16 sps:$4 sm:$0xff]  }
  0x6e   :  { %1562 = vmatpush1.bf16.msra.mxu0 %v6197_v31  ;;  %1520 = vmatprep.subr.bf16.mxu1 %v6198_v32  ;;  %v6236_v59 = vld [vmem:[#allocation5 + $0x3c4] ss:$16 sps:$4 sm:$0xff]   ;;  %v6245_v1 = vld [vmem:[#allocation5 + $0x3e0] ss:$16 sps:$4 sm:$0xff]   ;;  %v6291_v31 = vld [vmem:[#allocation5 + $0xc8] ss:$16 sps:$4 sm:$0xff]  }
  0x6f   :  { %1563 = vmatprep.subr.bf16.mxu0 %v6200_v33  ;;  %v6240_v62 = vld [vmem:[#allocation5 + $0x1e4] ss:$16 sps:$4 sm:$0xff]   ;;  %v7603_v4 = vld [vmem:[%s8291_s25] ss:$24 sps:$4 sm:$0xff]   ;;  %v6299_v33 = vld [vmem:[#allocation5 + $0xec] ss:$16 sps:$4 sm:$0xff]  }
  0x70   :  { %v6242_v63 = vld [vmem:[#allocation5 + $0x3e4] ss:$16 sps:$4 sm:$0xff]   ;;  %v7608_v5 = vld [vmem:[%s8291_s25 + $0x8] ss:$24 sps:$4 sm:$0xff]  }
  0x71   :  { %1521 = vmatpush1.bf16.msra.mxu1 %v6202_v34  ;;  %v6254_v2 = vld [vmem:[#allocation5 + $0x404] ss:$16 sps:$4 sm:$0xff]   ;;  %v6252_v6 = vld [vmem:[#allocation5 + $0x400] ss:$16 sps:$4 sm:$0xff]  }
  0x72   :  { %1564 = vmatpush1.bf16.msra.mxu0 %v6203_v35  ;;  %1522 = vmatprep.subr.bf16.mxu1 %v6204_v36  ;;  %v6260_v8 = vld [vmem:[#allocation5 + $0x424] ss:$16 sps:$4 sm:$0xff]   ;;  %v6258_v10 = vld [vmem:[#allocation5 + $0x420] ss:$16 sps:$4 sm:$0xff]   ;;  %v6297_v36 = vld [vmem:[#allocation5 + $0xe8] ss:$16 sps:$4 sm:$0xff]  }
  0x73   :  { %1565 = vmatprep.subr.bf16.mxu0 %v6206_v37  ;;  %v6266_v12 = vld [vmem:[#allocation5 + $0x444] ss:$16 sps:$4 sm:$0xff]   ;;  %v6264_v14 = vld [vmem:[#allocation5 + $0x440] ss:$16 sps:$4 sm:$0xff]  }
  0x74   :  { %v6272_v16 = vld [vmem:[#allocation5 + $0x464] ss:$16 sps:$4 sm:$0xff]   ;;  %v6270_v18 = vld [vmem:[#allocation5 + $0x460] ss:$16 sps:$4 sm:$0xff]  }
  0x75   :  { %1523 = vmatpush1.bf16.msra.mxu1 %v6208_v38  ;;  %v6278_v20 = vld [vmem:[#allocation5 + $0x484] ss:$16 sps:$4 sm:$0xff]   ;;  %v6276_v22 = vld [vmem:[#allocation5 + $0x480] ss:$16 sps:$4 sm:$0xff]   ;;  %v6305_v38 = vld [vmem:[#allocation5 + $0x10c] ss:$16 sps:$4 sm:$0xff]  }
  0x76   :  { %1566 = vmatpush1.bf16.msra.mxu0 %v6209_v39  ;;  %1524 = vmatprep.subr.bf16.mxu1 %v6210_v40  ;;  %v6284_v24 = vld [vmem:[#allocation5 + $0x4a4] ss:$16 sps:$4 sm:$0xff]   ;;  %v6282_v26 = vld [vmem:[#allocation5 + $0x4a0] ss:$16 sps:$4 sm:$0xff]   ;;  %v6303_v40 = vld [vmem:[#allocation5 + $0x108] ss:$16 sps:$4 sm:$0xff]  }
  0x77   :  { %1567 = vmatprep.subr.bf16.mxu0 %v6212_v41  ;;  %v6290_v28 = vld [vmem:[#allocation5 + $0x4c4] ss:$16 sps:$4 sm:$0xff]   ;;  %v6288_v30 = vld [vmem:[#allocation5 + $0x4c0] ss:$16 sps:$4 sm:$0xff]  }
  0x78   :  { %v6296_v32 = vld [vmem:[#allocation5 + $0x4e4] ss:$16 sps:$4 sm:$0xff]   ;;  %v6294_v35 = vld [vmem:[#allocation5 + $0x4e0] ss:$16 sps:$4 sm:$0xff]  }
  0x79   :  { %1525 = vmatpush1.bf16.msra.mxu1 %v6214_v42  ;;  %v7615_v34 = vld [vmem:[%s8291_s25 + $0x14] ss:$24 sps:$4 sm:$0xff]   ;;  %v6300_v39 = vld [vmem:[#allocation5 + $0x500] ss:$16 sps:$4 sm:$0xff]  }
  0x7a   :  { %1568 = vmatpush1.bf16.msra.mxu0 %v6215_v43  ;;  %1526 = vmatprep.subr.bf16.mxu1 %v6216_v44  ;;  %v6302_v37 = vld [vmem:[#allocation5 + $0x504] ss:$16 sps:$4 sm:$0xff]   ;;  %v6311_v42 = vld [vmem:[#allocation5 + $0x12c] ss:$16 sps:$4 sm:$0xff]   ;;  %v6306_v43 = vld [vmem:[#allocation5 + $0x520] ss:$16 sps:$4 sm:$0xff]  }
  0x7b   :  { %1569 = vmatprep.subr.bf16.mxu0 %v6218_v45  ;;  %v6308_v41 = vld [vmem:[#allocation5 + $0x524] ss:$16 sps:$4 sm:$0xff]   ;;  %v6309_v44 = vld [vmem:[#allocation5 + $0x128] ss:$16 sps:$4 sm:$0xff]  }
  0x7c   :  { %v6314_v45 = vld [vmem:[#allocation5 + $0x544] ss:$16 sps:$4 sm:$0xff]  }
  0x7d   :  { %1527 = vmatpush1.bf16.msra.mxu1 %v6220_v46  ;;  %v6317_v46 = vld [vmem:[#allocation5 + $0x14c] ss:$16 sps:$4 sm:$0xff]  }
  0x7e   :  { %1570 = vmatpush1.bf16.msra.mxu0 %v6221_v47  ;;  %1528 = vmatprep.subr.bf16.mxu1 %v6222_v48  ;;  %v6312_v47 = vld [vmem:[#allocation5 + $0x540] ss:$16 sps:$4 sm:$0xff]   ;;  %v6315_v48 = vld [vmem:[#allocation5 + $0x148] ss:$16 sps:$4 sm:$0xff]  }
  0x7f   :  { %1571 = vmatprep.subr.bf16.mxu0 %v6224_v50  ;;  %v6323_v50 = vld [vmem:[#allocation5 + $0x16c] ss:$16 sps:$4 sm:$0xff]  }
  0x81   :  { %1529 = vmatpush1.bf16.msra.mxu1 %v6226_v52  ;;  %v6318_v52 = vld [vmem:[#allocation5 + $0x560] ss:$16 sps:$4 sm:$0xff]  }
  0x82   :  { %1572 = vmatpush1.bf16.msra.mxu0 %v6227_v53  ;;  %1530 = vmatprep.subr.bf16.mxu1 %v6228_v54  ;;  %v6321_v53 = vld [vmem:[#allocation5 + $0x168] ss:$16 sps:$4 sm:$0xff]   ;;  %v6326_v54 = vld [vmem:[#allocation5 + $0x584] ss:$16 sps:$4 sm:$0xff]  }
  0x83   :  { %1573 = vmatprep.subr.bf16.mxu0 %v6230_v55  ;;  %v6329_v55 = vld [vmem:[#allocation5 + $0x18c] ss:$16 sps:$4 sm:$0xff]  }
  0x85   :  { %1531 = vmatpush1.bf16.msra.mxu1 %v6232_v56  ;;  %v6324_v56 = vld [vmem:[#allocation5 + $0x580] ss:$16 sps:$4 sm:$0xff]  }
  0x86   :  { %1574 = vmatpush1.bf16.msra.mxu0 %v6233_v57  ;;  %1532 = vmatprep.subr.bf16.mxu1 %v6234_v58  ;;  %v6327_v57 = vld [vmem:[#allocation5 + $0x188] ss:$16 sps:$4 sm:$0xff]   ;;  %v6332_v58 = vld [vmem:[#allocation5 + $0x5a4] ss:$16 sps:$4 sm:$0xff]  }
  0x87   :  { %1575 = vmatprep.subr.bf16.mxu0 %v6236_v59  ;;  %v6335_v59 = vld [vmem:[#allocation5 + $0x1ac] ss:$16 sps:$4 sm:$0xff]  }
  0x89   :  { %1533 = vmatpush1.bf16.msra.mxu1 %v6238_v60  ;;  %v6330_v60 = vld [vmem:[#allocation5 + $0x5a0] ss:$16 sps:$4 sm:$0xff]  }
  0x8a   :  { %1576 = vmatpush1.bf16.msra.mxu0 %v6239_v61  ;;  %1534 = vmatprep.subr.bf16.mxu1 %v6240_v62  ;;  %v6333_v61 = vld [vmem:[#allocation5 + $0x1a8] ss:$16 sps:$4 sm:$0xff]   ;;  %v6338_v62 = vld [vmem:[#allocation5 + $0x5c4] ss:$16 sps:$4 sm:$0xff]  }
  0x8b   :  { %1577 = vmatprep.subr.bf16.mxu0 %v6242_v63  ;;  %v6341_v63 = vld [vmem:[#allocation5 + $0x1cc] ss:$16 sps:$4 sm:$0xff]  }
  0x8d   :  { %1535 = vmatpush1.bf16.msra.mxu1 %v6244_v0  ;;  %v6336_v0 = vld [vmem:[#allocation5 + $0x5c0] ss:$16 sps:$4 sm:$0xff]  }
  0x8e   :  { %1578 = vmatpush1.bf16.msra.mxu0 %v6245_v1  ;;  %1633 = vmatprep.subr.bf16.mxu1 %v6257_v3  ;;  %v6339_v1 = vld [vmem:[#allocation5 + $0x1c8] ss:$16 sps:$4 sm:$0xff]   ;;  %v6347_v3 = vld [vmem:[#allocation5 + $0x1ec] ss:$16 sps:$4 sm:$0xff]  }
  0x8f   :  { %1590 = vmatprep.subr.bf16.mxu0 %v6254_v2  ;;  %v6344_v2 = vld [vmem:[#allocation5 + $0x5e4] ss:$16 sps:$4 sm:$0xff]  }
  0x90   :  { %1537 = vmatmul.mubr.bf16.vlgmr.msra.gmra.mrb[0].mxu1 %v7603_v4 }
  0x91   :  { %1580 = vmatmul.mubr.bf16.vlgmr.msra.gmra.mrb[0].mxu0 %v7608_v5  ;;  %1634 = vmatpush1.bf16.msra.mxu1 %v6255_v7  ;;  %v6345_v7 = vld [vmem:[#allocation5 + $0x1e8] ss:$16 sps:$4 sm:$0xff]  }
  0x92   :  { %1591 = vmatpush1.bf16.msra.mxu0 %v6252_v6  ;;  %1635 = vmatprep.subr.bf16.mxu1 %v6263_v9  ;;  %v6342_v6 = vld [vmem:[#allocation5 + $0x5e0] ss:$16 sps:$4 sm:$0xff]   ;;  %v6356_v9 = vld [vmem:[#allocation2 + $0x4] ss:$16 sps:$4 sm:$0xff]  }
  0x93   :  { %1592 = vmatprep.subr.bf16.mxu0 %v6260_v8  ;;  %1665 = vmatprep.mubr.bf16.mxu1 %v6248_v49  ;;  %v6320_v49 = vld [vmem:[#allocation5 + $0x564] ss:$16 sps:$4 sm:$0xff]   ;;  %v6353_v8 = vld [vmem:[#allocation5 + $0x20c] ss:$16 sps:$4 sm:$0xff]  }
  0x94   :  { %1622 = vmatprep.mubr.bf16.mxu0 %v7615_v34 }
  0x95   :  { %1636 = vmatpush1.bf16.msra.mxu1 %v6261_v11  ;;  %v6351_v11 = vld [vmem:[#allocation5 + $0x208] ss:$16 sps:$4 sm:$0xff]  }
  0x96   :  { %1593 = vmatpush1.bf16.msra.mxu0 %v6258_v10  ;;  %1637 = vmatprep.subr.bf16.mxu1 %v6269_v13  ;;  %v7621_v10 = vld [vmem:[%s8291_s25 + $0x10] ss:$24 sps:$4 sm:$0xff]   ;;  %v6359_v13 = vld [vmem:[#allocation5 + $0x22c] ss:$16 sps:$4 sm:$0xff]  }
  0x97   :  { %1594 = vmatprep.subr.bf16.mxu0 %v6266_v12  ;;  %v6354_v12 = vld [vmem:[#allocation2] ss:$16 sps:$4 sm:$0xff]  }
  0x99   :  { %1638 = vmatpush1.bf16.msra.mxu1 %v6267_v15  ;;  %v6357_v15 = vld [vmem:[#allocation5 + $0x228] ss:$16 sps:$4 sm:$0xff]  }
  0x9a   :  { %1595 = vmatpush1.bf16.msra.mxu0 %v6264_v14  ;;  %1639 = vmatprep.subr.bf16.mxu1 %v6275_v17  ;;  %v6362_v14 = vld [vmem:[#allocation2 + $0x24] ss:$16 sps:$4 sm:$0xff]   ;;  %v6365_v17 = vld [vmem:[#allocation5 + $0x24c] ss:$16 sps:$4 sm:$0xff]  }
  0x9b   :  { %1596 = vmatprep.subr.bf16.mxu0 %v6272_v16  ;;  %v6360_v16 = vld [vmem:[#allocation2 + $0x20] ss:$16 sps:$4 sm:$0xff]  }
  0x9d   :  { %1640 = vmatpush1.bf16.msra.mxu1 %v6273_v19  ;;  %v7629_v19 = vld [vmem:[%s8292_s10 + $0x4] ss:$24 sps:$4 sm:$0xff]  }
  0x9e   :  { %1597 = vmatpush1.bf16.msra.mxu0 %v6270_v18  ;;  %1641 = vmatprep.subr.bf16.mxu1 %v6281_v21  ;;  %v6368_v18 = vld [vmem:[#allocation2 + $0x44] ss:$16 sps:$4 sm:$0xff]   ;;  %v6366_v21 = vld [vmem:[#allocation2 + $0x40] ss:$16 sps:$4 sm:$0xff]  }
  0x9f   :  { %1598 = vmatprep.subr.bf16.mxu0 %v6278_v20  ;;  %v6363_v20 = vld [vmem:[#allocation5 + $0x248] ss:$16 sps:$4 sm:$0xff]  }
  0xa1   :  { %1642 = vmatpush1.bf16.msra.mxu1 %v6279_v23  ;;  %v6369_v23 = vld [vmem:[#allocation5 + $0x268] ss:$16 sps:$4 sm:$0xff]  }
  0xa2   :  { %1599 = vmatpush1.bf16.msra.mxu0 %v6276_v22  ;;  %1643 = vmatprep.subr.bf16.mxu1 %v6287_v25  ;;  %v6374_v22 = vld [vmem:[#allocation2 + $0x64] ss:$16 sps:$4 sm:$0xff]  }
  0xa3   :  { %1600 = vmatprep.subr.bf16.mxu0 %v6284_v24  ;;  %v6372_v24 = vld [vmem:[#allocation2 + $0x60] ss:$16 sps:$4 sm:$0xff]   ;;  %v6380_v25 = vld [vmem:[#allocation2 + $0x84] ss:$16 sps:$4 sm:$0xff]  }
  0xa5   :  { %1644 = vmatpush1.bf16.msra.mxu1 %v6285_v27  ;;  %v6378_v27 = vld [vmem:[#allocation2 + $0x80] ss:$16 sps:$4 sm:$0xff]  }
  0xa6   :  { %1601 = vmatpush1.bf16.msra.mxu0 %v6282_v26  ;;  %1645 = vmatprep.subr.bf16.mxu1 %v6293_v29  ;;  %v6375_v26 = vld [vmem:[#allocation5 + $0x288] ss:$16 sps:$4 sm:$0xff]   ;;  %v6386_v29 = vld [vmem:[#allocation2 + $0xa4] ss:$16 sps:$4 sm:$0xff]  }
  0xa7   :  { %1602 = vmatprep.subr.bf16.mxu0 %v6290_v28  ;;  %v6383_v28 = vld [vmem:[#allocation5 + $0x2ac] ss:$16 sps:$4 sm:$0xff]  }
  0xa9   :  { %1646 = vmatpush1.bf16.msra.mxu1 %v6291_v31  ;;  %v6384_v31 = vld [vmem:[#allocation2 + $0xa0] ss:$16 sps:$4 sm:$0xff]  }
  0xaa   :  { %1603 = vmatpush1.bf16.msra.mxu0 %v6288_v30  ;;  %1647 = vmatprep.subr.bf16.mxu1 %v6299_v33  ;;  %v6381_v30 = vld [vmem:[#allocation5 + $0x2a8] ss:$16 sps:$4 sm:$0xff]   ;;  %v6392_v33 = vld [vmem:[#allocation2 + $0xc4] ss:$16 sps:$4 sm:$0xff]  }
  0xab   :  { %1604 = vmatprep.subr.bf16.mxu0 %v6296_v32  ;;  %v6389_v32 = vld [vmem:[#allocation5 + $0x2cc] ss:$16 sps:$4 sm:$0xff]  }
  0xad   :  { %1648 = vmatpush1.bf16.msra.mxu1 %v6297_v36  ;;  %v6390_v36 = vld [vmem:[#allocation2 + $0xc0] ss:$16 sps:$4 sm:$0xff]  }
  0xae   :  { %1605 = vmatpush1.bf16.msra.mxu0 %v6294_v35  ;;  %1649 = vmatprep.subr.bf16.mxu1 %v6305_v38  ;;  %v6387_v35 = vld [vmem:[#allocation5 + $0x2c8] ss:$16 sps:$4 sm:$0xff]   ;;  %v6398_v38 = vld [vmem:[#allocation2 + $0xe4] ss:$16 sps:$4 sm:$0xff]  }
  0xaf   :  { %1606 = vmatprep.subr.bf16.mxu0 %v6302_v37  ;;  %v6395_v37 = vld [vmem:[#allocation5 + $0x2ec] ss:$16 sps:$4 sm:$0xff]  }
  0xb1   :  { %1650 = vmatpush1.bf16.msra.mxu1 %v6303_v40  ;;  %v6396_v40 = vld [vmem:[#allocation2 + $0xe0] ss:$16 sps:$4 sm:$0xff]  }
  0xb2   :  { %1607 = vmatpush1.bf16.msra.mxu0 %v6300_v39  ;;  %1651 = vmatprep.subr.bf16.mxu1 %v6311_v42  ;;  %v6393_v39 = vld [vmem:[#allocation5 + $0x2e8] ss:$16 sps:$4 sm:$0xff]   ;;  %v6404_v42 = vld [vmem:[#allocation2 + $0x104] ss:$16 sps:$4 sm:$0xff]  }
  0xb3   :  { %1608 = vmatprep.subr.bf16.mxu0 %v6308_v41  ;;  %v6401_v41 = vld [vmem:[#allocation5 + $0x30c] ss:$16 sps:$4 sm:$0xff]  }
  0xb5   :  { %1652 = vmatpush1.bf16.msra.mxu1 %v6309_v44  ;;  %v6402_v44 = vld [vmem:[#allocation2 + $0x100] ss:$16 sps:$4 sm:$0xff]  }
  0xb6   :  { %1609 = vmatpush1.bf16.msra.mxu0 %v6306_v43  ;;  %1653 = vmatprep.subr.bf16.mxu1 %v6317_v46  ;;  %v6399_v43 = vld [vmem:[#allocation5 + $0x308] ss:$16 sps:$4 sm:$0xff]   ;;  %v6410_v46 = vld [vmem:[#allocation2 + $0x124] ss:$16 sps:$4 sm:$0xff]  }
  0xb7   :  { %1610 = vmatprep.subr.bf16.mxu0 %v6314_v45  ;;  %v6407_v45 = vld [vmem:[#allocation5 + $0x32c] ss:$16 sps:$4 sm:$0xff]  }
  0xb9   :  { %1654 = vmatpush1.bf16.msra.mxu1 %v6315_v48  ;;  %v6408_v48 = vld [vmem:[#allocation2 + $0x120] ss:$16 sps:$4 sm:$0xff]  }
  0xba   :  { %1611 = vmatpush1.bf16.msra.mxu0 %v6312_v47  ;;  %1655 = vmatprep.subr.bf16.mxu1 %v6323_v50  ;;  %v6405_v47 = vld [vmem:[#allocation5 + $0x328] ss:$16 sps:$4 sm:$0xff]   ;;  %v6416_v50 = vld [vmem:[#allocation2 + $0x144] ss:$16 sps:$4 sm:$0xff]  }
  0xbb   :  { %1612 = vmatprep.subr.bf16.mxu0 %v6320_v49  ;;  %v6413_v49 = vld [vmem:[#allocation5 + $0x34c] ss:$16 sps:$4 sm:$0xff]  }
  0xbd   :  { %1656 = vmatpush1.bf16.msra.mxu1 %v6321_v53  ;;  %v6414_v53 = vld [vmem:[#allocation2 + $0x140] ss:$16 sps:$4 sm:$0xff]  }
  0xbe   :  { %1613 = vmatpush1.bf16.msra.mxu0 %v6318_v52  ;;  %1657 = vmatprep.subr.bf16.mxu1 %v6329_v55  ;;  %v6411_v52 = vld [vmem:[#allocation5 + $0x348] ss:$16 sps:$4 sm:$0xff]   ;;  %v6422_v55 = vld [vmem:[#allocation2 + $0x164] ss:$16 sps:$4 sm:$0xff]  }
  0xbf   :  { %1614 = vmatprep.subr.bf16.mxu0 %v6326_v54  ;;  %v6419_v54 = vld [vmem:[#allocation5 + $0x36c] ss:$16 sps:$4 sm:$0xff]  }
  0xc1   :  { %1658 = vmatpush1.bf16.msra.mxu1 %v6327_v57  ;;  %v6420_v57 = vld [vmem:[#allocation2 + $0x160] ss:$16 sps:$4 sm:$0xff]  }
  0xc2   :  { %1615 = vmatpush1.bf16.msra.mxu0 %v6324_v56  ;;  %1659 = vmatprep.subr.bf16.mxu1 %v6335_v59  ;;  %v6417_v56 = vld [vmem:[#allocation5 + $0x368] ss:$16 sps:$4 sm:$0xff]   ;;  %v6428_v59 = vld [vmem:[#allocation2 + $0x184] ss:$16 sps:$4 sm:$0xff]  }
  0xc3   :  { %1616 = vmatprep.subr.bf16.mxu0 %v6332_v58  ;;  %v6425_v58 = vld [vmem:[#allocation5 + $0x38c] ss:$16 sps:$4 sm:$0xff]  }
  0xc5   :  { %1660 = vmatpush1.bf16.msra.mxu1 %v6333_v61  ;;  %v6426_v61 = vld [vmem:[#allocation2 + $0x180] ss:$16 sps:$4 sm:$0xff]  }
  0xc6   :  { %1617 = vmatpush1.bf16.msra.mxu0 %v6330_v60  ;;  %1661 = vmatprep.subr.bf16.mxu1 %v6341_v63  ;;  %v6423_v60 = vld [vmem:[#allocation5 + $0x388] ss:$16 sps:$4 sm:$0xff]   ;;  %v6434_v63 = vld [vmem:[#allocation2 + $0x1a4] ss:$16 sps:$4 sm:$0xff]  }
  0xc7   :  { %1618 = vmatprep.subr.bf16.mxu0 %v6338_v62  ;;  %v6431_v62 = vld [vmem:[#allocation5 + $0x3ac] ss:$16 sps:$4 sm:$0xff]  }
  0xc9   :  { %1662 = vmatpush1.bf16.msra.mxu1 %v6339_v1  ;;  %v6432_v1 = vld [vmem:[#allocation2 + $0x1a0] ss:$16 sps:$4 sm:$0xff]  }
  0xca   :  { %1619 = vmatpush1.bf16.msra.mxu0 %v6336_v0  ;;  %1663 = vmatprep.subr.bf16.mxu1 %v6347_v3  ;;  %v6429_v0 = vld [vmem:[#allocation5 + $0x3a8] ss:$16 sps:$4 sm:$0xff]   ;;  %v6440_v3 = vld [vmem:[#allocation2 + $0x1c4] ss:$16 sps:$4 sm:$0xff]  }
  0xcb   :  { %1620 = vmatprep.subr.bf16.mxu0 %v6344_v2  ;;  %v6437_v2 = vld [vmem:[#allocation5 + $0x3cc] ss:$16 sps:$4 sm:$0xff]  }
  0xcd   :  { %1664 = vmatpush1.bf16.msra.mxu1 %v6345_v7  ;;  %v6438_v7 = vld [vmem:[#allocation2 + $0x1c0] ss:$16 sps:$4 sm:$0xff]  }
  0xce   :  { %1621 = vmatpush1.bf16.msra.mxu0 %v6342_v6  ;;  %1676 = vmatprep.subr.bf16.mxu1 %v6353_v8  ;;  %v6435_v6 = vld [vmem:[#allocation5 + $0x3c8] ss:$16 sps:$4 sm:$0xff]   ;;  %v6443_v8 = vld [vmem:[#allocation5 + $0x3ec] ss:$16 sps:$4 sm:$0xff]  }
  0xcf   :  { %2752 = vmatprep.subr.bf16.mxu0 %v6356_v9  ;;  %v6446_v9 = vld [vmem:[#allocation2 + $0x1e4] ss:$16 sps:$4 sm:$0xff]  }
  0xd0   :  { %1666 = vmatmul.mubr.bf16.vlgmr.msra.gmra.mrb[4].mxu1 %v7603_v4  ;;  %v6371_v4 = vld [vmem:[#allocation5 + $0x26c] ss:$16 sps:$4 sm:$0xff]  }
  0xd1   :  { %1623 = vmatmul.mubr.bf16.vlgmr.msra.gmra.mrb[0].mxu0 %v7621_v10  ;;  %1677 = vmatpush1.bf16.msra.mxu1 %v6351_v11  ;;  %v6441_v11 = vld [vmem:[#allocation5 + $0x3e8] ss:$16 sps:$4 sm:$0xff]  }
  0xd2   :  { %2753 = vmatpush1.bf16.msra.mxu0 %v6354_v12  ;;  %1678 = vmatprep.subr.bf16.mxu1 %v6359_v13  ;;  %v6444_v12 = vld [vmem:[#allocation2 + $0x1e0] ss:$16 sps:$4 sm:$0xff]   ;;  %v6449_v13 = vld [vmem:[#allocation5 + $0x40c] ss:$16 sps:$4 sm:$0xff]  }
  0xd3   :  { %2754 = vmatprep.subr.bf16.mxu0 %v6362_v14  ;;  %1708 = vmatprep.mubr.bf16.mxu1 %v7597_v51  ;;  %v6377_v51 = vld [vmem:[#allocation5 + $0x28c] ss:$16 sps:$4 sm:$0xff]   ;;  %v6455_v14 = vld [vmem:[#allocation2 + $0x204] ss:$16 sps:$4 sm:$0xff]  }
  0xd4   :  { %2784 = vmatprep.mubr.bf16.mxu0 %v7629_v19 }
  0xd5   :  { %1679 = vmatpush1.bf16.msra.mxu1 %v6357_v15  ;;  %v6447_v15 = vld [vmem:[#allocation5 + $0x408] ss:$16 sps:$4 sm:$0xff]  }
  0xd6   :  { %2755 = vmatpush1.bf16.msra.mxu0 %v6360_v16  ;;  %1680 = vmatprep.subr.bf16.mxu1 %v6365_v17  ;;  %v6450_v16 = vld [vmem:[%s8292_s10] ss:$24 sps:$4 sm:$0xff]  }
  0xd7   :  { %2756 = vmatprep.subr.bf16.mxu0 %v6368_v18  ;;  %v6453_v17 = vld [vmem:[#allocation2 + $0x200] ss:$16 sps:$4 sm:$0xff]   ;;  %v6458_v18 = vld [vmem:[#allocation5 + $0x42c] ss:$16 sps:$4 sm:$0xff]  }
  0xd9   :  { %1681 = vmatpush1.bf16.msra.mxu1 %v6363_v20  ;;  %v6461_v20 = vld [vmem:[#allocation2 + $0x224] ss:$16 sps:$4 sm:$0xff]  }
  0xda   :  { %2757 = vmatpush1.bf16.msra.mxu0 %v6366_v21  ;;  %1682 = vmatprep.subr.bf16.mxu1 %v6371_v4  ;;  %v6548_v21 = vld [vmem:[%s8292_s10 + $0xc] ss:$24 sps:$4 sm:$0xff]   ;;  %v6456_v4 = vld [vmem:[#allocation5 + $0x428] ss:$16 sps:$4 sm:$0xff]  }
  0xdb   :  { %2758 = vmatprep.subr.bf16.mxu0 %v6374_v22  ;;  %v6459_v22 = vld [vmem:[#allocation2 + $0x220] ss:$16 sps:$4 sm:$0xff]  }
  0xdd   :  { %1683 = vmatpush1.bf16.msra.mxu1 %v6369_v23  ;;  %v6464_v23 = vld [vmem:[#allocation5 + $0x44c] ss:$16 sps:$4 sm:$0xff]  }
  0xde   :  { %2759 = vmatpush1.bf16.msra.mxu0 %v6372_v24  ;;  %1684 = vmatprep.subr.bf16.mxu1 %v6377_v51  ;;  %v6467_v24 = vld [vmem:[#allocation2 + $0x244] ss:$16 sps:$4 sm:$0xff]   ;;  %v6462_v51 = vld [vmem:[#allocation5 + $0x448] ss:$16 sps:$4 sm:$0xff]  }
  0xdf   :  { %2760 = vmatprep.subr.bf16.mxu0 %v6380_v25  ;;  %v6465_v25 = vld [vmem:[#allocation2 + $0x240] ss:$16 sps:$4 sm:$0xff]  }
  0xe1   :  { %1685 = vmatpush1.bf16.msra.mxu1 %v6375_v26  ;;  %v6470_v26 = vld [vmem:[#allocation5 + $0x46c] ss:$16 sps:$4 sm:$0xff]  }
  0xe2   :  { %2761 = vmatpush1.bf16.msra.mxu0 %v6378_v27  ;;  %1686 = vmatprep.subr.bf16.mxu1 %v6383_v28  ;;  %v6468_v27 = vld [vmem:[#allocation5 + $0x468] ss:$16 sps:$4 sm:$0xff]   ;;  %v6471_v28 = vld [vmem:[#allocation2 + $0x260] ss:$16 sps:$4 sm:$0xff]  }
  0xe3   :  { %2762 = vmatprep.subr.bf16.mxu0 %v6386_v29  ;;  %v6476_v29 = vld [vmem:[#allocation5 + $0x48c] ss:$16 sps:$4 sm:$0xff]  }
  0xe5   :  { %1687 = vmatpush1.bf16.msra.mxu1 %v6381_v30  ;;  %v6479_v30 = vld [vmem:[#allocation2 + $0x284] ss:$16 sps:$4 sm:$0xff]  }
  0xe6   :  { %2763 = vmatpush1.bf16.msra.mxu0 %v6384_v31  ;;  %1688 = vmatprep.subr.bf16.mxu1 %v6389_v32  ;;  %v6474_v31 = vld [vmem:[#allocation5 + $0x488] ss:$16 sps:$4 sm:$0xff]   ;;  %v6477_v32 = vld [vmem:[#allocation2 + $0x280] ss:$16 sps:$4 sm:$0xff]  }
  0xe7   :  { %2764 = vmatprep.subr.bf16.mxu0 %v6392_v33  ;;  %v6485_v33 = vld [vmem:[#allocation2 + $0x2a4] ss:$16 sps:$4 sm:$0xff]  }
  0xe9   :  { %1689 = vmatpush1.bf16.msra.mxu1 %v6387_v35  ;;  %v6480_v35 = vld [vmem:[#allocation5 + $0x4a8] ss:$16 sps:$4 sm:$0xff]  }
  0xea   :  { %2765 = vmatpush1.bf16.msra.mxu0 %v6390_v36  ;;  %1690 = vmatprep.subr.bf16.mxu1 %v6395_v37  ;;  %v6483_v36 = vld [vmem:[#allocation2 + $0x2a0] ss:$16 sps:$4 sm:$0xff]   ;;  %v6488_v37 = vld [vmem:[#allocation5 + $0x4cc] ss:$16 sps:$4 sm:$0xff]  }
  0xeb   :  { %2766 = vmatprep.subr.bf16.mxu0 %v6398_v38  ;;  %v6491_v38 = vld [vmem:[#allocation2 + $0x2c4] ss:$16 sps:$4 sm:$0xff]  }
  0xed   :  { %1691 = vmatpush1.bf16.msra.mxu1 %v6393_v39  ;;  %v6486_v39 = vld [vmem:[#allocation5 + $0x4c8] ss:$16 sps:$4 sm:$0xff]  }
  0xee   :  { %2767 = vmatpush1.bf16.msra.mxu0 %v6396_v40  ;;  %1692 = vmatprep.subr.bf16.mxu1 %v6401_v41  ;;  %v6489_v40 = vld [vmem:[#allocation2 + $0x2c0] ss:$16 sps:$4 sm:$0xff]   ;;  %v6494_v41 = vld [vmem:[#allocation5 + $0x4ec] ss:$16 sps:$4 sm:$0xff]  }
  0xef   :  { %2768 = vmatprep.subr.bf16.mxu0 %v6404_v42  ;;  %v6497_v42 = vld [vmem:[#allocation2 + $0x2e4] ss:$16 sps:$4 sm:$0xff]  }
  0xf1   :  { %1693 = vmatpush1.bf16.msra.mxu1 %v6399_v43  ;;  %v6492_v43 = vld [vmem:[#allocation5 + $0x4e8] ss:$16 sps:$4 sm:$0xff]  }
  0xf2   :  { %2769 = vmatpush1.bf16.msra.mxu0 %v6402_v44  ;;  %1694 = vmatprep.subr.bf16.mxu1 %v6407_v45  ;;  %v6495_v44 = vld [vmem:[#allocation2 + $0x2e0] ss:$16 sps:$4 sm:$0xff]   ;;  %v6500_v45 = vld [vmem:[#allocation5 + $0x50c] ss:$16 sps:$4 sm:$0xff]  }
  0xf3   :  { %2770 = vmatprep.subr.bf16.mxu0 %v6410_v46  ;;  %v6503_v46 = vld [vmem:[#allocation2 + $0x304] ss:$16 sps:$4 sm:$0xff]  }
  0xf5   :  { %1695 = vmatpush1.bf16.msra.mxu1 %v6405_v47  ;;  %v6498_v47 = vld [vmem:[#allocation5 + $0x508] ss:$16 sps:$4 sm:$0xff]  }
  0xf6   :  { %2771 = vmatpush1.bf16.msra.mxu0 %v6408_v48  ;;  %1696 = vmatprep.subr.bf16.mxu1 %v6413_v49  ;;  %v6501_v48 = vld [vmem:[#allocation2 + $0x300] ss:$16 sps:$4 sm:$0xff]   ;;  %v6506_v49 = vld [vmem:[#allocation5 + $0x52c] ss:$16 sps:$4 sm:$0xff]  }
  0xf7   :  { %2772 = vmatprep.subr.bf16.mxu0 %v6416_v50  ;;  %v6509_v50 = vld [vmem:[#allocation2 + $0x324] ss:$16 sps:$4 sm:$0xff]  }
  0xf9   :  { %1697 = vmatpush1.bf16.msra.mxu1 %v6411_v52  ;;  %v6504_v52 = vld [vmem:[#allocation5 + $0x528] ss:$16 sps:$4 sm:$0xff]  }
  0xfa   :  { %2773 = vmatpush1.bf16.msra.mxu0 %v6414_v53  ;;  %1698 = vmatprep.subr.bf16.mxu1 %v6419_v54  ;;  %v6507_v53 = vld [vmem:[#allocation2 + $0x320] ss:$16 sps:$4 sm:$0xff]   ;;  %v6512_v54 = vld [vmem:[#allocation5 + $0x54c] ss:$16 sps:$4 sm:$0xff]  }
  0xfb   :  { %2774 = vmatprep.subr.bf16.mxu0 %v6422_v55  ;;  %v6515_v55 = vld [vmem:[#allocation2 + $0x344] ss:$16 sps:$4 sm:$0xff]  }
  0xfd   :  { %1699 = vmatpush1.bf16.msra.mxu1 %v6417_v56  ;;  %v6510_v56 = vld [vmem:[#allocation5 + $0x548] ss:$16 sps:$4 sm:$0xff]  }
  0xfe   :  { %2775 = vmatpush1.bf16.msra.mxu0 %v6420_v57  ;;  %1700 = vmatprep.subr.bf16.mxu1 %v6425_v58  ;;  %v6513_v57 = vld [vmem:[#allocation2 + $0x340] ss:$16 sps:$4 sm:$0xff]   ;;  %v6518_v58 = vld [vmem:[#allocation5 + $0x56c] ss:$16 sps:$4 sm:$0xff]  }
  0xff   :  { %2776 = vmatprep.subr.bf16.mxu0 %v6428_v59  ;;  %v6521_v59 = vld [vmem:[#allocation2 + $0x364] ss:$16 sps:$4 sm:$0xff]  }
 0x101   :  { %1701 = vmatpush1.bf16.msra.mxu1 %v6423_v60  ;;  %v6516_v60 = vld [vmem:[#allocation5 + $0x568] ss:$16 sps:$4 sm:$0xff]  }
 0x102   :  { %2777 = vmatpush1.bf16.msra.mxu0 %v6426_v61  ;;  %1702 = vmatprep.subr.bf16.mxu1 %v6431_v62  ;;  %v6519_v61 = vld [vmem:[#allocation2 + $0x360] ss:$16 sps:$4 sm:$0xff]   ;;  %v6524_v62 = vld [vmem:[#allocation5 + $0x58c] ss:$16 sps:$4 sm:$0xff]  }
 0x103   :  { %2778 = vmatprep.subr.bf16.mxu0 %v6434_v63  ;;  %v6527_v63 = vld [vmem:[#allocation2 + $0x384] ss:$16 sps:$4 sm:$0xff]  }
 0x105   :  { %1703 = vmatpush1.bf16.msra.mxu1 %v6429_v0  ;;  %v6522_v0 = vld [vmem:[#allocation5 + $0x588] ss:$16 sps:$4 sm:$0xff]  }
 0x106   :  { %2779 = vmatpush1.bf16.msra.mxu0 %v6432_v1  ;;  %1704 = vmatprep.subr.bf16.mxu1 %v6437_v2  ;;  %v6525_v1 = vld [vmem:[#allocation2 + $0x380] ss:$16 sps:$4 sm:$0xff]   ;;  %v6530_v2 = vld [vmem:[#allocation5 + $0x5ac] ss:$16 sps:$4 sm:$0xff]  }
 0x107   :  { %2780 = vmatprep.subr.bf16.mxu0 %v6440_v3  ;;  %v6533_v3 = vld [vmem:[#allocation2 + $0x3a4] ss:$16 sps:$4 sm:$0xff]  }
 0x109   :  { %1705 = vmatpush1.bf16.msra.mxu1 %v6435_v6  ;;  %v6528_v6 = vld [vmem:[#allocation5 + $0x5a8] ss:$16 sps:$4 sm:$0xff]  }
 0x10a   :  { %2781 = vmatpush1.bf16.msra.mxu0 %v6438_v7  ;;  %1706 = vmatprep.subr.bf16.mxu1 %v6443_v8  ;;  %v6531_v7 = vld [vmem:[#allocation2 + $0x3a0] ss:$16 sps:$4 sm:$0xff]   ;;  %v6536_v8 = vld [vmem:[#allocation5 + $0x5cc] ss:$16 sps:$4 sm:$0xff]  }
 0x10b   :  { %2782 = vmatprep.subr.bf16.mxu0 %v6446_v9  ;;  %v6539_v9 = vld [vmem:[#allocation2 + $0x3c4] ss:$16 sps:$4 sm:$0xff]  }
 0x10d   :  { %1707 = vmatpush1.bf16.msra.mxu1 %v6441_v11  ;;  %v6534_v11 = vld [vmem:[#allocation5 + $0x5c8] ss:$16 sps:$4 sm:$0xff]  }
 0x10e   :  { %2783 = vmatpush1.bf16.msra.mxu0 %v6444_v12  ;;  %1719 = vmatprep.subr.bf16.mxu1 %v6449_v13  ;;  %v6537_v12 = vld [vmem:[#allocation2 + $0x3c0] ss:$16 sps:$4 sm:$0xff]   ;;  %v6542_v13 = vld [vmem:[#allocation5 + $0x5ec] ss:$16 sps:$4 sm:$0xff]  }
 0x10f   :  { %2795 = vmatprep.subr.bf16.mxu0 %v6455_v14  ;;  %v6545_v14 = vld [vmem:[#allocation2 + $0x3e4] ss:$16 sps:$4 sm:$0xff]  }
 0x110   :  { %1709 = vmatmul.mubr.bf16.vlgmr.msra.gmra.mrb[4].mxu1 %v7608_v5  ;;  %v6473_v5 = vld [vmem:[#allocation2 + $0x264] ss:$16 sps:$4 sm:$0xff]  }
 0x111   :  { %2785 = vmatmul.mubr.bf16.vlgmr.msra.gmra.mrb[0].mxu0 %v6450_v16  ;;  %1720 = vmatpush1.bf16.msra.mxu1 %v6447_v15  ;;  %v6540_v15 = vld [vmem:[#allocation5 + $0x5e8] ss:$16 sps:$4 sm:$0xff]   ;;  %v6543_v16 = vld [vmem:[#allocation2 + $0x3e0] ss:$16 sps:$4 sm:$0xff]  }
 0x112   :  { %2796 = vmatpush1.bf16.msra.mxu0 %v6453_v17  ;;  %1721 = vmatprep.subr.bf16.mxu1 %v6458_v18  ;;  %v6551_v17 = vld [vmem:[#allocation2 + $0x404] ss:$16 sps:$4 sm:$0xff]   ;;  %v6554_v18 = vld [vmem:[#allocation2 + $0xc] ss:$16 sps:$4 sm:$0xff]  }
 0x113   :  { %2797 = vmatprep.subr.bf16.mxu0 %v6461_v20  ;;  %1751 = vmatprep.mubr.bf16.mxu1 %v7615_v34  ;;  %v6482_v34 = vld [vmem:[#allocation5 + $0x4ac] ss:$16 sps:$4 sm:$0xff]   ;;  %v7643_v20 = vld [vmem:[%s8292_s10 + $0x8] ss:$24 sps:$4 sm:$0xff]  }
 0x114   :  { %2827 = vmatprep.mubr.bf16.mxu0 %v6548_v21  ;;  %v6549_v21 = vld [vmem:[#allocation2 + $0x400] ss:$16 sps:$4 sm:$0xff]  }
 0x115   :  { %1722 = vmatpush1.bf16.msra.mxu1 %v6456_v4  ;;  %v6552_v4 = vld [vmem:[#allocation2 + $0x8] ss:$16 sps:$4 sm:$0xff]  }
 0x116   :  { %2798 = vmatpush1.bf16.msra.mxu0 %v6459_v22  ;;  %1723 = vmatprep.subr.bf16.mxu1 %v6464_v23  ;;  %v6557_v22 = vld [vmem:[#allocation2 + $0x424] ss:$16 sps:$4 sm:$0xff]   ;;  %v6560_v23 = vld [vmem:[#allocation2 + $0x2c] ss:$16 sps:$4 sm:$0xff]  }
 0x117   :  { %2799 = vmatprep.subr.bf16.mxu0 %v6467_v24  ;;  %v7648_v24 = vld [vmem:[%s8292_s10 + $0x14] ss:$24 sps:$4 sm:$0xff]  }
 0x119   :  { %1724 = vmatpush1.bf16.msra.mxu1 %v6462_v51  ;;  %v6555_v51 = vld [vmem:[#allocation2 + $0x420] ss:$16 sps:$4 sm:$0xff]  }
 0x11a   :  { %2800 = vmatpush1.bf16.msra.mxu0 %v6465_v25  ;;  %1725 = vmatprep.subr.bf16.mxu1 %v6470_v26  ;;  %v6558_v25 = vld [vmem:[#allocation2 + $0x28] ss:$16 sps:$4 sm:$0xff]   ;;  %v6563_v26 = vld [vmem:[#allocation2 + $0x444] ss:$16 sps:$4 sm:$0xff]  }
 0x11b   :  { %2801 = vmatprep.subr.bf16.mxu0 %v6473_v5  ;;  %v6566_v5 = vld [vmem:[#allocation2 + $0x4c] ss:$16 sps:$4 sm:$0xff]  }
 0x11d   :  { %1726 = vmatpush1.bf16.msra.mxu1 %v6468_v27  ;;  %v6561_v27 = vld [vmem:[#allocation2 + $0x440] ss:$16 sps:$4 sm:$0xff]  }
 0x11e   :  { %2802 = vmatpush1.bf16.msra.mxu0 %v6471_v28  ;;  %1727 = vmatprep.subr.bf16.mxu1 %v6476_v29  ;;  %v6564_v28 = vld [vmem:[#allocation2 + $0x48] ss:$16 sps:$4 sm:$0xff]   ;;  %v6569_v29 = vld [vmem:[#allocation2 + $0x464] ss:$16 sps:$4 sm:$0xff]  }
 0x11f   :  { %2803 = vmatprep.subr.bf16.mxu0 %v6479_v30  ;;  %v6572_v30 = vld [vmem:[#allocation2 + $0x6c] ss:$16 sps:$4 sm:$0xff]  }
 0x121   :  { %1728 = vmatpush1.bf16.msra.mxu1 %v6474_v31  ;;  %v6570_v31 = vld [vmem:[#allocation2 + $0x68] ss:$16 sps:$4 sm:$0xff]  }
 0x122   :  { %2804 = vmatpush1.bf16.msra.mxu0 %v6477_v32  ;;  %1729 = vmatprep.subr.bf16.mxu1 %v6482_v34  ;;  %v6575_v32 = vld [vmem:[#allocation2 + $0x484] ss:$16 sps:$4 sm:$0xff]   ;;  %v6578_v34 = vld [vmem:[#allocation2 + $0x8c] ss:$16 sps:$4 sm:$0xff]  }
 0x123   :  { %2805 = vmatprep.subr.bf16.mxu0 %v6485_v33  ;;  %v6573_v33 = vld [vmem:[#allocation2 + $0x480] ss:$16 sps:$4 sm:$0xff]  }
 0x125   :  { %1730 = vmatpush1.bf16.msra.mxu1 %v6480_v35  ;;  %v6576_v35 = vld [vmem:[#allocation2 + $0x88] ss:$16 sps:$4 sm:$0xff]  }
 0x126   :  { %2806 = vmatpush1.bf16.msra.mxu0 %v6483_v36  ;;  %1731 = vmatprep.subr.bf16.mxu1 %v6488_v37  ;;  %v6581_v36 = vld [vmem:[#allocation2 + $0x4a4] ss:$16 sps:$4 sm:$0xff]   ;;  %v6579_v37 = vld [vmem:[#allocation2 + $0x4a0] ss:$16 sps:$4 sm:$0xff]  }
 0x127   :  { %2807 = vmatprep.subr.bf16.mxu0 %v6491_v38  ;;  %v6582_v38 = vld [vmem:[#allocation2 + $0xa8] ss:$16 sps:$4 sm:$0xff]  }
 0x129   :  { %1732 = vmatpush1.bf16.msra.mxu1 %v6486_v39  ;;  %v6587_v39 = vld [vmem:[#allocation2 + $0x4c4] ss:$16 sps:$4 sm:$0xff]  }
 0x12a   :  { %2808 = vmatpush1.bf16.msra.mxu0 %v6489_v40  ;;  %1733 = vmatprep.subr.bf16.mxu1 %v6494_v41  ;;  %v6590_v40 = vld [vmem:[#allocation2 + $0xcc] ss:$16 sps:$4 sm:$0xff]  }
 0x12b   :  { %2809 = vmatprep.subr.bf16.mxu0 %v6497_v42  ;;  %v6585_v42 = vld [vmem:[#allocation2 + $0x4c0] ss:$16 sps:$4 sm:$0xff]  }
 0x12d   :  { %1734 = vmatpush1.bf16.msra.mxu1 %v6492_v43  ;;  %v6588_v43 = vld [vmem:[#allocation2 + $0xc8] ss:$16 sps:$4 sm:$0xff]  }
 0x12e   :  { %2810 = vmatpush1.bf16.msra.mxu0 %v6495_v44  ;;  %1735 = vmatprep.subr.bf16.mxu1 %v6500_v45 }
 0x12f   :  { %2811 = vmatprep.subr.bf16.mxu0 %v6503_v46  ;;  %v6593_v46 = vld [vmem:[#allocation2 + $0x4e4] ss:$16 sps:$4 sm:$0xff]  }
 0x131   :  { %1736 = vmatpush1.bf16.msra.mxu1 %v6498_v47  ;;  %v6596_v47 = vld [vmem:[#allocation2 + $0xec] ss:$16 sps:$4 sm:$0xff]  }
 0x132   :  { %2812 = vmatpush1.bf16.msra.mxu0 %v6501_v48  ;;  %1737 = vmatprep.subr.bf16.mxu1 %v6506_v49  ;;  %v6591_v49 = vld [vmem:[#allocation2 + $0x4e0] ss:$16 sps:$4 sm:$0xff]  }
 0x133   :  { %2813 = vmatprep.subr.bf16.mxu0 %v6509_v50  ;;  %v6594_v50 = vld [vmem:[#allocation2 + $0xe8] ss:$16 sps:$4 sm:$0xff]  }
 0x135   :  { %1738 = vmatpush1.bf16.msra.mxu1 %v6504_v52  ;;  %v6599_v52 = vld [vmem:[#allocation2 + $0x504] ss:$16 sps:$4 sm:$0xff]  }
 0x136   :  { %2814 = vmatpush1.bf16.msra.mxu0 %v6507_v53  ;;  %1739 = vmatprep.subr.bf16.mxu1 %v6512_v54  ;;  %v6602_v53 = vld [vmem:[#allocation2 + $0x10c] ss:$16 sps:$4 sm:$0xff]   ;;  %v6597_v54 = vld [vmem:[#allocation2 + $0x500] ss:$16 sps:$4 sm:$0xff]  }
 0x137   :  { %2815 = vmatprep.subr.bf16.mxu0 %v6515_v55  ;;  %v6600_v55 = vld [vmem:[#allocation2 + $0x108] ss:$16 sps:$4 sm:$0xff]  }
 0x139   :  { %1740 = vmatpush1.bf16.msra.mxu1 %v6510_v56  ;;  %v6605_v56 = vld [vmem:[#allocation2 + $0x524] ss:$16 sps:$4 sm:$0xff]  }
 0x13a   :  { %2816 = vmatpush1.bf16.msra.mxu0 %v6513_v57  ;;  %1741 = vmatprep.subr.bf16.mxu1 %v6518_v58  ;;  %v6608_v57 = vld [vmem:[#allocation2 + $0x12c] ss:$16 sps:$4 sm:$0xff]   ;;  %v6603_v58 = vld [vmem:[#allocation2 + $0x520] ss:$16 sps:$4 sm:$0xff]  }
 0x13b   :  { %2817 = vmatprep.subr.bf16.mxu0 %v6521_v59  ;;  %v6606_v59 = vld [vmem:[#allocation2 + $0x128] ss:$16 sps:$4 sm:$0xff]  }
 0x13d   :  { %1742 = vmatpush1.bf16.msra.mxu1 %v6516_v60  ;;  %v6611_v60 = vld [vmem:[#allocation2 + $0x544] ss:$16 sps:$4 sm:$0xff]  }
 0x13e   :  { %2818 = vmatpush1.bf16.msra.mxu0 %v6519_v61  ;;  %1743 = vmatprep.subr.bf16.mxu1 %v6524_v62  ;;  %v6614_v61 = vld [vmem:[#allocation2 + $0x14c] ss:$16 sps:$4 sm:$0xff]   ;;  %v6609_v62 = vld [vmem:[#allocation2 + $0x540] ss:$16 sps:$4 sm:$0xff]  }
 0x13f   :  { %2819 = vmatprep.subr.bf16.mxu0 %v6527_v63  ;;  %v6612_v63 = vld [vmem:[#allocation2 + $0x148] ss:$16 sps:$4 sm:$0xff]  }
 0x141   :  { %1744 = vmatpush1.bf16.msra.mxu1 %v6522_v0  ;;  %v6617_v0 = vld [vmem:[#allocation2 + $0x564] ss:$16 sps:$4 sm:$0xff]  }
 0x142   :  { %2820 = vmatpush1.bf16.msra.mxu0 %v6525_v1  ;;  %1745 = vmatprep.subr.bf16.mxu1 %v6530_v2  ;;  %v6620_v1 = vld [vmem:[#allocation2 + $0x16c] ss:$16 sps:$4 sm:$0xff]   ;;  %v6615_v2 = vld [vmem:[#allocation2 + $0x560] ss:$16 sps:$4 sm:$0xff]  }
 0x143   :  { %2821 = vmatprep.subr.bf16.mxu0 %v6533_v3  ;;  %v6618_v3 = vld [vmem:[#allocation2 + $0x168] ss:$16 sps:$4 sm:$0xff]  }
 0x145   :  { %1746 = vmatpush1.bf16.msra.mxu1 %v6528_v6  ;;  %v6623_v6 = vld [vmem:[#allocation2 + $0x584] ss:$16 sps:$4 sm:$0xff]  }
 0x146   :  { %2822 = vmatpush1.bf16.msra.mxu0 %v6531_v7  ;;  %1747 = vmatprep.subr.bf16.mxu1 %v6536_v8  ;;  %v6626_v7 = vld [vmem:[#allocation2 + $0x18c] ss:$16 sps:$4 sm:$0xff]   ;;  %v6621_v8 = vld [vmem:[#allocation2 + $0x580] ss:$16 sps:$4 sm:$0xff]  }
 0x147   :  { %2823 = vmatprep.subr.bf16.mxu0 %v6539_v9  ;;  %v6624_v9 = vld [vmem:[#allocation2 + $0x188] ss:$16 sps:$4 sm:$0xff]  }
 0x149   :  { %1748 = vmatpush1.bf16.msra.mxu1 %v6534_v11  ;;  %v6629_v11 = vld [vmem:[#allocation2 + $0x5a4] ss:$16 sps:$4 sm:$0xff]  }
 0x14a   :  { %2824 = vmatpush1.bf16.msra.mxu0 %v6537_v12  ;;  %1749 = vmatprep.subr.bf16.mxu1 %v6542_v13  ;;  %v6632_v12 = vld [vmem:[#allocation2 + $0x1ac] ss:$16 sps:$4 sm:$0xff]   ;;  %v6627_v13 = vld [vmem:[#allocation2 + $0x5a0] ss:$16 sps:$4 sm:$0xff]  }
 0x14b   :  { %2825 = vmatprep.subr.bf16.mxu0 %v6545_v14  ;;  %v6630_v14 = vld [vmem:[#allocation2 + $0x1a8] ss:$16 sps:$4 sm:$0xff]  }
 0x14d   :  { %1750 = vmatpush1.bf16.msra.mxu1 %v6540_v15  ;;  %v6635_v15 = vld [vmem:[#allocation2 + $0x5c4] ss:$16 sps:$4 sm:$0xff]  }
 0x14e   :  { %2826 = vmatpush1.bf16.msra.mxu0 %v6543_v16  ;;  %2881 = vmatprep.subr.bf16.mxu1 %v6554_v18  ;;  %v6638_v16 = vld [vmem:[#allocation2 + $0x1cc] ss:$16 sps:$4 sm:$0xff]   ;;  %v6636_v18 = vld [vmem:[#allocation2 + $0x1c8] ss:$16 sps:$4 sm:$0xff]  }
 0x14f   :  { %2838 = vmatprep.subr.bf16.mxu0 %v6551_v17  ;;  %v6633_v17 = vld [vmem:[#allocation2 + $0x5c0] ss:$16 sps:$4 sm:$0xff]  }
 0x150   :  { %1752 = vmatmul.mubr.bf16.vlgmr.msra.gmra.mrb[4].mxu1 %v7621_v10  ;;  %v6567_v10 = vld [vmem:[#allocation2 + $0x460] ss:$16 sps:$4 sm:$0xff]  }
 0x151   :  { %2828 = vmatmul.mubr.bf16.vlgmr.msra.gmra.mrb[0].mxu0 %v7643_v20  ;;  %2882 = vmatpush1.bf16.msra.mxu1 %v6552_v4  ;;  %v6644_v4 = vld [vmem:[#allocation2 + $0x1ec] ss:$16 sps:$4 sm:$0xff]  }
 0x152   :  { %2839 = vmatpush1.bf16.msra.mxu0 %v6549_v21  ;;  %2883 = vmatprep.subr.bf16.mxu1 %v6560_v23  ;;  %v6641_v21 = vld [vmem:[#allocation2 + $0x5e4] ss:$16 sps:$4 sm:$0xff]   ;;  %v6642_v23 = vld [vmem:[#allocation2 + $0x1e8] ss:$16 sps:$4 sm:$0xff]  }
 0x153   :  { %2840 = vmatprep.subr.bf16.mxu0 %v6557_v22  ;;  %2870 = vmatprep.mubr.bf16.mxu0 %v7648_v24  ;;  %v6639_v22 = vld [vmem:[#allocation2 + $0x5e0] ss:$16 sps:$4 sm:$0xff]  }
 0x154   :  { %2913 = vmatprep.mubr.bf16.mxu1 %v7629_v19  ;;  %v6584_v19 = vld [vmem:[#allocation2 + $0xac] ss:$16 sps:$4 sm:$0xff]  }
 0x155   :  { %2884 = vmatpush1.bf16.msra.mxu1 %v6558_v25  ;;  %v7665_v25 = vld [vmem:[%s8292_s10 + $0x10] ss:$24 sps:$4 sm:$0xff]  }
 0x156   :  { %2841 = vmatpush1.bf16.msra.mxu0 %v6555_v51  ;;  %2885 = vmatprep.subr.bf16.mxu1 %v6566_v5  ;;  %v6650_v51 = vld [vmem:[#allocation2 + $0x20c] ss:$16 sps:$4 sm:$0xff]   ;;  %v6954_v5 = vld [vmem:[#allocation5 + $0x4] ss:$16 sps:$4 sm:$0xff]  }
 0x157   :  { %2842 = vmatprep.subr.bf16.mxu0 %v6563_v26  ;;  %v6648_v26 = vld [vmem:[#allocation2 + $0x208] ss:$16 sps:$4 sm:$0xff]  }
 0x159   :  { %2886 = vmatpush1.bf16.msra.mxu1 %v6564_v28  ;;  %v7670_v28 = vld [vmem:[%s8253_s5 + $0x4] ss:$24 sps:$4 sm:$0xff]  }
 0x15a   :  { %2843 = vmatpush1.bf16.msra.mxu0 %v6561_v27  ;;  %2887 = vmatprep.subr.bf16.mxu1 %v6572_v30  ;;  %v6653_v27 = vld [vmem:[#allocation2 + $0x22c] ss:$16 sps:$4 sm:$0xff]   ;;  %v6956_v30 = vld [vmem:[#allocation5] ss:$16 sps:$4 sm:$0xff]  }
 0x15b   :  { %2844 = vmatprep.subr.bf16.mxu0 %v6569_v29  ;;  %v6955_v29 = vld [vmem:[%s8292_s10] ss:$24 sps:$4 sm:$0xff]  }
 0x15d   :  { %2888 = vmatpush1.bf16.msra.mxu1 %v6570_v31  ;;  %v6957_v31 = vld [vmem:[#allocation5 + $0x24] ss:$16 sps:$4 sm:$0xff]  }
 0x15e   :  { %2845 = vmatpush1.bf16.msra.mxu0 %v6567_v10  ;;  %2889 = vmatprep.subr.bf16.mxu1 %v6578_v34  ;;  %v6651_v10 = vld [vmem:[#allocation2 + $0x228] ss:$16 sps:$4 sm:$0xff]   ;;  %v6958_v34 = vld [vmem:[%s8292_s10 + $0xc] ss:$24 sps:$4 sm:$0xff]  }
 0x15f   :  { %2846 = vmatprep.subr.bf16.mxu0 %v6575_v32  ;;  %v6656_v32 = vld [vmem:[#allocation2 + $0x24c] ss:$16 sps:$4 sm:$0xff]  }
 0x161   :  { %2890 = vmatpush1.bf16.msra.mxu1 %v6576_v35  ;;  %v6654_v35 = vld [vmem:[#allocation2 + $0x248] ss:$16 sps:$4 sm:$0xff]  }
 0x162   :  { %2847 = vmatpush1.bf16.msra.mxu0 %v6573_v33  ;;  %2891 = vmatprep.subr.bf16.mxu1 %v6584_v19  ;;  %v6959_v33 = vld [vmem:[#allocation5 + $0x20] ss:$16 sps:$4 sm:$0xff]   ;;  %v6659_v19 = vld [vmem:[#allocation2 + $0x26c] ss:$16 sps:$4 sm:$0xff]  }
 0x163   :  { %2848 = vmatprep.subr.bf16.mxu0 %v6581_v36  ;;  %v7654_v41 = vpop.f32.mrb[0].mxu1  ;;  %v6960_v36 = vld [vmem:[#allocation5 + $0x44] ss:$16 sps:$4 sm:$0xff]  }
 0x164   :  { %v7656_v44 = vpop.f32.mrb[1].mxu1 }
 0x165   :  { %v7658_v45 = vpop.f32.mrb[2].mxu1  ;;  %2892 = vmatpush1.bf16.msra.mxu1 %v6582_v38  ;;  %v6657_v38 = vld [vmem:[#allocation2 + $0x268] ss:$16 sps:$4 sm:$0xff]  }
 0x166   :  { %2849 = vmatpush1.bf16.msra.mxu0 %v6579_v37  ;;  %v7660_v48 = vpop.f32.mrb[3].mxu1  ;;  %2893 = vmatprep.subr.bf16.mxu1 %v6590_v40  ;;  %v6961_v37 = vld [vmem:[#allocation5 + $0x40] ss:$16 sps:$4 sm:$0xff]   ;;  %v6662_v40 = vld [vmem:[#allocation2 + $0x28c] ss:$16 sps:$4 sm:$0xff]  }
 0x167   :  { %2850 = vmatprep.subr.bf16.mxu0 %v6587_v39  ;;  %v6962_v39 = vld [vmem:[#allocation5 + $0x64] ss:$16 sps:$4 sm:$0xff]  }
 0x169   :  { %2894 = vmatpush1.bf16.msra.mxu1 %v6588_v43  ;;  %v6660_v43 = vld [vmem:[#allocation2 + $0x288] ss:$16 sps:$4 sm:$0xff]  }
 0x16a   :  { %2851 = vmatpush1.bf16.msra.mxu0 %v6585_v42  ;;  %2895 = vmatprep.subr.bf16.mxu1 %v6596_v47  ;;  %v6963_v42 = vld [vmem:[#allocation5 + $0x60] ss:$16 sps:$4 sm:$0xff]   ;;  %v6665_v47 = vld [vmem:[#allocation2 + $0x2ac] ss:$16 sps:$4 sm:$0xff]  }
 0x16b   :  { %2852 = vmatprep.subr.bf16.mxu0 %v6593_v46  ;;  %v6964_v46 = vld [vmem:[#allocation5 + $0x84] ss:$16 sps:$4 sm:$0xff]  }
 0x16d   :  { %2896 = vmatpush1.bf16.msra.mxu1 %v6594_v50  ;;  %v6663_v50 = vld [vmem:[#allocation2 + $0x2a8] ss:$16 sps:$4 sm:$0xff]  }
 0x16e   :  { %2853 = vmatpush1.bf16.msra.mxu0 %v6591_v49  ;;  %2897 = vmatprep.subr.bf16.mxu1 %v6602_v53  ;;  %v6965_v49 = vld [vmem:[#allocation5 + $0x80] ss:$16 sps:$4 sm:$0xff]   ;;  %v6668_v53 = vld [vmem:[#allocation2 + $0x2cc] ss:$16 sps:$4 sm:$0xff]  }
 0x16f   :  { %2854 = vmatprep.subr.bf16.mxu0 %v6599_v52  ;;  %v6966_v52 = vld [vmem:[#allocation5 + $0xa4] ss:$16 sps:$4 sm:$0xff]  }
 0x171   :  { %2898 = vmatpush1.bf16.msra.mxu1 %v6600_v55  ;;  %v6666_v55 = vld [vmem:[#allocation2 + $0x2c8] ss:$16 sps:$4 sm:$0xff]  }
 0x172   :  { %2855 = vmatpush1.bf16.msra.mxu0 %v6597_v54  ;;  %2899 = vmatprep.subr.bf16.mxu1 %v6608_v57  ;;  %v6967_v54 = vld [vmem:[#allocation5 + $0xa0] ss:$16 sps:$4 sm:$0xff]   ;;  %v6671_v57 = vld [vmem:[#allocation2 + $0x2ec] ss:$16 sps:$4 sm:$0xff]  }
 0x173   :  { %2856 = vmatprep.subr.bf16.mxu0 %v6605_v56  ;;  %v6968_v56 = vld [vmem:[#allocation5 + $0xc4] ss:$16 sps:$4 sm:$0xff]  }
 0x175   :  { %2900 = vmatpush1.bf16.msra.mxu1 %v6606_v59  ;;  %v6669_v59 = vld [vmem:[#allocation2 + $0x2e8] ss:$16 sps:$4 sm:$0xff]  }
 0x176   :  { %2857 = vmatpush1.bf16.msra.mxu0 %v6603_v58  ;;  %2901 = vmatprep.subr.bf16.mxu1 %v6614_v61  ;;  %v6969_v58 = vld [vmem:[#allocation5 + $0xc0] ss:$16 sps:$4 sm:$0xff]   ;;  %v6674_v61 = vld [vmem:[#allocation2 + $0x30c] ss:$16 sps:$4 sm:$0xff]  }
 0x177   :  { %2858 = vmatprep.subr.bf16.mxu0 %v6611_v60  ;;  %v6970_v60 = vld [vmem:[#allocation5 + $0xe4] ss:$16 sps:$4 sm:$0xff]  }
 0x179   :  { %2902 = vmatpush1.bf16.msra.mxu1 %v6612_v63  ;;  %v6672_v63 = vld [vmem:[#allocation2 + $0x308] ss:$16 sps:$4 sm:$0xff]  }
 0x17a   :  { %2859 = vmatpush1.bf16.msra.mxu0 %v6609_v62  ;;  %2903 = vmatprep.subr.bf16.mxu1 %v6620_v1  ;;  %v6971_v62 = vld [vmem:[#allocation5 + $0xe0] ss:$16 sps:$4 sm:$0xff]   ;;  %v6677_v1 = vld [vmem:[#allocation2 + $0x32c] ss:$16 sps:$4 sm:$0xff]  }
 0x17b   :  { %2860 = vmatprep.subr.bf16.mxu0 %v6617_v0  ;;  %v6972_v0 = vld [vmem:[#allocation5 + $0x104] ss:$16 sps:$4 sm:$0xff]  }
 0x17d   :  { %2904 = vmatpush1.bf16.msra.mxu1 %v6618_v3  ;;  %v6675_v3 = vld [vmem:[#allocation2 + $0x328] ss:$16 sps:$4 sm:$0xff]  }
 0x17e   :  { %2861 = vmatpush1.bf16.msra.mxu0 %v6615_v2  ;;  %2905 = vmatprep.subr.bf16.mxu1 %v6626_v7  ;;  %v6973_v2 = vld [vmem:[#allocation5 + $0x100] ss:$16 sps:$4 sm:$0xff]   ;;  %v6680_v7 = vld [vmem:[#allocation2 + $0x34c] ss:$16 sps:$4 sm:$0xff]  }
 0x17f   :  { %2862 = vmatprep.subr.bf16.mxu0 %v6623_v6  ;;  %v6974_v6 = vld [vmem:[#allocation5 + $0x124] ss:$16 sps:$4 sm:$0xff]  }
 0x181   :  { %2906 = vmatpush1.bf16.msra.mxu1 %v6624_v9  ;;  %v6678_v9 = vld [vmem:[#allocation2 + $0x348] ss:$16 sps:$4 sm:$0xff]  }
 0x182   :  { %2863 = vmatpush1.bf16.msra.mxu0 %v6621_v8  ;;  %2907 = vmatprep.subr.bf16.mxu1 %v6632_v12  ;;  %v6975_v8 = vld [vmem:[#allocation5 + $0x120] ss:$16 sps:$4 sm:$0xff]   ;;  %v6683_v12 = vld [vmem:[#allocation2 + $0x36c] ss:$16 sps:$4 sm:$0xff]  }
 0x183   :  { %2864 = vmatprep.subr.bf16.mxu0 %v6629_v11  ;;  %v6976_v11 = vld [vmem:[#allocation5 + $0x144] ss:$16 sps:$4 sm:$0xff]  }
 0x185   :  { %2908 = vmatpush1.bf16.msra.mxu1 %v6630_v14  ;;  %v6681_v14 = vld [vmem:[#allocation2 + $0x368] ss:$16 sps:$4 sm:$0xff]  }
 0x186   :  { %2865 = vmatpush1.bf16.msra.mxu0 %v6627_v13  ;;  %2909 = vmatprep.subr.bf16.mxu1 %v6638_v16  ;;  %v6977_v13 = vld [vmem:[#allocation5 + $0x140] ss:$16 sps:$4 sm:$0xff]   ;;  %v6686_v16 = vld [vmem:[#allocation2 + $0x38c] ss:$16 sps:$4 sm:$0xff]  }
 0x187   :  { %2866 = vmatprep.subr.bf16.mxu0 %v6635_v15  ;;  %v6978_v15 = vld [vmem:[#allocation5 + $0x164] ss:$16 sps:$4 sm:$0xff]  }
 0x189   :  { %2910 = vmatpush1.bf16.msra.mxu1 %v6636_v18  ;;  %v6684_v18 = vld [vmem:[#allocation2 + $0x388] ss:$16 sps:$4 sm:$0xff]  }
 0x18a   :  { %2867 = vmatpush1.bf16.msra.mxu0 %v6633_v17  ;;  %2911 = vmatprep.subr.bf16.mxu1 %v6644_v4  ;;  %v6979_v17 = vld [vmem:[#allocation5 + $0x160] ss:$16 sps:$4 sm:$0xff]   ;;  %v7680_v4 = vld [vmem:[#allocation2 + $0x3ac] ss:$16 sps:$4 sm:$0xff]  }
 0x18b   :  { %2868 = vmatprep.subr.bf16.mxu0 %v6641_v21  ;;  %v6980_v21 = vld [vmem:[#allocation5 + $0x184] ss:$16 sps:$4 sm:$0xff]  }
 0x18d   :  { %2912 = vmatpush1.bf16.msra.mxu1 %v6642_v23  ;;  %v7682_v23 = vld [vmem:[#allocation2 + $0x3a8] ss:$16 sps:$4 sm:$0xff]  }
 0x18e   :  { %2869 = vmatpush1.bf16.msra.mxu0 %v6639_v22  ;;  %2924 = vmatprep.subr.bf16.mxu1 %v6650_v51  ;;  %v6981_v22 = vld [vmem:[#allocation5 + $0x180] ss:$16 sps:$4 sm:$0xff]   ;;  %v6982_v51 = vld [vmem:[#allocation5 + $0x1a4] ss:$16 sps:$4 sm:$0xff]  }
 0x18f   :  { %3269 = vmatprep.subr.bf16.mxu0 %v6954_v5  ;;  %v6983_v5 = vld [vmem:[#allocation5 + $0x1a0] ss:$16 sps:$4 sm:$0xff]  }
 0x190   :  { %2914 = vmatmul.mubr.bf16.vlgmr.msra.gmra.mrb[4].mxu1 %v6955_v29  ;;  %v6984_v29 = vld [vmem:[#allocation5 + $0x1c4] ss:$16 sps:$4 sm:$0xff]  }
 0x191   :  { %2871 = vmatmul.mubr.bf16.vlgmr.msra.gmra.mrb[0].mxu0 %v7665_v25  ;;  %2925 = vmatpush1.bf16.msra.mxu1 %v6648_v26  ;;  %v7685_v26 = vld [vmem:[#allocation2 + $0x3cc] ss:$16 sps:$4 sm:$0xff]  }
 0x192   :  { %3270 = vmatpush1.bf16.msra.mxu0 %v6956_v30  ;;  %2926 = vmatprep.subr.bf16.mxu1 %v6653_v27  ;;  %v7688_v27 = vld [vmem:[#allocation2 + $0x3c8] ss:$16 sps:$4 sm:$0xff]   ;;  %v7691_v30 = vld [vmem:[#allocation2 + $0x3ec] ss:$16 sps:$4 sm:$0xff]  }
 0x193   :  { %3271 = vmatprep.subr.bf16.mxu0 %v6957_v31  ;;  %2956 = vmatprep.mubr.bf16.mxu1 %v6958_v34  ;;  %v7694_v31 = vld [vmem:[#allocation2 + $0x3e8] ss:$16 sps:$4 sm:$0xff]   ;;  %v7697_v34 = vld [vmem:[#allocation2 + $0x40c] ss:$16 sps:$4 sm:$0xff]  }
 0x194   :  { %3301 = vmatprep.mubr.bf16.mxu0 %v7670_v28 }
 0x195   :  { %2927 = vmatpush1.bf16.msra.mxu1 %v6651_v10  ;;  %v6985_v10 = vld [vmem:[#allocation5 + $0x1c0] ss:$16 sps:$4 sm:$0xff]  }
 0x196   :  { %3272 = vmatpush1.bf16.msra.mxu0 %v6959_v33  ;;  %2928 = vmatprep.subr.bf16.mxu1 %v6656_v32  ;;  %v6986_v32 = vld [vmem:[#allocation5 + $0x1e4] ss:$16 sps:$4 sm:$0xff]   ;;  %v7702_v33 = vld [vmem:[%s8253_s5] ss:$24 sps:$4 sm:$0xff]  }
 0x197   :  { %3273 = vmatprep.subr.bf16.mxu0 %v6960_v36  ;;  %v7705_v36 = vld [vmem:[#allocation2 + $0x408] ss:$16 sps:$4 sm:$0xff]  }
 0x199   :  { %2929 = vmatpush1.bf16.msra.mxu1 %v6654_v35  ;;  %v6987_v35 = vld [vmem:[#allocation5 + $0x1e0] ss:$16 sps:$4 sm:$0xff]  }
 0x19a   :  { %3274 = vmatpush1.bf16.msra.mxu0 %v6961_v37  ;;  %2930 = vmatprep.subr.bf16.mxu1 %v6659_v19  ;;  %v6988_v19 = vld [vmem:[#allocation5 + $0x204] ss:$16 sps:$4 sm:$0xff]   ;;  %v7708_v37 = vld [vmem:[#allocation2 + $0x42c] ss:$16 sps:$4 sm:$0xff]  }
 0x19b   :  { %3275 = vmatprep.subr.bf16.mxu0 %v6962_v39  ;;  %v6989_v39 = vld [vmem:[#allocation5 + $0x200] ss:$16 sps:$4 sm:$0xff]  }
 0x19d   :  { %2931 = vmatpush1.bf16.msra.mxu1 %v6657_v38  ;;  %v7713_v38 = vld [vmem:[%s8253_s5 + $0xc] ss:$24 sps:$4 sm:$0xff]  }
 0x19e   :  { %3276 = vmatpush1.bf16.msra.mxu0 %v6963_v42  ;;  %2932 = vmatprep.subr.bf16.mxu1 %v6662_v40  ;;  %v7718_v40 = vld [vmem:[#allocation2 + $0x428] ss:$16 sps:$4 sm:$0xff]   ;;  %v6990_v42 = vld [vmem:[#allocation5 + $0x224] ss:$16 sps:$4 sm:$0xff]  }
 0x19f   :  { %3277 = vmatprep.subr.bf16.mxu0 %v6964_v46  ;;  %v7726_v46 = vld [vmem:[#allocation2 + $0x448] ss:$16 sps:$4 sm:$0xff]  }
 0x1a1   :  { %2933 = vmatpush1.bf16.msra.mxu1 %v6660_v43  ;;  %v7721_v43 = vld [vmem:[#allocation2 + $0x44c] ss:$16 sps:$4 sm:$0xff]  }
 0x1a2   :  { %3278 = vmatpush1.bf16.msra.mxu0 %v6965_v49  ;;  %2934 = vmatprep.subr.bf16.mxu1 %v6665_v47  ;;  %v6992_v47 = vld [vmem:[#allocation5 + $0x244] ss:$16 sps:$4 sm:$0xff]   ;;  %v7729_v49 = vld [vmem:[#allocation2 + $0x46c] ss:$16 sps:$4 sm:$0xff]  }
 0x1a3   :  { %3279 = vmatprep.subr.bf16.mxu0 %v6966_v52  ;;  %v7732_v52 = vld [vmem:[#allocation2 + $0x468] ss:$16 sps:$4 sm:$0xff]  }
 0x1a5   :  { %2935 = vmatpush1.bf16.msra.mxu1 %v6663_v50  ;;  %v6993_v50 = vld [vmem:[#allocation5 + $0x240] ss:$16 sps:$4 sm:$0xff]  }
 0x1a6   :  { %3280 = vmatpush1.bf16.msra.mxu0 %v6967_v54  ;;  %2936 = vmatprep.subr.bf16.mxu1 %v6668_v53  ;;  %v7735_v53 = vld [vmem:[#allocation2 + $0x48c] ss:$16 sps:$4 sm:$0xff]   ;;  %v6995_v54 = vld [vmem:[#allocation5 + $0x260] ss:$16 sps:$4 sm:$0xff]  }
 0x1a7   :  { %3281 = vmatprep.subr.bf16.mxu0 %v6968_v56  ;;  %v6996_v56 = vld [vmem:[#allocation5 + $0x284] ss:$16 sps:$4 sm:$0xff]  }
 0x1a9   :  { %2937 = vmatpush1.bf16.msra.mxu1 %v6666_v55  ;;  %v7738_v55 = vld [vmem:[#allocation2 + $0x488] ss:$16 sps:$4 sm:$0xff]  }
 0x1aa   :  { %3282 = vmatpush1.bf16.msra.mxu0 %v6969_v58  ;;  %2938 = vmatprep.subr.bf16.mxu1 %v6671_v57  ;;  %v7741_v57 = vld [vmem:[#allocation2 + $0x4ac] ss:$16 sps:$4 sm:$0xff]   ;;  %v6997_v58 = vld [vmem:[#allocation5 + $0x280] ss:$16 sps:$4 sm:$0xff]  }
 0x1ab   :  { %3283 = vmatprep.subr.bf16.mxu0 %v6970_v60  ;;  %v6998_v60 = vld [vmem:[#allocation5 + $0x2a4] ss:$16 sps:$4 sm:$0xff]  }
 0x1ad   :  { %2939 = vmatpush1.bf16.msra.mxu1 %v6669_v59  ;;  %v7744_v59 = vld [vmem:[#allocation2 + $0x4a8] ss:$16 sps:$4 sm:$0xff]  }
 0x1ae   :  { %3284 = vmatpush1.bf16.msra.mxu0 %v6971_v62  ;;  %2940 = vmatprep.subr.bf16.mxu1 %v6674_v61  ;;  %v7747_v61 = vld [vmem:[#allocation2 + $0x4cc] ss:$16 sps:$4 sm:$0xff]   ;;  %v6999_v62 = vld [vmem:[#allocation5 + $0x2a0] ss:$16 sps:$4 sm:$0xff]  }
 0x1af   :  { %3285 = vmatprep.subr.bf16.mxu0 %v6972_v0  ;;  %v7000_v0 = vld [vmem:[#allocation5 + $0x2c4] ss:$16 sps:$4 sm:$0xff]  }
 0x1b1   :  { %2941 = vmatpush1.bf16.msra.mxu1 %v6672_v63  ;;  %v7750_v63 = vld [vmem:[#allocation2 + $0x4c8] ss:$16 sps:$4 sm:$0xff]  }
 0x1b2   :  { %3286 = vmatpush1.bf16.msra.mxu0 %v6973_v2  ;;  %2942 = vmatprep.subr.bf16.mxu1 %v6677_v1  ;;  %v7753_v1 = vld [vmem:[#allocation2 + $0x4ec] ss:$16 sps:$4 sm:$0xff]   ;;  %v7001_v2 = vld [vmem:[#allocation5 + $0x2c0] ss:$16 sps:$4 sm:$0xff]  }
 0x1b3   :  { %3287 = vmatprep.subr.bf16.mxu0 %v6974_v6  ;;  %v7002_v6 = vld [vmem:[#allocation5 + $0x2e4] ss:$16 sps:$4 sm:$0xff]  }
 0x1b5   :  { %2943 = vmatpush1.bf16.msra.mxu1 %v6675_v3  ;;  %v7756_v3 = vld [vmem:[#allocation2 + $0x4e8] ss:$16 sps:$4 sm:$0xff]  }
 0x1b6   :  { %3288 = vmatpush1.bf16.msra.mxu0 %v6975_v8  ;;  %2944 = vmatprep.subr.bf16.mxu1 %v6680_v7  ;;  %v7759_v7 = vld [vmem:[#allocation2 + $0x50c] ss:$16 sps:$4 sm:$0xff]   ;;  %v7003_v8 = vld [vmem:[#allocation5 + $0x2e0] ss:$16 sps:$4 sm:$0xff]  }
 0x1b7   :  { %3289 = vmatprep.subr.bf16.mxu0 %v6976_v11  ;;  %v7004_v11 = vld [vmem:[#allocation5 + $0x304] ss:$16 sps:$4 sm:$0xff]  }
 0x1b9   :  { %2945 = vmatpush1.bf16.msra.mxu1 %v6678_v9  ;;  %v7762_v9 = vld [vmem:[#allocation2 + $0x508] ss:$16 sps:$4 sm:$0xff]  }
 0x1ba   :  { %3290 = vmatpush1.bf16.msra.mxu0 %v6977_v13  ;;  %2946 = vmatprep.subr.bf16.mxu1 %v6683_v12  ;;  %v7765_v12 = vld [vmem:[#allocation2 + $0x52c] ss:$16 sps:$4 sm:$0xff]   ;;  %v7005_v13 = vld [vmem:[#allocation5 + $0x300] ss:$16 sps:$4 sm:$0xff]  }
 0x1bb   :  { %3291 = vmatprep.subr.bf16.mxu0 %v6978_v15  ;;  %v7006_v15 = vld [vmem:[#allocation5 + $0x324] ss:$16 sps:$4 sm:$0xff]  }
 0x1bd   :  { %2947 = vmatpush1.bf16.msra.mxu1 %v6681_v14  ;;  %v7768_v14 = vld [vmem:[#allocation2 + $0x528] ss:$16 sps:$4 sm:$0xff]  }
 0x1be   :  { %3292 = vmatpush1.bf16.msra.mxu0 %v6979_v17  ;;  %2948 = vmatprep.subr.bf16.mxu1 %v6686_v16  ;;  %v7771_v16 = vld [vmem:[#allocation2 + $0x54c] ss:$16 sps:$4 sm:$0xff]   ;;  %v7007_v17 = vld [vmem:[#allocation5 + $0x320] ss:$16 sps:$4 sm:$0xff]  }
 0x1bf   :  { %3293 = vmatprep.subr.bf16.mxu0 %v6980_v21  ;;  %v7008_v21 = vld [vmem:[#allocation5 + $0x344] ss:$16 sps:$4 sm:$0xff]  }
 0x1c1   :  { %2949 = vmatpush1.bf16.msra.mxu1 %v6684_v18  ;;  %v7774_v18 = vld [vmem:[#allocation2 + $0x548] ss:$16 sps:$4 sm:$0xff]  }
 0x1c2   :  { %3294 = vmatpush1.bf16.msra.mxu0 %v6981_v22  ;;  %2950 = vmatprep.subr.bf16.mxu1 %v7680_v4  ;;  %v7777_v22 = vld [vmem:[#allocation2 + $0x56c] ss:$16 sps:$4 sm:$0xff]  }
 0x1c3   :  { %3295 = vmatprep.subr.bf16.mxu0 %v6982_v51  ;;  %v7009_v51 = vld [vmem:[#allocation5 + $0x340] ss:$16 sps:$4 sm:$0xff]  }
 0x1c5   :  { %2951 = vmatpush1.bf16.msra.mxu1 %v7682_v23 }
 0x1c6   :  { %3296 = vmatpush1.bf16.msra.mxu0 %v6983_v5  ;;  %2952 = vmatprep.subr.bf16.mxu1 %v7685_v26  ;;  %v7780_v5 = vld [vmem:[#allocation2 + $0x568] ss:$16 sps:$4 sm:$0xff]  }
 0x1c7   :  { %3297 = vmatprep.subr.bf16.mxu0 %v6984_v29  ;;  %v7010_v29 = vld [vmem:[#allocation5 + $0x364] ss:$16 sps:$4 sm:$0xff]  }
 0x1c9   :  { %2953 = vmatpush1.bf16.msra.mxu1 %v7688_v27 }
 0x1ca   :  { %3298 = vmatpush1.bf16.msra.mxu0 %v6985_v10  ;;  %2954 = vmatprep.subr.bf16.mxu1 %v7691_v30  ;;  %v7783_v10 = vld [vmem:[#allocation2 + $0x58c] ss:$16 sps:$4 sm:$0xff]  }
 0x1cb   :  { %3299 = vmatprep.subr.bf16.mxu0 %v6986_v32  ;;  %v7011_v32 = vld [vmem:[#allocation5 + $0x360] ss:$16 sps:$4 sm:$0xff]  }
 0x1cd   :  { %2955 = vmatpush1.bf16.msra.mxu1 %v7694_v31 }
 0x1ce   :  { %3300 = vmatpush1.bf16.msra.mxu0 %v6987_v35  ;;  %2967 = vmatprep.subr.bf16.mxu1 %v7697_v34  ;;  %v7786_v35 = vld [vmem:[#allocation2 + $0x588] ss:$16 sps:$4 sm:$0xff]  }
 0x1cf   :  { %3312 = vmatprep.subr.bf16.mxu0 %v6988_v19  ;;  %v7012_v19 = vld [vmem:[#allocation5 + $0x384] ss:$16 sps:$4 sm:$0xff]  }
 0x1d0   :  { %2957 = vmatmul.mubr.bf16.vlgmr.msra.gmra.mrb[4].mxu1 %v7643_v20  ;;  %v6991_v20 = vld [vmem:[#allocation5 + $0x220] ss:$16 sps:$4 sm:$0xff]  }
 0x1d1   :  { %3302 = vmatmul.mubr.bf16.vlgmr.msra.gmra.mrb[4].mxu0 %v7702_v33  ;;  %2968 = vmatpush1.bf16.msra.mxu1 %v7705_v36 }
 0x1d2   :  { %3313 = vmatpush1.bf16.msra.mxu0 %v6989_v39  ;;  %2969 = vmatprep.subr.bf16.mxu1 %v7708_v37  ;;  %v7789_v39 = vld [vmem:[#allocation2 + $0x5ac] ss:$16 sps:$4 sm:$0xff]  }
 0x1d3   :  { %3314 = vmatprep.subr.bf16.mxu0 %v6990_v42  ;;  %2999 = vmatprep.mubr.bf16.mxu1 %v7648_v24  ;;  %v6994_v24 = vld [vmem:[#allocation5 + $0x264] ss:$16 sps:$4 sm:$0xff]   ;;  %v7013_v42 = vld [vmem:[#allocation5 + $0x380] ss:$16 sps:$4 sm:$0xff]  }
 0x1d4   :  { %3344 = vmatprep.mubr.bf16.mxu0 %v7713_v38 }
 0x1d5   :  { %2970 = vmatpush1.bf16.msra.mxu1 %v7718_v40 }
 0x1d6   :  { %3315 = vmatpush1.bf16.msra.mxu0 %v6991_v20  ;;  %2971 = vmatprep.subr.bf16.mxu1 %v7721_v43  ;;  %v7792_v20 = vld [vmem:[#allocation2 + $0x5a8] ss:$16 sps:$4 sm:$0xff]  }
 0x1d7   :  { %3316 = vmatprep.subr.bf16.mxu0 %v6992_v47  ;;  %8293 = vst [vmem:[#allocation15_spill] sm:$0xff] %v7792_v20  ;;  %v7014_v47 = vld [vmem:[#allocation5 + $0x3a4] ss:$16 sps:$4 sm:$0xff]  }
 0x1d9   :  { %2972 = vmatpush1.bf16.msra.mxu1 %v7726_v46 }
 0x1da   :  { %3317 = vmatpush1.bf16.msra.mxu0 %v6993_v50  ;;  %2973 = vmatprep.subr.bf16.mxu1 %v7729_v49  ;;  %v7795_v50 = vld [vmem:[#allocation2 + $0x5cc] ss:$16 sps:$4 sm:$0xff]  }
 0x1db   :  { %3318 = vmatprep.subr.bf16.mxu0 %v6994_v24  ;;  %8294 = vst [vmem:[#allocation16_spill] sm:$0xff] %v7795_v50  ;;  %v7015_v24 = vld [vmem:[#allocation5 + $0x3a0] ss:$16 sps:$4 sm:$0xff]  }
 0x1dd   :  { %2974 = vmatpush1.bf16.msra.mxu1 %v7732_v52 }
 0x1de   :  { %3319 = vmatpush1.bf16.msra.mxu0 %v6995_v54  ;;  %2975 = vmatprep.subr.bf16.mxu1 %v7735_v53  ;;  %v7798_v54 = vld [vmem:[#allocation2 + $0x5c8] ss:$16 sps:$4 sm:$0xff]  }
 0x1df   :  { %3320 = vmatprep.subr.bf16.mxu0 %v6996_v56  ;;  %8295 = vst [vmem:[#allocation17_spill] sm:$0xff] %v7798_v54  ;;  %v7016_v56 = vld [vmem:[#allocation5 + $0x3c4] ss:$16 sps:$4 sm:$0xff]  }
 0x1e1   :  { %2976 = vmatpush1.bf16.msra.mxu1 %v7738_v55 }
 0x1e2   :  { %3321 = vmatpush1.bf16.msra.mxu0 %v6997_v58  ;;  %2977 = vmatprep.subr.bf16.mxu1 %v7741_v57  ;;  %v7801_v58 = vld [vmem:[#allocation2 + $0x5ec] ss:$16 sps:$4 sm:$0xff]  }
 0x1e3   :  { %3322 = vmatprep.subr.bf16.mxu0 %v6998_v60  ;;  %8296 = vst [vmem:[#allocation18_spill] sm:$0xff] %v7801_v58  ;;  %v7017_v60 = vld [vmem:[#allocation5 + $0x3c0] ss:$16 sps:$4 sm:$0xff]  }
 0x1e5   :  { %2978 = vmatpush1.bf16.msra.mxu1 %v7744_v59 }
 0x1e6   :  { %3323 = vmatpush1.bf16.msra.mxu0 %v6999_v62  ;;  %2979 = vmatprep.subr.bf16.mxu1 %v7747_v61  ;;  %v7804_v62 = vld [vmem:[#allocation2 + $0x5e8] ss:$16 sps:$4 sm:$0xff]  }
 0x1e7   :  { %3324 = vmatprep.subr.bf16.mxu0 %v7000_v0  ;;  %8297 = vst [vmem:[#allocation19_spill] sm:$0xff] %v7804_v62  ;;  %v7018_v0 = vld [vmem:[#allocation5 + $0x3e4] ss:$16 sps:$4 sm:$0xff]  }
 0x1e9   :  { %2980 = vmatpush1.bf16.msra.mxu1 %v7750_v63 }
 0x1ea   :  { %3325 = vmatpush1.bf16.msra.mxu0 %v7001_v2  ;;  %2981 = vmatprep.subr.bf16.mxu1 %v7753_v1  ;;  %v7810_v2 = vld [vmem:[%s8254_s6 + $0x8] sm:$0xff] }
 0x1eb   :  { %3326 = vmatprep.subr.bf16.mxu0 %v7002_v6  ;;  %8298 = vst [vmem:[#allocation20_spill] sm:$0xff] %v7810_v2  ;;  %v7815_v6 = vld [vmem:[%s8253_s5 + $0x8] ss:$24 sps:$4 sm:$0xff]  }
 0x1ed   :  { %2982 = vmatpush1.bf16.msra.mxu1 %v7756_v3 }
 0x1ee   :  { %3327 = vmatpush1.bf16.msra.mxu0 %v7003_v8  ;;  %2983 = vmatprep.subr.bf16.mxu1 %v7759_v7  ;;  %v7019_v8 = vld [vmem:[#allocation5 + $0x3e0] ss:$16 sps:$4 sm:$0xff]  }
 0x1ef   :  { %3328 = vmatprep.subr.bf16.mxu0 %v7004_v11  ;;  %v7020_v11 = vld [vmem:[#allocation5 + $0x404] ss:$16 sps:$4 sm:$0xff]  }
 0x1f1   :  { %2984 = vmatpush1.bf16.msra.mxu1 %v7762_v9 }
 0x1f2   :  { %3329 = vmatpush1.bf16.msra.mxu0 %v7005_v13  ;;  %2985 = vmatprep.subr.bf16.mxu1 %v7765_v12  ;;  %v7822_v13 = vld [vmem:[%s8254_s6] sm:$0xff] }
 0x1f3   :  { %3330 = vmatprep.subr.bf16.mxu0 %v7006_v15  ;;  %8299 = vst [vmem:[#allocation21_spill] sm:$0xff] %v7822_v13  ;;  %v7827_v15 = vld [vmem:[%s8253_s5 + $0x14] ss:$24 sps:$4 sm:$0xff]  }
 0x1f5   :  { %2986 = vmatpush1.bf16.msra.mxu1 %v7768_v14 }
 0x1f6   :  { %3331 = vmatpush1.bf16.msra.mxu0 %v7007_v17  ;;  %2987 = vmatprep.subr.bf16.mxu1 %v7771_v16  ;;  %v7834_v17 = vld [vmem:[%s8254_s6 + $0x18] sm:$0xff] }
 0x1f7   :  { %3332 = vmatprep.subr.bf16.mxu0 %v7008_v21  ;;  %8300 = vst [vmem:[#allocation22_spill] sm:$0xff] %v7834_v17  ;;  %v7021_v21 = vld [vmem:[#allocation5 + $0x400] ss:$16 sps:$4 sm:$0xff]  }
 0x1f9   :  { %2988 = vmatpush1.bf16.msra.mxu1 %v7774_v18 }
 0x1fa   :  { %3333 = vmatpush1.bf16.msra.mxu0 %v7009_v51  ;;  %2989 = vmatprep.subr.bf16.mxu1 %v7777_v22  ;;  %v7022_v51 = vld [vmem:[#allocation5 + $0x424] ss:$16 sps:$4 sm:$0xff]  }
 0x1fb   :  { %3334 = vmatprep.subr.bf16.mxu0 %v7010_v29  ;;  %v8272_v29 = vmov 0.0  }
 0x1fd   :  { %2990 = vmatpush1.bf16.msra.mxu1 %v7780_v5 }
 0x1fe   :  { %3335 = vmatpush1.bf16.msra.mxu0 %v7011_v32  ;;  %2991 = vmatprep.subr.bf16.mxu1 %v7783_v10  ;;  %v3010_v32 = vld [vmem:[%s8301_s23] sm:$0xff] }
 0x1ff   :  { %3336 = vmatprep.subr.bf16.mxu0 %v7012_v19  ;;  %v7024_v19 = vld [vmem:[#allocation5 + $0x444] ss:$16 sps:$4 sm:$0xff]  }
 0x201   :  { %2992 = vmatpush1.bf16.msra.mxu1 %v7786_v35 }
 0x202   :  { %3337 = vmatpush1.bf16.msra.mxu0 %v7013_v42  ;;  %2993 = vmatprep.subr.bf16.mxu1 %v7789_v39  ;;  %v7846_v42 = vld [vmem:[%s8254_s6 + $0x10] sm:$0xff] }
 0x203   :  { %3338 = vmatprep.subr.bf16.mxu0 %v7014_v47  ;;  %8302 = vst [vmem:[#allocation23_spill] sm:$0xff] %v7846_v42  ;;  %v7025_v47 = vld [vmem:[#allocation5 + $0x440] ss:$16 sps:$4 sm:$0xff]  }
 0x205   :  { %2994 = vmatpush1.bf16.msra.mxu1 %v7792_v20 }
 0x206   :  { %3339 = vmatpush1.bf16.msra.mxu0 %v7015_v24  ;;  %2995 = vmatprep.subr.bf16.mxu1 %v7795_v50  ;;  %v3011_v24 = vld [vmem:[%s8301_s23 + $0x8] sm:$0xff] }
 0x207   :  { %3340 = vmatprep.subr.bf16.mxu0 %v7016_v56  ;;  %v7026_v56 = vld [vmem:[#allocation5 + $0x464] ss:$16 sps:$4 sm:$0xff]  }
 0x209   :  { %2996 = vmatpush1.bf16.msra.mxu1 %v7798_v54  ;;  %v7239_v54 = vld [vmem:[#allocation2 + $0x500] ss:$16 sps:$4 sm:$0xff]  }
 0x20a   :  { %3341 = vmatpush1.bf16.msra.mxu0 %v7017_v60  ;;  %2997 = vmatprep.subr.bf16.mxu1 %v7801_v58  ;;  %v7027_v60 = vld [vmem:[#allocation5 + $0xc] ss:$16 sps:$4 sm:$0xff]  }
 0x20b   :  { %3342 = vmatprep.subr.bf16.mxu0 %v7018_v0  ;;  %v7028_v0 = vld [vmem:[#allocation5 + $0x460] ss:$16 sps:$4 sm:$0xff]  }
 0x20d   :  { %2998 = vmatpush1.bf16.msra.mxu1 %v7804_v62 }
 0x20e   :  { %3343 = vmatpush1.bf16.msra.mxu0 %v7019_v8  ;;  %3023 = vmatprep.subr.mxu1 %v7810_v2  ;;  %v7029_v8 = vld [vmem:[#allocation5 + $0x484] ss:$16 sps:$4 sm:$0xff]  }
 0x20f   :  { %3355 = vmatprep.subr.bf16.mxu0 %v7020_v11  ;;  %v7030_v11 = vld [vmem:[#allocation5 + $0x8] ss:$16 sps:$4 sm:$0xff]  }
 0x210   :  { %3000 = vmatmul.mubr.bf16.vlgmr.msra.gmra.mrb[4].mxu1 %v7665_v25  ;;  %v7023_v25 = vld [vmem:[#allocation5 + $0x420] ss:$16 sps:$4 sm:$0xff]  }
 0x211   :  { %3345 = vmatmul.mubr.bf16.vlgmr.msra.gmra.mrb[4].mxu0 %v7815_v6  ;;  %3024 = vmatpush1.msra.mxu1 %v7822_v13 }
 0x212   :  { %3356 = vmatpush1.bf16.msra.mxu0 %v7021_v21  ;;  %3087 = vmatprep.mubr.f32.mxu1 %v8272_v29  ;;  %v7031_v21 = vld [vmem:[#allocation5 + $0x480] ss:$16 sps:$4 sm:$0xff]  }
 0x213   :  { %3357 = vmatprep.subr.bf16.mxu0 %v7022_v51  ;;  %3100 = vmatprep.subr.mxu1 %v7834_v17  ;;  %v7032_v51 = vld [vmem:[#allocation5 + $0x2c] ss:$16 sps:$4 sm:$0xff]  }
 0x214   :  { %3387 = vmatprep.mubr.bf16.mxu0 %v7827_v15  ;;  %v7156_v17 = vld [vmem:[#allocation5 + $0x40c] ss:$16 sps:$4 sm:$0xff]  }
 0x216   :  { %3358 = vmatpush1.bf16.msra.mxu0 %v7023_v25  ;;  %v7033_v25 = vld [vmem:[#allocation5 + $0x4a4] ss:$16 sps:$4 sm:$0xff]  }
 0x217   :  { %3359 = vmatprep.subr.bf16.mxu0 %v7024_v19  ;;  %v7034_v19 = vld [vmem:[#allocation5 + $0x28] ss:$16 sps:$4 sm:$0xff]  }
 0x218   :  { %5695 = vmatmul.mubr.msk.f32.vlgmr.msra.gmra.mrb[8].mxu1 %vm3016_vm0, %v3010_v32 }
 0x219   :  { %3101 = vmatpush1.msra.mxu1 %v7846_v42  ;;  %3093 = vmatprep.mubr.f32.mxu1 %v8272_v29  ;;  %v7151_v42 = vld [vmem:[#allocation2 + $0x240] ss:$16 sps:$4 sm:$0xff]  }
 0x21a   :  { %3360 = vmatpush1.bf16.msra.mxu0 %v7025_v47  ;;  %3398 = vmatprep.subr.bf16.mxu1 %v7027_v60  ;;  %v7035_v47 = vld [vmem:[#allocation5 + $0x4a0] ss:$16 sps:$4 sm:$0xff]   ;;  %v7037_v60 = vld [vmem:[#allocation5 + $0x4c4] ss:$16 sps:$4 sm:$0xff]  }
 0x21b   :  { %3361 = vmatprep.subr.bf16.mxu0 %v7026_v56  ;;  %v7036_v56 = vld [vmem:[#allocation5 + $0x4c] ss:$16 sps:$4 sm:$0xff]  }
 0x21c   :  { %5696 = vmatmul.mubr.msk.f32.gmra.mrb[10].mxu1 %vm3016_vm0, %v3011_v24 }
 0x21d   :  { %3164 = vmatprep.mubr.f32.mxu1 %v8272_v29 }
 0x21e   :  { %3362 = vmatpush1.bf16.msra.mxu0 %v7028_v0  ;;  %v7039_v0 = vld [vmem:[#allocation5 + $0x4c0] ss:$16 sps:$4 sm:$0xff]  }
 0x21f   :  { %3363 = vmatprep.subr.bf16.mxu0 %v7029_v8  ;;  %v7040_v8 = vld [vmem:[#allocation5 + $0x6c] ss:$16 sps:$4 sm:$0xff]  }
 0x220   :  { %5697 = vmatmul.mubr.msk.f32.vlgmr.msra.gmra.mrb[12].mxu1 %vm3016_vm0, %v3010_v32  ;;  %v7038_v32 = vld [vmem:[#allocation5 + $0x48] ss:$16 sps:$4 sm:$0xff]  }
 0x221   :  { %3399 = vmatpush1.bf16.msra.mxu1 %v7030_v11  ;;  %3170 = vmatprep.mubr.f32.mxu1 %v8272_v29  ;;  %v7041_v11 = vld [vmem:[#allocation5 + $0x4e4] ss:$16 sps:$4 sm:$0xff]   ;;  %v7126_v29 = vld [vmem:[#allocation5 + $0x308] ss:$16 sps:$4 sm:$0xff]  }
 0x222   :  { %3364 = vmatpush1.bf16.msra.mxu0 %v7031_v21  ;;  %3400 = vmatprep.subr.bf16.mxu1 %v7032_v51  ;;  %v7042_v21 = vld [vmem:[#allocation5 + $0x68] ss:$16 sps:$4 sm:$0xff]   ;;  %v7044_v51 = vld [vmem:[#allocation5 + $0x8c] ss:$16 sps:$4 sm:$0xff]  }
 0x223   :  { %3365 = vmatprep.subr.bf16.mxu0 %v7033_v25  ;;  %v7045_v25 = vld [vmem:[#allocation5 + $0x504] ss:$16 sps:$4 sm:$0xff]  }
 0x224   :  { %5698 = vmatmul.mubr.msk.f32.gmra.mrb[14].mxu1 %vm3016_vm0, %v3011_v24  ;;  %v7043_v24 = vld [vmem:[#allocation5 + $0x4e0] ss:$16 sps:$4 sm:$0xff]  }
 0x225   :  { %3401 = vmatpush1.bf16.msra.mxu1 %v7034_v19  ;;  %3430 = vmatprep.mubr.bf16.mxu1 %v7670_v28  ;;  %v7046_v19 = vld [vmem:[#allocation5 + $0x88] ss:$16 sps:$4 sm:$0xff]   ;;  %v7048_v28 = vld [vmem:[#allocation5 + $0xac] ss:$16 sps:$4 sm:$0xff]  }
 0x226   :  { %3366 = vmatpush1.bf16.msra.mxu0 %v7035_v47  ;;  %3402 = vmatprep.subr.bf16.mxu1 %v7036_v56  ;;  %v7047_v47 = vld [vmem:[#allocation5 + $0x500] ss:$16 sps:$4 sm:$0xff]   ;;  %v7049_v56 = vld [vmem:[#allocation5 + $0x524] ss:$16 sps:$4 sm:$0xff]  }
 0x227   :  { %3367 = vmatprep.subr.bf16.mxu0 %v7037_v60  ;;  %v7050_v60 = vld [vmem:[#allocation5 + $0xa8] ss:$16 sps:$4 sm:$0xff]  }
 0x229   :  { %3403 = vmatpush1.bf16.msra.mxu1 %v7038_v32  ;;  %v7051_v32 = vld [vmem:[#allocation5 + $0x520] ss:$16 sps:$4 sm:$0xff]  }
 0x22a   :  { %3368 = vmatpush1.bf16.msra.mxu0 %v7039_v0  ;;  %3404 = vmatprep.subr.bf16.mxu1 %v7040_v8  ;;  %v7052_v0 = vld [vmem:[#allocation5 + $0xcc] ss:$16 sps:$4 sm:$0xff]   ;;  %v7053_v8 = vld [vmem:[#allocation5 + $0x544] ss:$16 sps:$4 sm:$0xff]  }
 0x22b   :  { %3369 = vmatprep.subr.bf16.mxu0 %v7041_v11  ;;  %v7054_v11 = vld [vmem:[#allocation5 + $0xc8] ss:$16 sps:$4 sm:$0xff]  }
 0x22d   :  { %3405 = vmatpush1.bf16.msra.mxu1 %v7042_v21  ;;  %v7055_v21 = vld [vmem:[#allocation5 + $0x540] ss:$16 sps:$4 sm:$0xff]  }
 0x22e   :  { %3370 = vmatpush1.bf16.msra.mxu0 %v7043_v24  ;;  %3406 = vmatprep.subr.bf16.mxu1 %v7044_v51  ;;  %v7056_v24 = vld [vmem:[#allocation5 + $0xec] ss:$16 sps:$4 sm:$0xff]   ;;  %v7057_v51 = vld [vmem:[#allocation5 + $0x564] ss:$16 sps:$4 sm:$0xff]  }
 0x22f   :  { %3371 = vmatprep.subr.bf16.mxu0 %v7045_v25  ;;  %v7058_v25 = vld [vmem:[#allocation5 + $0xe8] ss:$16 sps:$4 sm:$0xff]  }
 0x231   :  { %3407 = vmatpush1.bf16.msra.mxu1 %v7046_v19  ;;  %v7059_v19 = vld [vmem:[#allocation5 + $0x560] ss:$16 sps:$4 sm:$0xff]  }
 0x232   :  { %3372 = vmatpush1.bf16.msra.mxu0 %v7047_v47  ;;  %3408 = vmatprep.subr.bf16.mxu1 %v7048_v28  ;;  %v7060_v47 = vld [vmem:[#allocation5 + $0x10c] ss:$16 sps:$4 sm:$0xff]   ;;  %v7061_v28 = vld [vmem:[#allocation5 + $0x584] ss:$16 sps:$4 sm:$0xff]  }
 0x233   :  { %3373 = vmatprep.subr.bf16.mxu0 %v7049_v56  ;;  %v7062_v56 = vld [vmem:[#allocation5 + $0x108] ss:$16 sps:$4 sm:$0xff]  }
 0x235   :  { %3409 = vmatpush1.bf16.msra.mxu1 %v7050_v60  ;;  %v7063_v60 = vld [vmem:[#allocation5 + $0x580] ss:$16 sps:$4 sm:$0xff]  }
 0x236   :  { %3374 = vmatpush1.bf16.msra.mxu0 %v7051_v32  ;;  %3410 = vmatprep.subr.bf16.mxu1 %v7052_v0  ;;  %v7064_v32 = vld [vmem:[#allocation5 + $0x12c] ss:$16 sps:$4 sm:$0xff]   ;;  %v7065_v0 = vld [vmem:[#allocation5 + $0x5a4] ss:$16 sps:$4 sm:$0xff]  }
 0x237   :  { %3375 = vmatprep.subr.bf16.mxu0 %v7053_v8  ;;  %v7066_v8 = vld [vmem:[#allocation5 + $0x128] ss:$16 sps:$4 sm:$0xff]  }
 0x239   :  { %3411 = vmatpush1.bf16.msra.mxu1 %v7054_v11  ;;  %v7067_v11 = vld [vmem:[#allocation5 + $0x5a0] ss:$16 sps:$4 sm:$0xff]  }
 0x23a   :  { %3376 = vmatpush1.bf16.msra.mxu0 %v7055_v21  ;;  %3412 = vmatprep.subr.bf16.mxu1 %v7056_v24  ;;  %v7068_v21 = vld [vmem:[#allocation5 + $0x14c] ss:$16 sps:$4 sm:$0xff]   ;;  %v7069_v24 = vld [vmem:[#allocation5 + $0x5c4] ss:$16 sps:$4 sm:$0xff]  }
 0x23b   :  { %3377 = vmatprep.subr.bf16.mxu0 %v7057_v51  ;;  %v7070_v51 = vld [vmem:[#allocation5 + $0x148] ss:$16 sps:$4 sm:$0xff]  }
 0x23d   :  { %3413 = vmatpush1.bf16.msra.mxu1 %v7058_v25  ;;  %v7071_v25 = vld [vmem:[#allocation5 + $0x5c0] ss:$16 sps:$4 sm:$0xff]  }
 0x23e   :  { %3378 = vmatpush1.bf16.msra.mxu0 %v7059_v19  ;;  %3414 = vmatprep.subr.bf16.mxu1 %v7060_v47  ;;  %v7072_v19 = vld [vmem:[#allocation5 + $0x16c] ss:$16 sps:$4 sm:$0xff]   ;;  %v7073_v47 = vld [vmem:[#allocation5 + $0x5e4] ss:$16 sps:$4 sm:$0xff]  }
 0x23f   :  { %3379 = vmatprep.subr.bf16.mxu0 %v7061_v28  ;;  %v7863_v28 = vld [vmem:[%s8253_s5 + $0x10] ss:$24 sps:$4 sm:$0xff]  }
 0x241   :  { %3415 = vmatpush1.bf16.msra.mxu1 %v7062_v56  ;;  %v7074_v56 = vld [vmem:[#allocation5 + $0x168] ss:$16 sps:$4 sm:$0xff]  }
 0x242   :  { %3380 = vmatpush1.bf16.msra.mxu0 %v7063_v60  ;;  %3416 = vmatprep.subr.bf16.mxu1 %v7064_v32  ;;  %v7075_v60 = vld [vmem:[#allocation5 + $0x5e0] ss:$16 sps:$4 sm:$0xff]   ;;  %v7076_v32 = vld [vmem:[#allocation5 + $0x18c] ss:$16 sps:$4 sm:$0xff]  }
 0x243   :  { %3381 = vmatprep.subr.bf16.mxu0 %v7065_v0  ;;  %v7077_v0 = vld [vmem:[#allocation2 + $0x4] ss:$16 sps:$4 sm:$0xff]  }
 0x245   :  { %3417 = vmatpush1.bf16.msra.mxu1 %v7066_v8  ;;  %v7868_v8 = vld [vmem:[%s8252_s4 + $0x4] ss:$24 sps:$4 sm:$0xff]  }
 0x246   :  { %3382 = vmatpush1.bf16.msra.mxu0 %v7067_v11  ;;  %3418 = vmatprep.subr.bf16.mxu1 %v7068_v21  ;;  %v7078_v11 = vld [vmem:[#allocation5 + $0x188] ss:$16 sps:$4 sm:$0xff]   ;;  %v7079_v21 = vld [vmem:[#allocation2] ss:$16 sps:$4 sm:$0xff]  }
 0x247   :  { %3383 = vmatprep.subr.bf16.mxu0 %v7069_v24  ;;  %v7080_v24 = vld [vmem:[#allocation5 + $0x1ac] ss:$16 sps:$4 sm:$0xff]  }
 0x249   :  { %3419 = vmatpush1.bf16.msra.mxu1 %v7070_v51  ;;  %v7081_v51 = vld [vmem:[#allocation2 + $0x24] ss:$16 sps:$4 sm:$0xff]  }
 0x24a   :  { %3384 = vmatpush1.bf16.msra.mxu0 %v7071_v25  ;;  %3420 = vmatprep.subr.bf16.mxu1 %v7072_v19  ;;  %v7082_v25 = vld [vmem:[#allocation5 + $0x1a8] ss:$16 sps:$4 sm:$0xff]   ;;  %v7083_v19 = vld [vmem:[#allocation2 + $0x20] ss:$16 sps:$4 sm:$0xff]  }
 0x24b   :  { %3385 = vmatprep.subr.bf16.mxu0 %v7073_v47  ;;  %v7084_v47 = vld [vmem:[#allocation5 + $0x1cc] ss:$16 sps:$4 sm:$0xff]  }
 0x24d   :  { %3421 = vmatpush1.bf16.msra.mxu1 %v7074_v56  ;;  %v7085_v56 = vld [vmem:[#allocation2 + $0x44] ss:$16 sps:$4 sm:$0xff]  }
 0x24e   :  { %3386 = vmatpush1.bf16.msra.mxu0 %v7075_v60  ;;  %3422 = vmatprep.subr.bf16.mxu1 %v7076_v32  ;;  %v7086_v60 = vld [vmem:[#allocation5 + $0x1c8] ss:$16 sps:$4 sm:$0xff]   ;;  %v7087_v32 = vld [vmem:[#allocation2 + $0x40] ss:$16 sps:$4 sm:$0xff]  }
 0x24f   :  { %3557 = vmatprep.subr.bf16.mxu0 %v7077_v0  ;;  %v7088_v0 = vld [vmem:[#allocation5 + $0x1ec] ss:$16 sps:$4 sm:$0xff]  }
 0x251   :  { %3388 = vmatmul.mubr.bf16.vlgmr.msra.gmra.mrb[4].mxu0 %v7863_v28  ;;  %3423 = vmatpush1.bf16.msra.mxu1 %v7078_v11  ;;  %v7089_v11 = vld [vmem:[#allocation2 + $0x64] ss:$16 sps:$4 sm:$0xff]  }
 0x252   :  { %3558 = vmatpush1.bf16.msra.mxu0 %v7079_v21  ;;  %3424 = vmatprep.subr.bf16.mxu1 %v7080_v24  ;;  %v7090_v21 = vld [vmem:[#allocation5 + $0x1e8] ss:$16 sps:$4 sm:$0xff]   ;;  %v7091_v24 = vld [vmem:[#allocation2 + $0x60] ss:$16 sps:$4 sm:$0xff]  }
 0x253   :  { %3559 = vmatprep.subr.bf16.mxu0 %v7081_v51  ;;  %3589 = vmatprep.mubr.bf16.mxu0 %v7868_v8  ;;  %v7092_v51 = vld [vmem:[#allocation5 + $0x20c] ss:$16 sps:$4 sm:$0xff]  }
 0x255   :  { %3425 = vmatpush1.bf16.msra.mxu1 %v7082_v25  ;;  %v7093_v25 = vld [vmem:[#allocation2 + $0x84] ss:$16 sps:$4 sm:$0xff]  }
 0x256   :  { %3560 = vmatpush1.bf16.msra.mxu0 %v7083_v19  ;;  %3426 = vmatprep.subr.bf16.mxu1 %v7084_v47  ;;  %v7094_v19 = vld [vmem:[#allocation5 + $0x208] ss:$16 sps:$4 sm:$0xff]   ;;  %v7095_v47 = vld [vmem:[#allocation2 + $0x80] ss:$16 sps:$4 sm:$0xff]  }
 0x257   :  { %3561 = vmatprep.subr.bf16.mxu0 %v7085_v56  ;;  %v7096_v56 = vld [vmem:[#allocation5 + $0x22c] ss:$16 sps:$4 sm:$0xff]  }
 0x259   :  { %3427 = vmatpush1.bf16.msra.mxu1 %v7086_v60  ;;  %v7097_v60 = vld [vmem:[#allocation2 + $0xa4] ss:$16 sps:$4 sm:$0xff]  }
 0x25a   :  { %3562 = vmatpush1.bf16.msra.mxu0 %v7087_v32  ;;  %3428 = vmatprep.subr.bf16.mxu1 %v7088_v0 }
 0x25b   :  { %3563 = vmatprep.subr.bf16.mxu0 %v7089_v11 }
 0x25d   :  { %3429 = vmatpush1.bf16.msra.mxu1 %v7090_v21 }
 0x25e   :  { %3564 = vmatpush1.bf16.msra.mxu0 %v7091_v24  ;;  %3441 = vmatprep.subr.bf16.mxu1 %v7092_v51  ;;  %v7098_v24 = vld [vmem:[#allocation5 + $0x228] ss:$16 sps:$4 sm:$0xff]   ;;  %v7099_v51 = vld [vmem:[#allocation2 + $0xa0] ss:$16 sps:$4 sm:$0xff]  }
 0x25f   :  { %3565 = vmatprep.subr.bf16.mxu0 %v7093_v25 }
 0x260   :  { %3431 = vmatmul.mubr.bf16.vlgmr.msra.gmra.mrb[16].mxu1 %v7702_v33 }
 0x261   :  { %3442 = vmatpush1.bf16.msra.mxu1 %v7094_v19  ;;  %3473 = vmatprep.mubr.bf16.mxu1 %v7713_v38  ;;  %v7102_v38 = vld [vmem:[#allocation5 + $0x248] ss:$16 sps:$4 sm:$0xff]  }
 0x262   :  { %3566 = vmatpush1.bf16.msra.mxu0 %v7095_v47  ;;  %3443 = vmatprep.subr.bf16.mxu1 %v7096_v56  ;;  %v7100_v47 = vld [vmem:[#allocation5 + $0x24c] ss:$16 sps:$4 sm:$0xff]   ;;  %v7101_v56 = vld [vmem:[#allocation2 + $0xc4] ss:$16 sps:$4 sm:$0xff]  }
 0x263   :  { %3567 = vmatprep.subr.bf16.mxu0 %v7097_v60  ;;  %v7104_v60 = vld [vmem:[#allocation5 + $0x26c] ss:$16 sps:$4 sm:$0xff]  }
 0x264   :  { %v2872_v32 = vpop.f32.mrb[0].mxu0 }
 0x265   :  { %v7875_v0 = vadd.f32 %v2872_v32, %v7654_v41  ;;  %v2874_v11 = vpop.f32.mrb[1].mxu0  ;;  %3444 = vmatpush1.bf16.msra.mxu1 %v7098_v24  ;;  %v7105_v32 = vld [vmem:[#allocation2 + $0xe4] ss:$16 sps:$4 sm:$0xff]   ;;  %v3187_v24 = vlaneseq }
 0x266   :  { %v7878_v21 = vadd.f32 %v2874_v11, %v7656_v44  ;;  %v2876_v33 = vpop.f32.mrb[2].mxu0  ;;  %3568 = vmatpush1.bf16.msra.mxu0 %v7099_v51  ;;  %3445 = vmatprep.subr.bf16.mxu1 %v7100_v47  ;;  %v7103_v44 = vld [vmem:[#allocation2 + $0xc0] ss:$16 sps:$4 sm:$0xff]   ;;  %v7106_v11 = vld [vmem:[#allocation5 + $0x268] ss:$16 sps:$4 sm:$0xff]  }
 0x267   :  { %v7881_v25 = vadd.f32 %v2876_v33, %v7658_v45  ;;  %v2878_v19 = vpop.f32.mrb[3].mxu0  ;;  %3569 = vmatprep.subr.bf16.mxu0 %v7101_v56  ;;  %v7107_v45 = vld [vmem:[#allocation2 + $0xe0] ss:$16 sps:$4 sm:$0xff]   ;;  %v7108_v33 = vld [vmem:[#allocation5 + $0x28c] ss:$16 sps:$4 sm:$0xff]  }
 0x268   :  { %v7884_v41 = vadd.f32 %v2878_v19, %v7660_v48  ;;  %v7109_v51 = vld [vmem:[#allocation2 + $0x104] ss:$16 sps:$4 sm:$0xff]   ;;  %v7110_v47 = vld [vmem:[#allocation5 + $0x288] ss:$16 sps:$4 sm:$0xff]   ;;  %v7111_v48 = vld [vmem:[#allocation2 + $0x100] ss:$16 sps:$4 sm:$0xff]  }
 0x269   :  { %3446 = vmatpush1.bf16.msra.mxu1 %v7102_v38  ;;  %v7886_v19 = vshrl.u32 %v3187_v24, 7  ;;  %v7112_v56 = vld [vmem:[#allocation5 + $0x2ac] ss:$16 sps:$4 sm:$0xff]   ;;  %v7113_v38 = vld [vmem:[#allocation2 + $0x124] ss:$16 sps:$4 sm:$0xff]  }
 0x26a   :  { %3570 = vmatpush1.bf16.msra.mxu0 %v7103_v44  ;;  %3447 = vmatprep.subr.bf16.mxu1 %v7104_v60  ;;  %v7892_v60 = vld [vmem:[%s8257_s9] sm:$0xf]  ;;  %v7116_v24 = vld [vmem:[#allocation5 + $0x2cc] ss:$16 sps:$4 sm:$0xff]  }
 0x26b   :  { %3571 = vmatprep.subr.bf16.mxu0 %v7105_v32  ;;  %8303 = vst [vmem:[#allocation24_spill] sm:$0xff] %v7886_v19  ;;  %v3197_v44 = vsub.s32 2, %v7886_v19  ;;  %v7114_v32 = vld [vmem:[#allocation5 + $0x2a8] ss:$16 sps:$4 sm:$0xff]  }
 0x26d   :  { %3448 = vmatpush1.bf16.msra.mxu1 %v7106_v11  ;;  %v7115_v11 = vld [vmem:[#allocation2 + $0x120] ss:$16 sps:$4 sm:$0xff]  }
 0x26e   :  { %3572 = vmatpush1.bf16.msra.mxu0 %v7107_v45  ;;  %3449 = vmatprep.subr.bf16.mxu1 %v7108_v33  ;;  %v7895_v45 = vrot.slane %v7892_v60, %v3197_v44  ;;  %v7117_v33 = vld [vmem:[#allocation2 + $0x144] ss:$16 sps:$4 sm:$0xff]  }
 0x26f   :  { %3573 = vmatprep.subr.bf16.mxu0 %v7109_v51  ;;  %v7118_v51 = vld [vmem:[#allocation5 + $0x2c8] ss:$16 sps:$4 sm:$0xff]   ;;  %v7125_v44 = vld [vmem:[#allocation2 + $0x184] ss:$16 sps:$4 sm:$0xff]  }
 0x271   :  { %3450 = vmatpush1.bf16.msra.mxu1 %v7110_v47  ;;  %v7119_v47 = vld [vmem:[#allocation2 + $0x140] ss:$16 sps:$4 sm:$0xff]  }
 0x272   :  { %3574 = vmatpush1.bf16.msra.mxu0 %v7111_v48  ;;  %3451 = vmatprep.subr.bf16.mxu1 %v7112_v56  ;;  %v7120_v48 = vld [vmem:[#allocation5 + $0x2ec] ss:$16 sps:$4 sm:$0xff]   ;;  %v7121_v56 = vld [vmem:[#allocation2 + $0x164] ss:$16 sps:$4 sm:$0xff]  }
 0x273   :  { %3575 = vmatprep.subr.bf16.mxu0 %v7113_v38  ;;  %v7122_v38 = vld [vmem:[#allocation5 + $0x2e8] ss:$16 sps:$4 sm:$0xff]  }
 0x275   :  { %3452 = vmatpush1.bf16.msra.mxu1 %v7114_v32  ;;  %v7123_v32 = vld [vmem:[#allocation2 + $0x160] ss:$16 sps:$4 sm:$0xff]  }
 0x276   :  { %3576 = vmatpush1.bf16.msra.mxu0 %v7115_v11  ;;  %3453 = vmatprep.subr.bf16.mxu1 %v7116_v24  ;;  %v7124_v11 = vld [vmem:[#allocation5 + $0x30c] ss:$16 sps:$4 sm:$0xff]   ;;  %v7127_v24 = vld [vmem:[#allocation2 + $0x180] ss:$16 sps:$4 sm:$0xff]  }
 0x277   :  { %3577 = vmatprep.subr.bf16.mxu0 %v7117_v33  ;;  %v7128_v33 = vld [vmem:[#allocation5 + $0x32c] ss:$16 sps:$4 sm:$0xff]  }
 0x279   :  { %3454 = vmatpush1.bf16.msra.mxu1 %v7118_v51  ;;  %v7129_v51 = vld [vmem:[#allocation2 + $0x1a4] ss:$16 sps:$4 sm:$0xff]  }
 0x27a   :  { %3578 = vmatpush1.bf16.msra.mxu0 %v7119_v47  ;;  %3455 = vmatprep.subr.bf16.mxu1 %v7120_v48  ;;  %v7130_v47 = vld [vmem:[#allocation5 + $0x328] ss:$16 sps:$4 sm:$0xff]   ;;  %v7131_v48 = vld [vmem:[#allocation2 + $0x1a0] ss:$16 sps:$4 sm:$0xff]  }
 0x27b   :  { %3579 = vmatprep.subr.bf16.mxu0 %v7121_v56  ;;  %v7132_v56 = vld [vmem:[#allocation5 + $0x34c] ss:$16 sps:$4 sm:$0xff]  }
 0x27d   :  { %3456 = vmatpush1.bf16.msra.mxu1 %v7122_v38  ;;  %v7133_v38 = vld [vmem:[#allocation2 + $0x1c4] ss:$16 sps:$4 sm:$0xff]  }
 0x27e   :  { %3580 = vmatpush1.bf16.msra.mxu0 %v7123_v32  ;;  %3457 = vmatprep.subr.bf16.mxu1 %v7124_v11  ;;  %v7134_v32 = vld [vmem:[#allocation5 + $0x348] ss:$16 sps:$4 sm:$0xff]   ;;  %v7135_v11 = vld [vmem:[#allocation2 + $0x1c0] ss:$16 sps:$4 sm:$0xff]  }
 0x27f   :  { %3581 = vmatprep.subr.bf16.mxu0 %v7125_v44  ;;  %v7136_v44 = vld [vmem:[#allocation5 + $0x36c] ss:$16 sps:$4 sm:$0xff]  }
 0x281   :  { %3458 = vmatpush1.bf16.msra.mxu1 %v7126_v29  ;;  %v7137_v29 = vld [vmem:[#allocation2 + $0x1e4] ss:$16 sps:$4 sm:$0xff]  }
 0x282   :  { %3582 = vmatpush1.bf16.msra.mxu0 %v7127_v24  ;;  %3459 = vmatprep.subr.bf16.mxu1 %v7128_v33  ;;  %v7900_v24 = vld [vmem:[%s8252_s4] ss:$24 sps:$4 sm:$0xff]  }
 0x283   :  { %3583 = vmatprep.subr.bf16.mxu0 %v7129_v51  ;;  %v7138_v33 = vld [vmem:[#allocation5 + $0x368] ss:$16 sps:$4 sm:$0xff]   ;;  %v7139_v51 = vld [vmem:[#allocation2 + $0x1e0] ss:$16 sps:$4 sm:$0xff]  }
 0x285   :  { %3460 = vmatpush1.bf16.msra.mxu1 %v7130_v47  ;;  %v7140_v47 = vld [vmem:[#allocation5 + $0x38c] ss:$16 sps:$4 sm:$0xff]  }
 0x286   :  { %3584 = vmatpush1.bf16.msra.mxu0 %v7131_v48  ;;  %3461 = vmatprep.subr.bf16.mxu1 %v7132_v56  ;;  %v7141_v48 = vld [vmem:[#allocation2 + $0x204] ss:$16 sps:$4 sm:$0xff]  }
 0x287   :  { %3585 = vmatprep.subr.bf16.mxu0 %v7133_v38  ;;  %v7905_v56 = vld [vmem:[%s8252_s4 + $0xc] ss:$24 sps:$4 sm:$0xff]   ;;  %v7142_v38 = vld [vmem:[#allocation5 + $0x388] ss:$16 sps:$4 sm:$0xff]  }
 0x289   :  { %3462 = vmatpush1.bf16.msra.mxu1 %v7134_v32  ;;  %v7143_v32 = vld [vmem:[#allocation2 + $0x200] ss:$16 sps:$4 sm:$0xff]  }
 0x28a   :  { %3586 = vmatpush1.bf16.msra.mxu0 %v7135_v11  ;;  %3463 = vmatprep.subr.bf16.mxu1 %v7136_v44  ;;  %v7144_v11 = vld [vmem:[#allocation5 + $0x3ac] ss:$16 sps:$4 sm:$0xff]   ;;  %v7145_v44 = vld [vmem:[#allocation2 + $0x224] ss:$16 sps:$4 sm:$0xff]  }
 0x28b   :  { %3587 = vmatprep.subr.bf16.mxu0 %v7137_v29  ;;  %v7146_v29 = vld [vmem:[#allocation5 + $0x3a8] ss:$16 sps:$4 sm:$0xff]  }
 0x28d   :  { %3464 = vmatpush1.bf16.msra.mxu1 %v7138_v33  ;;  %v7147_v33 = vld [vmem:[#allocation2 + $0x220] ss:$16 sps:$4 sm:$0xff]  }
 0x28e   :  { %3588 = vmatpush1.bf16.msra.mxu0 %v7139_v51  ;;  %3465 = vmatprep.subr.bf16.mxu1 %v7140_v47  ;;  %v7148_v51 = vld [vmem:[#allocation5 + $0x3cc] ss:$16 sps:$4 sm:$0xff]   ;;  %v7149_v47 = vld [vmem:[#allocation2 + $0x244] ss:$16 sps:$4 sm:$0xff]  }
 0x28f   :  { %3600 = vmatprep.subr.bf16.mxu0 %v7141_v48  ;;  %v7150_v48 = vld [vmem:[#allocation5 + $0x3c8] ss:$16 sps:$4 sm:$0xff]  }
 0x291   :  { %3590 = vmatmul.mubr.bf16.vlgmr.msra.gmra.mrb[4].mxu0 %v7900_v24  ;;  %3466 = vmatpush1.bf16.msra.mxu1 %v7142_v38  ;;  %v7152_v38 = vld [vmem:[#allocation5 + $0x3ec] ss:$16 sps:$4 sm:$0xff]  }
 0x292   :  { %3601 = vmatpush1.bf16.msra.mxu0 %v7143_v32  ;;  %3467 = vmatprep.subr.bf16.mxu1 %v7144_v11  ;;  %v7153_v32 = vld [vmem:[#allocation2 + $0x264] ss:$16 sps:$4 sm:$0xff]   ;;  %v7154_v11 = vld [vmem:[#allocation5 + $0x3e8] ss:$16 sps:$4 sm:$0xff]  }
 0x293   :  { %3602 = vmatprep.subr.bf16.mxu0 %v7145_v44  ;;  %3632 = vmatprep.mubr.bf16.mxu0 %v7905_v56  ;;  %v7155_v44 = vld [vmem:[#allocation2 + $0x260] ss:$16 sps:$4 sm:$0xff]  }
 0x295   :  { %3468 = vmatpush1.bf16.msra.mxu1 %v7146_v29  ;;  %v7157_v29 = vld [vmem:[#allocation2 + $0x284] ss:$16 sps:$4 sm:$0xff]  }
 0x296   :  { %3603 = vmatpush1.bf16.msra.mxu0 %v7147_v33  ;;  %3469 = vmatprep.subr.bf16.mxu1 %v7148_v51  ;;  %v7158_v33 = vld [vmem:[#allocation5 + $0x408] ss:$16 sps:$4 sm:$0xff]   ;;  %v7159_v51 = vld [vmem:[#allocation2 + $0x280] ss:$16 sps:$4 sm:$0xff]  }
 0x297   :  { %3604 = vmatprep.subr.bf16.mxu0 %v7149_v47  ;;  %v7160_v47 = vld [vmem:[#allocation5 + $0x42c] ss:$16 sps:$4 sm:$0xff]  }
 0x299   :  { %3470 = vmatpush1.bf16.msra.mxu1 %v7150_v48  ;;  %v7162_v48 = vld [vmem:[#allocation5 + $0x428] ss:$16 sps:$4 sm:$0xff]  }
 0x29a   :  { %3605 = vmatpush1.bf16.msra.mxu0 %v7151_v42  ;;  %3471 = vmatprep.subr.bf16.mxu1 %v7152_v38  ;;  %v7161_v42 = vld [vmem:[#allocation2 + $0x2a4] ss:$16 sps:$4 sm:$0xff]   ;;  %v7163_v38 = vld [vmem:[#allocation2 + $0x2a0] ss:$16 sps:$4 sm:$0xff]  }
 0x29b   :  { %3606 = vmatprep.subr.bf16.mxu0 %v7153_v32  ;;  %v7164_v32 = vld [vmem:[#allocation5 + $0x44c] ss:$16 sps:$4 sm:$0xff]  }
 0x29d   :  { %3472 = vmatpush1.bf16.msra.mxu1 %v7154_v11  ;;  %v7166_v11 = vld [vmem:[#allocation5 + $0x448] ss:$16 sps:$4 sm:$0xff]  }
 0x29e   :  { %3607 = vmatpush1.bf16.msra.mxu0 %v7155_v44  ;;  %3484 = vmatprep.subr.bf16.mxu1 %v7156_v17  ;;  %v7165_v17 = vld [vmem:[#allocation2 + $0x2c4] ss:$16 sps:$4 sm:$0xff]   ;;  %v7168_v44 = vld [vmem:[#allocation5 + $0x46c] ss:$16 sps:$4 sm:$0xff]  }
 0x29f   :  { %3608 = vmatprep.subr.bf16.mxu0 %v7157_v29  ;;  %v7169_v29 = vld [vmem:[#allocation2 + $0x2e4] ss:$16 sps:$4 sm:$0xff]  }
 0x2a0   :  { %3474 = vmatmul.mubr.bf16.vlgmr.msra.gmra.mrb[16].mxu1 %v7815_v6  ;;  %v7167_v6 = vld [vmem:[#allocation2 + $0x2c0] ss:$16 sps:$4 sm:$0xff]  }
 0x2a1   :  { %3485 = vmatpush1.bf16.msra.mxu1 %v7158_v33  ;;  %3516 = vmatprep.mubr.bf16.mxu1 %v7827_v15  ;;  %v7170_v33 = vld [vmem:[#allocation5 + $0x468] ss:$16 sps:$4 sm:$0xff]   ;;  %v7172_v15 = vld [vmem:[#allocation5 + $0x48c] ss:$16 sps:$4 sm:$0xff]  }
 0x2a2   :  { %3609 = vmatpush1.bf16.msra.mxu0 %v7159_v51  ;;  %3486 = vmatprep.subr.bf16.mxu1 %v7160_v47  ;;  %v7171_v51 = vld [vmem:[#allocation2 + $0x2e0] ss:$16 sps:$4 sm:$0xff]   ;;  %v7173_v47 = vld [vmem:[#allocation2 + $0x304] ss:$16 sps:$4 sm:$0xff]  }
 0x2a3   :  { %3610 = vmatprep.subr.bf16.mxu0 %v7161_v42  ;;  %v7174_v42 = vld [vmem:[#allocation5 + $0x488] ss:$16 sps:$4 sm:$0xff]  }
 0x2a5   :  { %3487 = vmatpush1.bf16.msra.mxu1 %v7162_v48  ;;  %v7175_v48 = vld [vmem:[#allocation2 + $0x300] ss:$16 sps:$4 sm:$0xff]  }
 0x2a6   :  { %3611 = vmatpush1.bf16.msra.mxu0 %v7163_v38  ;;  %3488 = vmatprep.subr.bf16.mxu1 %v7164_v32  ;;  %v7176_v38 = vld [vmem:[#allocation5 + $0x4ac] ss:$16 sps:$4 sm:$0xff]   ;;  %v7177_v32 = vld [vmem:[#allocation2 + $0x324] ss:$16 sps:$4 sm:$0xff]  }
 0x2a7   :  { %3612 = vmatprep.subr.bf16.mxu0 %v7165_v17  ;;  %v7178_v17 = vld [vmem:[#allocation5 + $0x4a8] ss:$16 sps:$4 sm:$0xff]  }
 0x2a9   :  { %3489 = vmatpush1.bf16.msra.mxu1 %v7166_v11  ;;  %v7179_v11 = vld [vmem:[#allocation2 + $0x320] ss:$16 sps:$4 sm:$0xff]  }
 0x2aa   :  { %3613 = vmatpush1.bf16.msra.mxu0 %v7167_v6  ;;  %3490 = vmatprep.subr.bf16.mxu1 %v7168_v44  ;;  %v7180_v6 = vld [vmem:[#allocation5 + $0x4cc] ss:$16 sps:$4 sm:$0xff]   ;;  %v7181_v44 = vld [vmem:[#allocation2 + $0x344] ss:$16 sps:$4 sm:$0xff]  }
 0x2ab   :  { %3614 = vmatprep.subr.bf16.mxu0 %v7169_v29  ;;  %v7182_v29 = vld [vmem:[#allocation5 + $0x4c8] ss:$16 sps:$4 sm:$0xff]  }
 0x2ad   :  { %3491 = vmatpush1.bf16.msra.mxu1 %v7170_v33  ;;  %v7183_v33 = vld [vmem:[#allocation2 + $0x340] ss:$16 sps:$4 sm:$0xff]  }
 0x2ae   :  { %3615 = vmatpush1.bf16.msra.mxu0 %v7171_v51  ;;  %3492 = vmatprep.subr.bf16.mxu1 %v7172_v15  ;;  %v7184_v51 = vld [vmem:[#allocation5 + $0x4ec] ss:$16 sps:$4 sm:$0xff]   ;;  %v7185_v15 = vld [vmem:[#allocation2 + $0x364] ss:$16 sps:$4 sm:$0xff]  }
 0x2af   :  { %3616 = vmatprep.subr.bf16.mxu0 %v7173_v47  ;;  %v7186_v47 = vld [vmem:[#allocation5 + $0x4e8] ss:$16 sps:$4 sm:$0xff]  }
 0x2b1   :  { %3493 = vmatpush1.bf16.msra.mxu1 %v7174_v42  ;;  %v7187_v42 = vld [vmem:[#allocation2 + $0x360] ss:$16 sps:$4 sm:$0xff]  }
 0x2b2   :  { %3617 = vmatpush1.bf16.msra.mxu0 %v7175_v48  ;;  %3494 = vmatprep.subr.bf16.mxu1 %v7176_v38  ;;  %v7188_v48 = vld [vmem:[#allocation5 + $0x50c] ss:$16 sps:$4 sm:$0xff]   ;;  %v7189_v38 = vld [vmem:[#allocation2 + $0x384] ss:$16 sps:$4 sm:$0xff]  }
 0x2b3   :  { %3618 = vmatprep.subr.bf16.mxu0 %v7177_v32  ;;  %v7190_v32 = vld [vmem:[#allocation5 + $0x508] ss:$16 sps:$4 sm:$0xff]  }
 0x2b5   :  { %3495 = vmatpush1.bf16.msra.mxu1 %v7178_v17  ;;  %v7191_v17 = vld [vmem:[#allocation2 + $0x380] ss:$16 sps:$4 sm:$0xff]  }
 0x2b6   :  { %3619 = vmatpush1.bf16.msra.mxu0 %v7179_v11  ;;  %3496 = vmatprep.subr.bf16.mxu1 %v7180_v6  ;;  %v7192_v11 = vld [vmem:[#allocation5 + $0x52c] ss:$16 sps:$4 sm:$0xff]   ;;  %v7193_v6 = vld [vmem:[#allocation2 + $0x3a4] ss:$16 sps:$4 sm:$0xff]  }
 0x2b7   :  { %3620 = vmatprep.subr.bf16.mxu0 %v7181_v44  ;;  %v7194_v44 = vld [vmem:[#allocation5 + $0x528] ss:$16 sps:$4 sm:$0xff]  }
 0x2b9   :  { %3497 = vmatpush1.bf16.msra.mxu1 %v7182_v29  ;;  %v7195_v29 = vld [vmem:[#allocation2 + $0x3a0] ss:$16 sps:$4 sm:$0xff]  }
 0x2ba   :  { %3621 = vmatpush1.bf16.msra.mxu0 %v7183_v33  ;;  %3498 = vmatprep.subr.bf16.mxu1 %v7184_v51  ;;  %v7196_v33 = vld [vmem:[#allocation5 + $0x54c] ss:$16 sps:$4 sm:$0xff]   ;;  %v7197_v51 = vld [vmem:[#allocation2 + $0x3c4] ss:$16 sps:$4 sm:$0xff]  }
 0x2bb   :  { %3622 = vmatprep.subr.bf16.mxu0 %v7185_v15  ;;  %v7198_v15 = vld [vmem:[#allocation5 + $0x548] ss:$16 sps:$4 sm:$0xff]  }
 0x2bd   :  { %3499 = vmatpush1.bf16.msra.mxu1 %v7186_v47  ;;  %v7199_v47 = vld [vmem:[#allocation2 + $0x3c0] ss:$16 sps:$4 sm:$0xff]  }
 0x2be   :  { %3623 = vmatpush1.bf16.msra.mxu0 %v7187_v42  ;;  %3500 = vmatprep.subr.bf16.mxu1 %v7188_v48  ;;  %v7200_v42 = vld [vmem:[#allocation5 + $0x56c] ss:$16 sps:$4 sm:$0xff]   ;;  %v7201_v48 = vld [vmem:[#allocation2 + $0x3e4] ss:$16 sps:$4 sm:$0xff]  }
 0x2bf   :  { %3624 = vmatprep.subr.bf16.mxu0 %v7189_v38  ;;  %v7914_v38 = vld [vmem:[%s8252_s4 + $0x8] ss:$24 sps:$4 sm:$0xff]  }
 0x2c1   :  { %3501 = vmatpush1.bf16.msra.mxu1 %v7190_v32  ;;  %v7202_v32 = vld [vmem:[#allocation5 + $0x568] ss:$16 sps:$4 sm:$0xff]  }
 0x2c2   :  { %3625 = vmatpush1.bf16.msra.mxu0 %v7191_v17  ;;  %3502 = vmatprep.subr.bf16.mxu1 %v7192_v11  ;;  %v7203_v17 = vld [vmem:[#allocation2 + $0x3e0] ss:$16 sps:$4 sm:$0xff]   ;;  %v7204_v11 = vld [vmem:[#allocation5 + $0x58c] ss:$16 sps:$4 sm:$0xff]  }
 0x2c3   :  { %3626 = vmatprep.subr.bf16.mxu0 %v7193_v6  ;;  %v7205_v6 = vld [vmem:[#allocation2 + $0x404] ss:$16 sps:$4 sm:$0xff]  }
 0x2c5   :  { %3503 = vmatpush1.bf16.msra.mxu1 %v7194_v44  ;;  %v7919_v44 = vld [vmem:[%s8252_s4 + $0x14] ss:$24 sps:$4 sm:$0xff]  }
 0x2c6   :  { %3627 = vmatpush1.bf16.msra.mxu0 %v7195_v29  ;;  %3504 = vmatprep.subr.bf16.mxu1 %v7196_v33  ;;  %v7206_v29 = vld [vmem:[#allocation5 + $0x588] ss:$16 sps:$4 sm:$0xff]   ;;  %v7207_v33 = vld [vmem:[#allocation2 + $0x400] ss:$16 sps:$4 sm:$0xff]  }
 0x2c7   :  { %3628 = vmatprep.subr.bf16.mxu0 %v7197_v51  ;;  %v7208_v51 = vld [vmem:[#allocation5 + $0x5ac] ss:$16 sps:$4 sm:$0xff]  }
 0x2c9   :  { %3505 = vmatpush1.bf16.msra.mxu1 %v7198_v15  ;;  %v7209_v15 = vld [vmem:[#allocation2 + $0x424] ss:$16 sps:$4 sm:$0xff]  }
 0x2ca   :  { %3629 = vmatpush1.bf16.msra.mxu0 %v7199_v47  ;;  %3506 = vmatprep.subr.bf16.mxu1 %v7200_v42  ;;  %v7210_v47 = vld [vmem:[#allocation5 + $0x5a8] ss:$16 sps:$4 sm:$0xff]   ;;  %v7211_v42 = vld [vmem:[#allocation2 + $0x420] ss:$16 sps:$4 sm:$0xff]  }
 0x2cb   :  { %3630 = vmatprep.subr.bf16.mxu0 %v7201_v48  ;;  %v7212_v48 = vld [vmem:[#allocation5 + $0x5cc] ss:$16 sps:$4 sm:$0xff]  }
 0x2cd   :  { %3507 = vmatpush1.bf16.msra.mxu1 %v7202_v32  ;;  %v7213_v32 = vld [vmem:[#allocation2 + $0x444] ss:$16 sps:$4 sm:$0xff]  }
 0x2ce   :  { %3631 = vmatpush1.bf16.msra.mxu0 %v7203_v17  ;;  %3508 = vmatprep.subr.bf16.mxu1 %v7204_v11  ;;  %v7214_v17 = vld [vmem:[#allocation5 + $0x5c8] ss:$16 sps:$4 sm:$0xff]   ;;  %v7215_v11 = vld [vmem:[#allocation2 + $0x440] ss:$16 sps:$4 sm:$0xff]  }
 0x2cf   :  { %3643 = vmatprep.subr.bf16.mxu0 %v7205_v6  ;;  %v7216_v6 = vld [vmem:[#allocation5 + $0x5ec] ss:$16 sps:$4 sm:$0xff]  }
 0x2d1   :  { %3633 = vmatmul.mubr.bf16.vlgmr.msra.gmra.mrb[4].mxu0 %v7914_v38  ;;  %3509 = vmatpush1.bf16.msra.mxu1 %v7206_v29  ;;  %v7217_v29 = vld [vmem:[#allocation2 + $0x464] ss:$16 sps:$4 sm:$0xff]  }
 0x2d2   :  { %3644 = vmatpush1.bf16.msra.mxu0 %v7207_v33  ;;  %3510 = vmatprep.subr.bf16.mxu1 %v7208_v51  ;;  %v7218_v33 = vld [vmem:[#allocation5 + $0x5e8] ss:$16 sps:$4 sm:$0xff]   ;;  %v7219_v51 = vld [vmem:[#allocation2 + $0x460] ss:$16 sps:$4 sm:$0xff]  }
 0x2d3   :  { %3645 = vmatprep.subr.bf16.mxu0 %v7209_v15  ;;  %3675 = vmatprep.mubr.bf16.mxu0 %v7919_v44  ;;  %v7220_v15 = vld [vmem:[#allocation2 + $0xc] ss:$16 sps:$4 sm:$0xff]  }
 0x2d5   :  { %3511 = vmatpush1.bf16.msra.mxu1 %v7210_v47  ;;  %v7221_v47 = vld [vmem:[#allocation2 + $0x484] ss:$16 sps:$4 sm:$0xff]  }
 0x2d6   :  { %3646 = vmatpush1.bf16.msra.mxu0 %v7211_v42  ;;  %3512 = vmatprep.subr.bf16.mxu1 %v7212_v48  ;;  %v7222_v42 = vld [vmem:[#allocation2 + $0x8] ss:$16 sps:$4 sm:$0xff]   ;;  %v7223_v48 = vld [vmem:[#allocation2 + $0x480] ss:$16 sps:$4 sm:$0xff]  }
 0x2d7   :  { %3647 = vmatprep.subr.bf16.mxu0 %v7213_v32  ;;  %v7224_v32 = vld [vmem:[#allocation2 + $0x2c] ss:$16 sps:$4 sm:$0xff]  }
 0x2d9   :  { %3513 = vmatpush1.bf16.msra.mxu1 %v7214_v17  ;;  %v7225_v17 = vld [vmem:[#allocation2 + $0x4a4] ss:$16 sps:$4 sm:$0xff]  }
 0x2da   :  { %3648 = vmatpush1.bf16.msra.mxu0 %v7215_v11  ;;  %3514 = vmatprep.subr.bf16.mxu1 %v7216_v6 }
 0x2db   :  { %3649 = vmatprep.subr.bf16.mxu0 %v7217_v29  ;;  %v7226_v29 = vld [vmem:[#allocation2 + $0x28] ss:$16 sps:$4 sm:$0xff]  }
 0x2dd   :  { %3515 = vmatpush1.bf16.msra.mxu1 %v7218_v33 }
 0x2de   :  { %3650 = vmatpush1.bf16.msra.mxu0 %v7219_v51  ;;  %3686 = vmatprep.subr.bf16.mxu1 %v7220_v15  ;;  %v7227_v51 = vld [vmem:[#allocation2 + $0x4a0] ss:$16 sps:$4 sm:$0xff]  }
 0x2df   :  { %3651 = vmatprep.subr.bf16.mxu0 %v7221_v47  ;;  %v7229_v47 = vld [vmem:[#allocation2 + $0x4c4] ss:$16 sps:$4 sm:$0xff]  }
 0x2e0   :  { %3517 = vmatmul.mubr.bf16.vlgmr.msra.gmra.mrb[16].mxu1 %v7863_v28  ;;  %v7228_v28 = vld [vmem:[#allocation2 + $0x4c] ss:$16 sps:$4 sm:$0xff]  }
 0x2e1   :  { %3687 = vmatpush1.bf16.msra.mxu1 %v7222_v42  ;;  %3718 = vmatprep.mubr.bf16.mxu1 %v7868_v8  ;;  %v8278_v42 = vsub.s32 0, %v7886_v19  ;;  %v8281_v8 = vsub.s32 1, %v7886_v19 }
 0x2e2   :  { %3652 = vmatpush1.bf16.msra.mxu0 %v7223_v48  ;;  %3688 = vmatprep.subr.bf16.mxu1 %v7224_v32  ;;  %v7230_v48 = vld [vmem:[#allocation2 + $0x48] ss:$16 sps:$4 sm:$0xff]   ;;  %v7231_v32 = vld [vmem:[#allocation2 + $0x4c0] ss:$16 sps:$4 sm:$0xff]  }
 0x2e3   :  { %3653 = vmatprep.subr.bf16.mxu0 %v7225_v17  ;;  %v3001_v11 = vpop.f32.mrb[4].mxu1  ;;  %v7232_v17 = vld [vmem:[#allocation2 + $0x6c] ss:$16 sps:$4 sm:$0xff]  }
 0x2e4   :  { %v3003_v6 = vpop.f32.mrb[5].mxu1 }
 0x2e5   :  { %3689 = vmatpush1.bf16.msra.mxu1 %v7226_v29  ;;  %v7925_v33 = vpop.f32.mrb[6].mxu1  ;;  %v7233_v29 = vld [vmem:[#allocation2 + $0x4e4] ss:$16 sps:$4 sm:$0xff]  }
 0x2e6   :  { %3654 = vmatpush1.bf16.msra.mxu0 %v7227_v51  ;;  %v7927_v15 = vpop.f32.mrb[7].mxu1  ;;  %3690 = vmatprep.subr.bf16.mxu1 %v7228_v28  ;;  %v7935_v28 = vrot.slane %v7892_v60, %v8278_v42 }
 0x2e7   :  { %3655 = vmatprep.subr.bf16.mxu0 %v7229_v47 }
 0x2e9   :  { %3691 = vmatpush1.bf16.msra.mxu1 %v7230_v48  ;;  %v7941_v48 = vrot.slane %v7892_v60, %v8281_v8  ;;  %v7238_v8 = vld [vmem:[#allocation2 + $0x88] ss:$16 sps:$4 sm:$0xff]  }
 0x2ea   :  { %3656 = vmatpush1.bf16.msra.mxu0 %v7231_v32  ;;  %3692 = vmatprep.subr.bf16.mxu1 %v7232_v17  ;;  %v7234_v32 = vld [vmem:[#allocation2 + $0x68] ss:$16 sps:$4 sm:$0xff]   ;;  %v7235_v17 = vld [vmem:[#allocation2 + $0x4e0] ss:$16 sps:$4 sm:$0xff]  }
 0x2eb   :  { %3657 = vmatprep.subr.bf16.mxu0 %v7233_v29  ;;  %v3089_v13 = vpop.f32.mrb[8].mxu1  ;;  %v7236_v29 = vld [vmem:[#allocation2 + $0x8c] ss:$16 sps:$4 sm:$0xff]  }
 0x2ec   :  { %v3177_v51 = vadd.f32 %v7875_v0, %v3089_v13  ;;  %v3091_v47 = vpop.f32.mrb[9].mxu1  ;;  %v7237_v13 = vld [vmem:[#allocation2 + $0x504] ss:$16 sps:$4 sm:$0xff]  }
 0x2ed   :  { %v3178_v2 = vadd.f32 %v7878_v21, %v3091_v47  ;;  %3693 = vmatpush1.bf16.msra.mxu1 %v7234_v32  ;;  %v3201_v32 = vsub.s32 3, %v7886_v19  ;;  %v7242_v19 = vld [vmem:[#allocation2 + $0xa8] ss:$16 sps:$4 sm:$0xff]  }
 0x2ee   :  { %3658 = vmatpush1.bf16.msra.mxu0 %v7235_v17  ;;  %3694 = vmatprep.subr.bf16.mxu1 %v7236_v29  ;;  %v3207_v42 = vadd.f32 %v7935_v28, %v3177_v51  ;;  %v7240_v29 = vld [vmem:[#allocation2 + $0xac] ss:$16 sps:$4 sm:$0xff]  }
 0x2ef   :  { %3659 = vmatprep.subr.bf16.mxu0 %v7237_v13  ;;  %v3095_v0 = vpop.f32.mrb[10].mxu1  ;;  %v3208_v21 = vadd.f32 %v7941_v48, %v3178_v2  ;;  %v7241_v13 = vld [vmem:[#allocation2 + $0x524] ss:$16 sps:$4 sm:$0xff]  }
 0x2f0   :  { %v3181_v62 = vadd.f32 %v7881_v25, %v3095_v0  ;;  %v3097_v58 = vpop.f32.mrb[11].mxu1  ;;  %v3215_v0 = vmax.f32 %v3207_v42, 0.0 }
 0x2f1   :  { %v3182_v47 = vadd.f32 %v7884_v41, %v3097_v58  ;;  %3695 = vmatpush1.bf16.msra.mxu1 %v7238_v8  ;;  %v3216_v58 = vmax.f32 %v3208_v21, 0.0  ;;  %v7246_v21 = vld [vmem:[#allocation2 + $0xc8] ss:$16 sps:$4 sm:$0xff]  }
 0x2f2   :  { %3660 = vmatpush1.bf16.msra.mxu0 %v7239_v54  ;;  %v3211_v17 = vadd.f32 %v7935_v28, %v3181_v62  ;;  %3696 = vmatprep.subr.bf16.mxu1 %v7240_v29  ;;  %v7951_v54 = vrot.slane %v7892_v60, %v3201_v32  ;;  %v7243_v62 = vld [vmem:[#allocation2 + $0x520] ss:$16 sps:$4 sm:$0xff]  }
 0x2f3   :  { %3661 = vmatprep.subr.bf16.mxu0 %v7241_v13  ;;  %v3212_v51 = vadd.f32 %v7941_v48, %v3182_v47  ;;  %v3166_v25 = vpop.f32.mrb[12].mxu1  ;;  %v7244_v13 = vld [vmem:[#allocation2 + $0xcc] ss:$16 sps:$4 sm:$0xff]   ;;  %v7245_v47 = vld [vmem:[#allocation2 + $0x544] ss:$16 sps:$4 sm:$0xff]  }
 0x2f4   :  { %v3219_v50 = vmax.f32 %v3211_v17, 0.0  ;;  %v3179_v2 = vadd.f32 %v3166_v25, %v3001_v11  ;;  %v3168_v20 = vpop.f32.mrb[13].mxu1  ;;  %v7249_v25 = vld [vmem:[#allocation2 + $0x564] ss:$16 sps:$4 sm:$0xff]  }
 0x2f5   :  { %v3220_v41 = vmax.f32 %v3212_v51, 0.0  ;;  %v3180_v8 = vadd.f32 %v3168_v20, %v3003_v6  ;;  %3697 = vmatpush1.bf16.msra.mxu1 %v7242_v19  ;;  %v7248_v51 = vld [vmem:[#allocation2 + $0xec] ss:$16 sps:$4 sm:$0xff]  }
 0x2f6   :  { %3662 = vmatpush1.bf16.msra.mxu0 %v7243_v62  ;;  %v7953_v29 = vpack.c.bf16 %v3219_v50, %v3215_v0  ;;  %3698 = vmatprep.subr.bf16.mxu1 %v7244_v13  ;;  %v3209_v11 = vadd.f32 %v7895_v45, %v3179_v2  ;;  %v7247_v50 = vld [vmem:[#allocation2 + $0x540] ss:$16 sps:$4 sm:$0xff]   ;;  %v7250_v62 = vld [vmem:[#allocation2 + $0xe8] ss:$16 sps:$4 sm:$0xff]   ;;  %v7252_v13 = vld [vmem:[#allocation2 + $0x10c] ss:$16 sps:$4 sm:$0xff]  }
 0x2f7   :  { %3663 = vmatprep.subr.bf16.mxu0 %v7245_v47  ;;  %v3172_v42 = vpop.f32.mrb[14].mxu1  ;;  %v7955_v17 = vpack.c.bf16 %v3220_v41, %v3216_v58  ;;  %v3210_v60 = vadd.f32 %v7951_v54, %v3180_v8  ;;  %v7251_v8 = vld [vmem:[#allocation2 + $0x560] ss:$16 sps:$4 sm:$0xff]   ;;  %v7253_v47 = vld [vmem:[#allocation2 + $0x584] ss:$16 sps:$4 sm:$0xff]  }
 0x2f8   :  { %v3183_v20 = vadd.f32 %v3172_v42, %v7925_v33  ;;  %v3174_v6 = vpop.f32.mrb[15].mxu1  ;;  %v3217_v2 = vmax.f32 %v3209_v11, 0.0  ;;  %v7256_v11 = vld [vmem:[#allocation2 + $0x12c] ss:$16 sps:$4 sm:$0xff]  }
 0x2f9   :  { %v3184_v19 = vadd.f32 %v3174_v6, %v7927_v15  ;;  %3699 = vmatpush1.bf16.msra.mxu1 %v7246_v21  ;;  %v3218_v33 = vmax.f32 %v3210_v60, 0.0  ;;  %v7255_v6 = vld [vmem:[#allocation2 + $0x580] ss:$16 sps:$4 sm:$0xff]   ;;  %v7257_v60 = vld [vmem:[#allocation2 + $0x5a4] ss:$16 sps:$4 sm:$0xff]  }
 0x2fa   :  { %3664 = vmatpush1.bf16.msra.mxu0 %v7247_v50  ;;  %v3213_v32 = vadd.f32 %v7895_v45, %v3183_v20  ;;  %3700 = vmatprep.subr.bf16.mxu1 %v7248_v51  ;;  %v7254_v20 = vld [vmem:[#allocation2 + $0x108] ss:$16 sps:$4 sm:$0xff]   ;;  %v7259_v21 = vld [vmem:[#allocation2 + $0x5a0] ss:$16 sps:$4 sm:$0xff]   ;;  %v7260_v50 = vld [vmem:[#allocation2 + $0x14c] ss:$16 sps:$4 sm:$0xff]  }
 0x2fb   :  { %3665 = vmatprep.subr.bf16.mxu0 %v7249_v25  ;;  %v3214_v0 = vadd.f32 %v7951_v54, %v3184_v19  ;;  %v7258_v19 = vld [vmem:[#allocation2 + $0x128] ss:$16 sps:$4 sm:$0xff]   ;;  %v7263_v25 = vld [vmem:[#allocation2 + $0x5c0] ss:$16 sps:$4 sm:$0xff]  }
 0x2fc   :  { %v3221_v58 = vmax.f32 %v3213_v32, 0.0  ;;  %v7261_v32 = vld [vmem:[#allocation2 + $0x5c4] ss:$16 sps:$4 sm:$0xff]   ;;  %v7262_v51 = vld [vmem:[#allocation2 + $0x148] ss:$16 sps:$4 sm:$0xff]  }
 0x2fd   :  { %v3222_v41 = vmax.f32 %v3214_v0, 0.0  ;;  %3701 = vmatpush1.bf16.msra.mxu1 %v7250_v62  ;;  %v7264_v0 = vld [vmem:[#allocation2 + $0x16c] ss:$16 sps:$4 sm:$0xff]  }
 0x2fe   :  { %3666 = vmatpush1.bf16.msra.mxu0 %v7251_v8  ;;  %v7963_v15 = vpack.c.bf16 %v3221_v58, %v3217_v2  ;;  %3702 = vmatprep.subr.bf16.mxu1 %v7252_v13  ;;  %v7265_v2 = vld [vmem:[#allocation2 + $0x5e4] ss:$16 sps:$4 sm:$0xff]   ;;  %v7970_v58 = vld [vmem:[%s8252_s4 + $0x10] ss:$24 sps:$4 sm:$0xff]   ;;  %v7268_v62 = vld [vmem:[#allocation2 + $0x18c] ss:$16 sps:$4 sm:$0xff]  }
 0x2ff   :  { %3667 = vmatprep.subr.bf16.mxu0 %v7253_v47  ;;  %v7965_v42 = vpack.c.bf16 %v3222_v41, %v3218_v33  ;;  %v7266_v33 = vld [vmem:[#allocation2 + $0x168] ss:$16 sps:$4 sm:$0xff]   ;;  %v7267_v41 = vld [vmem:[#allocation2 + $0x5e0] ss:$16 sps:$4 sm:$0xff]   ;;  %v7270_v13 = vld [vmem:[#allocation2 + $0x1ac] ss:$16 sps:$4 sm:$0xff]  }
 0x300   :  { %v7269_v8 = vld [vmem:[#allocation2 + $0x188] ss:$16 sps:$4 sm:$0xff]  }
 0x301   :  { %3703 = vmatpush1.bf16.msra.mxu1 %v7254_v20  ;;  %v7271_v47 = vld [vmem:[#allocation2 + $0x1a8] ss:$16 sps:$4 sm:$0xff]   ;;  %v7272_v20 = vld [vmem:[#allocation2 + $0x1cc] ss:$16 sps:$4 sm:$0xff]  }
 0x302   :  { %3668 = vmatpush1.bf16.msra.mxu0 %v7255_v6  ;;  %3704 = vmatprep.subr.bf16.mxu1 %v7256_v11  ;;  %v7273_v6 = vld [vmem:[#allocation2 + $0x1c8] ss:$16 sps:$4 sm:$0xff]   ;;  %v7274_v11 = vld [vmem:[#allocation2 + $0x1ec] ss:$16 sps:$4 sm:$0xff]  }
 0x303   :  { %3669 = vmatprep.subr.bf16.mxu0 %v7257_v60  ;;  %v7275_v60 = vld [vmem:[#allocation2 + $0x1e8] ss:$16 sps:$4 sm:$0xff]  }
 0x305   :  { %3705 = vmatpush1.bf16.msra.mxu1 %v7258_v19  ;;  %v7276_v19 = vld [vmem:[#allocation2 + $0x20c] ss:$16 sps:$4 sm:$0xff]  }
 0x306   :  { %3670 = vmatpush1.bf16.msra.mxu0 %v7259_v21  ;;  %3706 = vmatprep.subr.bf16.mxu1 %v7260_v50  ;;  %v7277_v21 = vld [vmem:[#allocation2 + $0x208] ss:$16 sps:$4 sm:$0xff]   ;;  %v7278_v50 = vld [vmem:[#allocation2 + $0x22c] ss:$16 sps:$4 sm:$0xff]  }
 0x307   :  { %3671 = vmatprep.subr.bf16.mxu0 %v7261_v32  ;;  %v7279_v32 = vld [vmem:[#allocation2 + $0x228] ss:$16 sps:$4 sm:$0xff]  }
 0x309   :  { %3707 = vmatpush1.bf16.msra.mxu1 %v7262_v51  ;;  %v7280_v51 = vld [vmem:[#allocation2 + $0x24c] ss:$16 sps:$4 sm:$0xff]  }
 0x30a   :  { %3672 = vmatpush1.bf16.msra.mxu0 %v7263_v25  ;;  %3708 = vmatprep.subr.bf16.mxu1 %v7264_v0  ;;  %v7281_v25 = vld [vmem:[#allocation2 + $0x248] ss:$16 sps:$4 sm:$0xff]   ;;  %v7282_v0 = vld [vmem:[#allocation2 + $0x26c] ss:$16 sps:$4 sm:$0xff]  }
 0x30b   :  { %3673 = vmatprep.subr.bf16.mxu0 %v7265_v2  ;;  %v7283_v2 = vld [vmem:[#allocation2 + $0x268] ss:$16 sps:$4 sm:$0xff]  }
 0x30d   :  { %3709 = vmatpush1.bf16.msra.mxu1 %v7266_v33  ;;  %v7284_v33 = vld [vmem:[#allocation2 + $0x28c] ss:$16 sps:$4 sm:$0xff]  }
 0x30e   :  { %3674 = vmatpush1.bf16.msra.mxu0 %v7267_v41  ;;  %3710 = vmatprep.subr.bf16.mxu1 %v7268_v62  ;;  %v7285_v41 = vld [vmem:[#allocation2 + $0x288] ss:$16 sps:$4 sm:$0xff]  }
 0x30f   :  { %v7287_v62 = vld [vmem:[#allocation2 + $0x2a8] ss:$16 sps:$4 sm:$0xff]  }
 0x311   :  { %3676 = vmatmul.mubr.bf16.vlgmr.msra.gmra.mrb[4].mxu0 %v7970_v58  ;;  %3711 = vmatpush1.bf16.msra.mxu1 %v7269_v8  ;;  %v7289_v8 = vld [vmem:[#allocation2 + $0x2c8] ss:$16 sps:$4 sm:$0xff]  }
 0x312   :  { %3712 = vmatprep.subr.bf16.mxu1 %v7270_v13  ;;  %v7290_v13 = vld [vmem:[#allocation2 + $0x2ec] ss:$16 sps:$4 sm:$0xff]  }
 0x315   :  { %3713 = vmatpush1.bf16.msra.mxu1 %v7271_v47  ;;  %v7291_v47 = vld [vmem:[#allocation2 + $0x2e8] ss:$16 sps:$4 sm:$0xff]  }
 0x316   :  { %3714 = vmatprep.subr.bf16.mxu1 %v7272_v20  ;;  %v7292_v20 = vld [vmem:[#allocation2 + $0x30c] ss:$16 sps:$4 sm:$0xff]  }
 0x319   :  { %3715 = vmatpush1.bf16.msra.mxu1 %v7273_v6  ;;  %v7293_v6 = vld [vmem:[#allocation2 + $0x308] ss:$16 sps:$4 sm:$0xff]  }
 0x31a   :  { %3716 = vmatprep.subr.bf16.mxu1 %v7274_v11  ;;  %v7294_v11 = vld [vmem:[#allocation2 + $0x32c] ss:$16 sps:$4 sm:$0xff]  }
 0x31d   :  { %3717 = vmatpush1.bf16.msra.mxu1 %v7275_v60  ;;  %v7295_v60 = vld [vmem:[#allocation2 + $0x328] ss:$16 sps:$4 sm:$0xff]  }
 0x31e   :  { %3729 = vmatprep.subr.bf16.mxu1 %v7276_v19  ;;  %v7296_v19 = vld [vmem:[#allocation2 + $0x34c] ss:$16 sps:$4 sm:$0xff]  }
 0x320   :  { %3719 = vmatmul.mubr.bf16.vlgmr.msra.gmra.mrb[16].mxu1 %v7900_v24  ;;  %v7286_v24 = vld [vmem:[#allocation2 + $0x2ac] ss:$16 sps:$4 sm:$0xff]  }
 0x321   :  { %3730 = vmatpush1.bf16.msra.mxu1 %v7277_v21  ;;  %3761 = vmatprep.mubr.bf16.mxu1 %v7905_v56  ;;  %v7288_v56 = vld [vmem:[#allocation2 + $0x2cc] ss:$16 sps:$4 sm:$0xff]   ;;  %v7297_v21 = vld [vmem:[#allocation2 + $0x348] ss:$16 sps:$4 sm:$0xff]  }
 0x322   :  { %3731 = vmatprep.subr.bf16.mxu1 %v7278_v50  ;;  %v7298_v50 = vld [vmem:[#allocation2 + $0x36c] ss:$16 sps:$4 sm:$0xff]  }
 0x325   :  { %3732 = vmatpush1.bf16.msra.mxu1 %v7279_v32  ;;  %v7299_v32 = vld [vmem:[#allocation2 + $0x368] ss:$16 sps:$4 sm:$0xff]  }
 0x326   :  { %3733 = vmatprep.subr.bf16.mxu1 %v7280_v51  ;;  %v7300_v51 = vld [vmem:[#allocation2 + $0x38c] ss:$16 sps:$4 sm:$0xff]  }
 0x329   :  { %3734 = vmatpush1.bf16.msra.mxu1 %v7281_v25  ;;  %v7301_v25 = vld [vmem:[#allocation2 + $0x388] ss:$16 sps:$4 sm:$0xff]  }
 0x32a   :  { %3735 = vmatprep.subr.bf16.mxu1 %v7282_v0 }
 0x32d   :  { %3736 = vmatpush1.bf16.msra.mxu1 %v7283_v2 }
 0x32e   :  { %3737 = vmatprep.subr.bf16.mxu1 %v7284_v33  ;;  %v6797_v33 = vld [vmem:[#allocation8 + $0xb4] ss:$8 sps:$4 sm:$0xff]  }
 0x331   :  { %3738 = vmatpush1.bf16.msra.mxu1 %v7285_v41  ;;  %v6795_v41 = vld [vmem:[#allocation8 + $0xb0] ss:$8 sps:$4 sm:$0xff]  }
 0x332   :  { %3739 = vmatprep.subr.bf16.mxu1 %v7286_v24  ;;  %v6798_v24 = vld [vmem:[#allocation8 + $0xc0] ss:$8 sps:$4 sm:$0xff]  }
 0x335   :  { %3740 = vmatpush1.bf16.msra.mxu1 %v7287_v62  ;;  %v6800_v62 = vld [vmem:[#allocation8 + $0xc4] ss:$8 sps:$4 sm:$0xff]  }
 0x336   :  { %3741 = vmatprep.subr.bf16.mxu1 %v7288_v56  ;;  %v6803_v56 = vld [vmem:[#allocation8 + $0xd4] ss:$8 sps:$4 sm:$0xff]  }
 0x339   :  { %3742 = vmatpush1.bf16.msra.mxu1 %v7289_v8  ;;  %v6801_v8 = vld [vmem:[#allocation8 + $0xd0] ss:$8 sps:$4 sm:$0xff]  }
 0x33a   :  { %3743 = vmatprep.subr.bf16.mxu1 %v7290_v13  ;;  %v6806_v13 = vld [vmem:[#allocation8 + $0xe4] ss:$8 sps:$4 sm:$0xff]  }
 0x33d   :  { %3744 = vmatpush1.bf16.msra.mxu1 %v7291_v47  ;;  %v6804_v47 = vld [vmem:[#allocation8 + $0xe0] ss:$8 sps:$4 sm:$0xff]  }
 0x33e   :  { %3745 = vmatprep.subr.bf16.mxu1 %v7292_v20  ;;  %v6809_v20 = vld [vmem:[#allocation8 + $0xf4] ss:$8 sps:$4 sm:$0xff]  }
 0x341   :  { %3746 = vmatpush1.bf16.msra.mxu1 %v7293_v6  ;;  %v6807_v6 = vld [vmem:[#allocation8 + $0xf0] ss:$8 sps:$4 sm:$0xff]  }
 0x342   :  { %3747 = vmatprep.subr.bf16.mxu1 %v7294_v11  ;;  %v6812_v11 = vld [vmem:[#allocation8 + $0x104] ss:$8 sps:$4 sm:$0xff]  }
 0x345   :  { %3748 = vmatpush1.bf16.msra.mxu1 %v7295_v60 }
 0x346   :  { %3749 = vmatprep.subr.bf16.mxu1 %v7296_v19 }
 0x349   :  { %3750 = vmatpush1.bf16.msra.mxu1 %v7297_v21 }
 0x34a   :  { %3751 = vmatprep.subr.bf16.mxu1 %v7298_v50 }
 0x34d   :  { %3752 = vmatpush1.bf16.msra.mxu1 %v7299_v32 }
 0x34e   :  { %3753 = vmatprep.subr.bf16.mxu1 %v7300_v51 }
 0x351   :  { %3754 = vmatpush1.bf16.msra.mxu1 %v7301_v25 }
 0x352   :  { %3755 = vmatprep.subr.bf16.mxu1 %v7680_v4  ;;  %v6762_v4 = vld [vmem:[#allocation8] ss:$8 sps:$4 sm:$0xff]  }
 0x355   :  { %3756 = vmatpush1.bf16.msra.mxu1 %v7682_v23  ;;  %v6764_v23 = vld [vmem:[#allocation8 + $0x4] ss:$8 sps:$4 sm:$0xff]  }
 0x356   :  { %3757 = vmatprep.subr.bf16.mxu1 %v7685_v26  ;;  %v6767_v26 = vld [vmem:[#allocation8 + $0x14] ss:$8 sps:$4 sm:$0xff]   ;;  %4453 = vmatprep.subr.bf16.mxu0 %v6764_v23 }
 0x357   :  { %4454 = vmatpush1.bf16.msra.mxu0 %v6762_v4 }
 0x358   :  { %4455 = vmatprep.subr.bf16.mxu0 %v6767_v26 }
 0x359   :  { %3758 = vmatpush1.bf16.msra.mxu1 %v7688_v27  ;;  %v6765_v27 = vld [vmem:[#allocation8 + $0x10] ss:$8 sps:$4 sm:$0xff]  }
 0x35a   :  { %3759 = vmatprep.subr.bf16.mxu1 %v7691_v30  ;;  %v6770_v30 = vld [vmem:[#allocation8 + $0x24] ss:$8 sps:$4 sm:$0xff]  }
 0x35b   :  { %4456 = vmatpush1.bf16.msra.mxu0 %v6765_v27 }
 0x35c   :  { %4457 = vmatprep.subr.bf16.mxu0 %v6770_v30 }
 0x35d   :  { %3760 = vmatpush1.bf16.msra.mxu1 %v7694_v31  ;;  %v6768_v31 = vld [vmem:[#allocation8 + $0x20] ss:$8 sps:$4 sm:$0xff]  }
 0x35e   :  { %3772 = vmatprep.subr.bf16.mxu1 %v7697_v34  ;;  %v6773_v34 = vld [vmem:[#allocation8 + $0x34] ss:$8 sps:$4 sm:$0xff]  }
 0x35f   :  { %4458 = vmatpush1.bf16.msra.mxu0 %v6768_v31 }
 0x360   :  { %3762 = vmatmul.mubr.bf16.vlgmr.msra.gmra.mrb[16].mxu1 %v7914_v38  ;;  %4459 = vmatprep.subr.bf16.mxu0 %v6773_v34  ;;  %v8314_v38 = vld [vmem:[#allocation23_spill] sm:$0xff] }
 0x361   :  { %3773 = vmatpush1.bf16.msra.mxu1 %v7705_v36  ;;  %3804 = vmatprep.mubr.bf16.mxu1 %v7919_v44  ;;  %v6771_v36 = vld [vmem:[#allocation8 + $0x30] ss:$8 sps:$4 sm:$0xff]  }
 0x362   :  { %3774 = vmatprep.subr.bf16.mxu1 %v7708_v37  ;;  %v6776_v37 = vld [vmem:[#allocation8 + $0x44] ss:$8 sps:$4 sm:$0xff]  }
 0x363   :  { %4460 = vmatpush1.bf16.msra.mxu0 %v6771_v36 }
 0x364   :  { %4461 = vmatprep.subr.bf16.mxu0 %v6776_v37 }
 0x365   :  { %3775 = vmatpush1.bf16.msra.mxu1 %v7718_v40  ;;  %v6774_v40 = vld [vmem:[#allocation8 + $0x40] ss:$8 sps:$4 sm:$0xff]  }
 0x366   :  { %3776 = vmatprep.subr.bf16.mxu1 %v7721_v43  ;;  %v6779_v43 = vld [vmem:[#allocation8 + $0x54] ss:$8 sps:$4 sm:$0xff]  }
 0x367   :  { %4462 = vmatpush1.bf16.msra.mxu0 %v6774_v40 }
 0x368   :  { %4463 = vmatprep.subr.bf16.mxu0 %v6779_v43 }
 0x369   :  { %3777 = vmatpush1.bf16.msra.mxu1 %v7726_v46  ;;  %v6777_v46 = vld [vmem:[#allocation8 + $0x50] ss:$8 sps:$4 sm:$0xff]  }
 0x36a   :  { %3778 = vmatprep.subr.bf16.mxu1 %v7729_v49  ;;  %v6782_v49 = vld [vmem:[#allocation8 + $0x64] ss:$8 sps:$4 sm:$0xff]  }
 0x36b   :  { %4464 = vmatpush1.bf16.msra.mxu0 %v6777_v46 }
 0x36c   :  { %4465 = vmatprep.subr.bf16.mxu0 %v6782_v49 }
 0x36d   :  { %3779 = vmatpush1.bf16.msra.mxu1 %v7732_v52  ;;  %v6780_v52 = vld [vmem:[#allocation8 + $0x60] ss:$8 sps:$4 sm:$0xff]  }
 0x36e   :  { %3780 = vmatprep.subr.bf16.mxu1 %v7735_v53  ;;  %v6785_v53 = vld [vmem:[#allocation8 + $0x74] ss:$8 sps:$4 sm:$0xff]  }
 0x36f   :  { %4466 = vmatpush1.bf16.msra.mxu0 %v6780_v52 }
 0x370   :  { %4467 = vmatprep.subr.bf16.mxu0 %v6785_v53 }
 0x371   :  { %3781 = vmatpush1.bf16.msra.mxu1 %v7738_v55  ;;  %v6783_v55 = vld [vmem:[#allocation8 + $0x70] ss:$8 sps:$4 sm:$0xff]  }
 0x372   :  { %3782 = vmatprep.subr.bf16.mxu1 %v7741_v57  ;;  %v6788_v57 = vld [vmem:[#allocation8 + $0x84] ss:$8 sps:$4 sm:$0xff]  }
 0x373   :  { %4468 = vmatpush1.bf16.msra.mxu0 %v6783_v55 }
 0x374   :  { %4469 = vmatprep.subr.bf16.mxu0 %v6788_v57 }
 0x375   :  { %3783 = vmatpush1.bf16.msra.mxu1 %v7744_v59  ;;  %v6786_v59 = vld [vmem:[#allocation8 + $0x80] ss:$8 sps:$4 sm:$0xff]  }
 0x376   :  { %3784 = vmatprep.subr.bf16.mxu1 %v7747_v61  ;;  %v6791_v61 = vld [vmem:[#allocation8 + $0x94] ss:$8 sps:$4 sm:$0xff]  }
 0x377   :  { %4470 = vmatpush1.bf16.msra.mxu0 %v6786_v59 }
 0x378   :  { %4471 = vmatprep.subr.bf16.mxu0 %v6791_v61 }
 0x379   :  { %3785 = vmatpush1.bf16.msra.mxu1 %v7750_v63  ;;  %v6789_v63 = vld [vmem:[#allocation8 + $0x90] ss:$8 sps:$4 sm:$0xff]  }
 0x37a   :  { %3786 = vmatprep.subr.bf16.mxu1 %v7753_v1  ;;  %v6794_v1 = vld [vmem:[#allocation8 + $0xa4] ss:$8 sps:$4 sm:$0xff]  }
 0x37b   :  { %4472 = vmatpush1.bf16.msra.mxu0 %v6789_v63 }
 0x37c   :  { %4473 = vmatprep.subr.bf16.mxu0 %v6794_v1  ;;  %v6810_v1 = vld [vmem:[#allocation8 + $0x100] ss:$8 sps:$4 sm:$0xff]  }
 0x37d   :  { %3787 = vmatpush1.bf16.msra.mxu1 %v7756_v3  ;;  %v6792_v3 = vld [vmem:[#allocation8 + $0xa0] ss:$8 sps:$4 sm:$0xff]  }
 0x37e   :  { %3788 = vmatprep.subr.bf16.mxu1 %v7759_v7  ;;  %v8304_v7 = vld [vmem:[#allocation15_spill] sm:$0xff] }
 0x37f   :  { %4474 = vmatpush1.bf16.msra.mxu0 %v6792_v3 }
 0x380   :  { %4475 = vmatprep.subr.bf16.mxu0 %v6797_v33  ;;  %v6827_v33 = vld [vmem:[#allocation8 + $0x154] ss:$8 sps:$4 sm:$0xff]  }
 0x381   :  { %3789 = vmatpush1.bf16.msra.mxu1 %v7762_v9  ;;  %v8305_v9 = vld [vmem:[#allocation16_spill] sm:$0xff] }
 0x382   :  { %3790 = vmatprep.subr.bf16.mxu1 %v7765_v12  ;;  %v8306_v12 = vld [vmem:[#allocation17_spill] sm:$0xff] }
 0x383   :  { %4476 = vmatpush1.bf16.msra.mxu0 %v6795_v41  ;;  %v6825_v41 = vld [vmem:[#allocation8 + $0x150] ss:$8 sps:$4 sm:$0xff]  }
 0x384   :  { %4477 = vmatprep.subr.bf16.mxu0 %v6800_v62  ;;  %v6828_v62 = vld [vmem:[#allocation8 + $0x160] ss:$8 sps:$4 sm:$0xff]  }
 0x385   :  { %3791 = vmatpush1.bf16.msra.mxu1 %v7768_v14  ;;  %v8307_v14 = vld [vmem:[#allocation18_spill] sm:$0xff] }
 0x386   :  { %3792 = vmatprep.subr.bf16.mxu1 %v7771_v16  ;;  %v8308_v16 = vld [vmem:[#allocation19_spill] sm:$0xff] }
 0x387   :  { %4478 = vmatpush1.bf16.msra.mxu0 %v6798_v24  ;;  %v6830_v24 = vld [vmem:[#allocation8 + $0x164] ss:$8 sps:$4 sm:$0xff]  }
 0x388   :  { %4479 = vmatprep.subr.bf16.mxu0 %v6803_v56  ;;  %v6833_v56 = vld [vmem:[#allocation8 + $0x174] ss:$8 sps:$4 sm:$0xff]  }
 0x389   :  { %3793 = vmatpush1.bf16.msra.mxu1 %v7774_v18  ;;  %v8309_v18 = vld [vmem:[#allocation20_spill] sm:$0xff] }
 0x38a   :  { %3794 = vmatprep.subr.bf16.mxu1 %v7777_v22  ;;  %v8310_v22 = vld [vmem:[#allocation21_spill] sm:$0xff] }
 0x38b   :  { %4480 = vmatpush1.bf16.msra.mxu0 %v6801_v8  ;;  %v6831_v8 = vld [vmem:[#allocation8 + $0x170] ss:$8 sps:$4 sm:$0xff]  }
 0x38c   :  { %4481 = vmatprep.subr.bf16.mxu0 %v6806_v13  ;;  %v6836_v13 = vld [vmem:[#allocation8 + $0x184] ss:$8 sps:$4 sm:$0xff]  }
 0x38d   :  { %3795 = vmatpush1.bf16.msra.mxu1 %v7780_v5  ;;  %v8311_v5 = vmov 0.0  }
 0x38e   :  { %3796 = vmatprep.subr.bf16.mxu1 %v7783_v10  ;;  %v8312_v10 = vld [vmem:[#allocation22_spill] sm:$0xff] }
 0x38f   :  { %4482 = vmatpush1.bf16.msra.mxu0 %v6804_v47  ;;  %v6834_v47 = vld [vmem:[#allocation8 + $0x180] ss:$8 sps:$4 sm:$0xff]  }
 0x390   :  { %4483 = vmatprep.subr.bf16.mxu0 %v6809_v20  ;;  %v6839_v20 = vld [vmem:[#allocation8 + $0x194] ss:$8 sps:$4 sm:$0xff]  }
 0x391   :  { %3797 = vmatpush1.bf16.msra.mxu1 %v7786_v35  ;;  %v3815_v35 = vld [vmem:[%s8313_s29] sm:$0xff] }
 0x392   :  { %3798 = vmatprep.subr.bf16.mxu1 %v7789_v39  ;;  %v3816_v39 = vld [vmem:[%s8313_s29 + $0x8] sm:$0xff] }
 0x393   :  { %4484 = vmatpush1.bf16.msra.mxu0 %v6807_v6  ;;  %v6837_v6 = vld [vmem:[#allocation8 + $0x190] ss:$8 sps:$4 sm:$0xff]  }
 0x394   :  { %4496 = vmatprep.subr.bf16.mxu0 %v6812_v11  ;;  %v6842_v11 = vld [vmem:[#allocation8 + $0x1a4] ss:$8 sps:$4 sm:$0xff]  }
 0x395   :  { %3799 = vmatpush1.bf16.msra.mxu1 %v8304_v7 }
 0x396   :  { %3800 = vmatprep.subr.bf16.mxu1 %v8305_v9 }
 0x399   :  { %3801 = vmatpush1.bf16.msra.mxu1 %v8306_v12  ;;  %v6815_v12 = vld [vmem:[#allocation8 + $0x114] ss:$8 sps:$4 sm:$0xff]  }
 0x39a   :  { %3802 = vmatprep.subr.bf16.mxu1 %v8307_v14 }
 0x39d   :  { %3803 = vmatpush1.bf16.msra.mxu1 %v8308_v16 }
 0x39e   :  { %3823 = vmatprep.subr.mxu1 %v8309_v18  ;;  %v6813_v18 = vld [vmem:[#allocation8 + $0x110] ss:$8 sps:$4 sm:$0xff]  }
 0x3a0   :  { %3805 = vmatmul.mubr.bf16.vlgmr.msra.gmra.mrb[16].mxu1 %v7970_v58 }
 0x3a1   :  { %3824 = vmatpush1.msra.mxu1 %v8310_v22  ;;  %3887 = vmatprep.mubr.f32.mxu1 %v8311_v5 }
 0x3a2   :  { %3900 = vmatprep.subr.mxu1 %v8312_v10  ;;  %v6818_v10 = vld [vmem:[#allocation8 + $0x124] ss:$8 sps:$4 sm:$0xff]  }
 0x3a8   :  { %5711 = vmatmul.mubr.msk.f32.vlgmr.msra.gmra.mrb[20].mxu1 %vm3016_vm0, %v3815_v35 }
 0x3a9   :  { %3893 = vmatprep.mubr.f32.mxu1 %v8311_v5  ;;  %3901 = vmatpush1.msra.mxu1 %v8314_v38 }
 0x3ac   :  { %5712 = vmatmul.mubr.msk.f32.gmra.mrb[22].mxu1 %vm3016_vm0, %v3816_v39 }
 0x3ad   :  { %3964 = vmatprep.mubr.f32.mxu1 %v8311_v5 }
 0x3b0   :  { %5713 = vmatmul.mubr.msk.f32.vlgmr.msra.gmra.mrb[24].mxu1 %vm3016_vm0, %v3815_v35 }
 0x3b1   :  { %3970 = vmatprep.mubr.f32.mxu1 %v8311_v5 }
 0x3b4   :  { %5714 = vmatmul.mubr.msk.f32.gmra.mrb[26].mxu1 %vm3016_vm0, %v3816_v39 }
 0x3e4   :  { %v3677_v44 = vpop.f32.mrb[4].mxu0 }
 0x3e5   :  { %v3679_v58 = vpop.f32.mrb[5].mxu0 }
 0x3e6   :  { %v3681_v0 = vpop.f32.mrb[6].mxu0 }
 0x3e7   :  { %v3683_v2 = vpop.f32.mrb[7].mxu0 }
 0x473   :  { %v3806_v60 = vpop.f32.mrb[16].mxu1 }
 0x474   :  { %v3808_v19 = vpop.f32.mrb[17].mxu1 }
 0x475   :  { %v3810_v21 = vpop.f32.mrb[18].mxu1 }
 0x476   :  { %v3812_v50 = vpop.f32.mrb[19].mxu1 }
 0x47b   :  { %v3889_v32 = vpop.f32.mrb[20].mxu1 }
 0x47c   :  { %v3977_v51 = vadd.f32 %v3889_v32, %v3677_v44  ;;  %v3891_v25 = vpop.f32.mrb[21].mxu1  ;;  %v6816_v44 = vld [vmem:[#allocation8 + $0x120] ss:$8 sps:$4 sm:$0xff]  }
 0x47d   :  { %v3978_v4 = vadd.f32 %v3891_v25, %v3679_v58  ;;  %v6846_v32 = vld [vmem:[#allocation8 + $0x1c0] ss:$8 sps:$4 sm:$0xff]   ;;  %v6849_v25 = vld [vmem:[#allocation8 + $0x1d0] ss:$8 sps:$4 sm:$0xff]  }
 0x47e   :  { %v3985_v26 = vadd.f32 %v3977_v51, %v7935_v28  ;;  %v6851_v51 = vld [vmem:[#allocation8 + $0x1d4] ss:$8 sps:$4 sm:$0xff]  }
 0x47f   :  { %v3895_v23 = vpop.f32.mrb[22].mxu1  ;;  %v3986_v31 = vadd.f32 %v3978_v4, %v7941_v48  ;;  %v6854_v4 = vld [vmem:[#allocation8 + $0x1e4] ss:$8 sps:$4 sm:$0xff]  }
 0x480   :  { %v3981_v27 = vadd.f32 %v3895_v23, %v3681_v0  ;;  %v3897_v30 = vpop.f32.mrb[23].mxu1  ;;  %v3993_v43 = vmax.f32 %v3985_v26, 0.0  ;;  %v6821_v0 = vld [vmem:[#allocation8 + $0x134] ss:$8 sps:$4 sm:$0xff]   ;;  %v6852_v23 = vld [vmem:[#allocation8 + $0x1e0] ss:$8 sps:$4 sm:$0xff]  }
 0x481   :  { %v3982_v34 = vadd.f32 %v3897_v30, %v3683_v2  ;;  %v3994_v53 = vmax.f32 %v3986_v31, 0.0  ;;  %v6822_v2 = vld [vmem:[#allocation8 + $0x140] ss:$8 sps:$4 sm:$0xff]   ;;  %v6857_v26 = vld [vmem:[#allocation8 + $0x1f4] ss:$8 sps:$4 sm:$0xff]  }
 0x482   :  { %v3989_v36 = vadd.f32 %v3981_v27, %v7935_v28  ;;  %v6855_v27 = vld [vmem:[#allocation8 + $0x1f0] ss:$8 sps:$4 sm:$0xff]   ;;  %v6860_v30 = vld [vmem:[#allocation7 + $0x4] ss:$8 sps:$4 sm:$0xff]   ;;  %v6858_v31 = vld [vmem:[#allocation7] ss:$8 sps:$4 sm:$0xff]  }
 0x483   :  { %v3990_v37 = vadd.f32 %v3982_v34, %v7941_v48  ;;  %v3966_v40 = vpop.f32.mrb[24].mxu1  ;;  %v6863_v34 = vld [vmem:[#allocation7 + $0x14] ss:$8 sps:$4 sm:$0xff]  }
 0x484   :  { %v3997_v46 = vmax.f32 %v3989_v36, 0.0  ;;  %v3979_v49 = vadd.f32 %v3966_v40, %v3806_v60  ;;  %v3968_v52 = vpop.f32.mrb[25].mxu1  ;;  %v6840_v60 = vld [vmem:[#allocation8 + $0x1a0] ss:$8 sps:$4 sm:$0xff]   ;;  %v6861_v36 = vld [vmem:[#allocation7 + $0x10] ss:$8 sps:$4 sm:$0xff]  }
 0x485   :  { %v3998_v55 = vmax.f32 %v3990_v37, 0.0  ;;  %v3980_v57 = vadd.f32 %v3968_v52, %v3808_v19  ;;  %v6845_v19 = vld [vmem:[#allocation8 + $0x1b4] ss:$8 sps:$4 sm:$0xff]   ;;  %v6866_v37 = vld [vmem:[#allocation7 + $0x24] ss:$8 sps:$4 sm:$0xff]  }
 0x486   :  { %v4001_v59 = vpack.c.bf16 %v3997_v46, %v3993_v43  ;;  %v3987_v3 = vadd.f32 %v3979_v49, %v7895_v45  ;;  %v4981_v40 = vld [vmem:[%s8261_s13 + $0x80] sm:$0xff]  ;;  %v4982_v43 = vld [vmem:[%s8261_s13 + $0x88] sm:$0xff] }
 0x487   :  { %v3972_v61 = vpop.f32.mrb[26].mxu1  ;;  %v4002_v63 = vpack.c.bf16 %v3998_v55, %v3994_v53  ;;  %v3988_v28 = vadd.f32 %v3980_v57, %v7951_v54  ;;  %v4965_v46 = vld [vmem:[%s8261_s13] sm:$0xff]  ;;  %v5968_v49 = vpack.c.bf16 %v4982_v43, %v4981_v40  ;;  %v4966_v52 = vld [vmem:[%s8261_s13 + $0x8] sm:$0xff]  ;;  %v4983_v53 = vld [vmem:[%s8261_s13 + $0x90] sm:$0xff] }
 0x488   :  { %v3983_v7 = vadd.f32 %v3972_v61, %v3810_v21  ;;  %v3974_v9 = vpop.f32.mrb[27].mxu1  ;;  %v3995_v22 = vmax.f32 %v3987_v3, 0.0  ;;  %v6843_v21 = vld [vmem:[#allocation8 + $0x1b0] ss:$8 sps:$4 sm:$0xff]   ;;  %v4984_v55 = vld [vmem:[%s8261_s13 + $0x98] sm:$0xff]  ;;  %v5970_v57 = vpack.c.bf16 %v4966_v52, %v4965_v46 }
 0x489   :  { %v3984_v48 = vadd.f32 %v3974_v9, %v3812_v50  ;;  %4485 = vmatprep.mubr.bf16.mxu0 %v4002_v63  ;;  %v3996_v35 = vmax.f32 %v3988_v28, 0.0  ;;  %v6848_v50 = vld [vmem:[#allocation8 + $0x1c4] ss:$8 sps:$4 sm:$0xff]   ;;  %v4985_v63 = vld [vmem:[%s8261_s13 + $0xa0] sm:$0xff]  ;;  %5969 = vmatprep.subr.bf16.mxu1 %v5968_v49  ;;  %v4970_v28 = vld [vmem:[%s8261_s13 + $0x28] sm:$0xff] }
 0x48a   :  { %v3991_v14 = vadd.f32 %v3983_v7, %v7895_v45  ;;  %4486 = vmatmul.mubr.bf16.vlgmr.msra.gmra.mrb[8].mxu0 %v4001_v59  ;;  %v6819_v45 = vld [vmem:[#allocation8 + $0x130] ss:$8 sps:$4 sm:$0xff]   ;;  %v5972_v59 = vpack.c.bf16 %v4984_v55, %v4983_v53  ;;  %v4968_v61 = vld [vmem:[%s8261_s13 + $0x18] sm:$0xff]  ;;  %5971 = vmatpush3.bf16.msra.mxu1 %v5970_v57  ;;  %v6905_v49 = vld [vmem:[#allocation7 + $0xf4] ss:$8 sps:$4 sm:$0xff]  }
 0x48b   :  { %v3992_v16 = vadd.f32 %v3984_v48, %v7951_v54  ;;  %4497 = vmatpush1.bf16.msra.mxu0 %v6810_v1  ;;  %v6824_v54 = vld [vmem:[#allocation8 + $0x144] ss:$8 sps:$4 sm:$0xff]   ;;  %v4986_v1 = vld [vmem:[%s8261_s13 + $0xa8] sm:$0xff]  ;;  %v6864_v7 = vld [vmem:[#allocation7 + $0x20] ss:$8 sps:$4 sm:$0xff]  }
 0x48c   :  { %v3999_v5 = vmax.f32 %v3991_v14, 0.0  ;;  %4498 = vmatprep.subr.bf16.mxu0 %v6815_v12  ;;  %5973 = vmatprep.subr.bf16.mxu1 %v5972_v59  ;;  %v5976_v9 = vpack.c.bf16 %v4986_v1, %v4985_v63  ;;  %v4969_v12 = vld [vmem:[%s8261_s13 + $0x20] sm:$0xff]  ;;  %v4987_v14 = vld [vmem:[%s8261_s13 + $0xb0] sm:$0xff] }
 0x48d   :  { %v4000_v39 = vmax.f32 %v3992_v16, 0.0  ;;  %v6869_v48 = vld [vmem:[#allocation7 + $0x34] ss:$8 sps:$4 sm:$0xff]   ;;  %v4988_v16 = vld [vmem:[%s8261_s13 + $0xb8] sm:$0xff]  ;;  %v6897_v40 = vld [vmem:[#allocation7 + $0xd0] ss:$8 sps:$4 sm:$0xff]  }
 0x48e   :  { %v8042_v38 = vpack.c.bf16 %v3999_v5, %v3995_v22  ;;  %v6867_v22 = vld [vmem:[#allocation7 + $0x30] ss:$8 sps:$4 sm:$0xff]   ;;  %v5980_v5 = vpack.c.bf16 %v4988_v16, %v4987_v14  ;;  %v6902_v43 = vld [vmem:[#allocation7 + $0xe4] ss:$8 sps:$4 sm:$0xff]   ;;  %v6900_v46 = vld [vmem:[#allocation7 + $0xe0] ss:$8 sps:$4 sm:$0xff]  }
 0x48f   :  { %4499 = vmatpush1.bf16.msra.mxu0 %v6813_v18  ;;  %v4004_v58 = vpack.c.bf16 %v4000_v39, %v3996_v35  ;;  %v5978_v18 = vpack.c.bf16 %v4970_v28, %v4969_v12  ;;  %v4972_v35 = vld [vmem:[%s8261_s13 + $0x38] sm:$0xff]  ;;  %v6903_v52 = vld [vmem:[#allocation7 + $0xf0] ss:$8 sps:$4 sm:$0xff]   ;;  %v6911_v57 = vld [vmem:[#allocation7 + $0x114] ss:$8 sps:$4 sm:$0xff]  }
 0x490   :  { %4500 = vmatprep.subr.bf16.mxu0 %v6818_v10  ;;  %v4971_v10 = vld [vmem:[%s8261_s13 + $0x30] sm:$0xff]  ;;  %v6909_v59 = vld [vmem:[#allocation7 + $0x110] ss:$8 sps:$4 sm:$0xff]   ;;  %v6917_v63 = vld [vmem:[#allocation7 + $0x134] ss:$8 sps:$4 sm:$0xff]  }
 0x491   :  { %4528 = vmatprep.mubr.bf16.mxu0 %v4004_v58  ;;  %v6872_v39 = vld [vmem:[#allocation7 + $0x44] ss:$8 sps:$4 sm:$0xff]   ;;  %v5982_v58 = vpack.c.bf16 %v4972_v35, %v4971_v10  ;;  %v6906_v55 = vld [vmem:[#allocation7 + $0x100] ss:$8 sps:$4 sm:$0xff]   ;;  %v6915_v1 = vld [vmem:[#allocation7 + $0x130] ss:$8 sps:$4 sm:$0xff]  }
 0x492   :  { %v6908_v53 = vld [vmem:[#allocation7 + $0x104] ss:$8 sps:$4 sm:$0xff]   ;;  %v6929_v28 = vld [vmem:[#allocation7 + $0x174] ss:$8 sps:$4 sm:$0xff]   ;;  %v6930_v16 = vld [vmem:[#allocation7 + $0x180] ss:$8 sps:$4 sm:$0xff]  }
 0x493   :  { %4501 = vmatpush1.bf16.msra.mxu0 %v6816_v44  ;;  %v4990_v44 = vld [vmem:[%s8261_s13 + $0xc8] sm:$0xff]  ;;  %v6926_v12 = vld [vmem:[#allocation7 + $0x164] ss:$8 sps:$4 sm:$0xff]   ;;  %v6936_v10 = vld [vmem:[#allocation7 + $0x1a0] ss:$8 sps:$4 sm:$0xff]  }
 0x494   :  { %4502 = vmatprep.subr.bf16.mxu0 %v6821_v0  ;;  %v6870_v0 = vld [vmem:[#allocation7 + $0x40] ss:$8 sps:$4 sm:$0xff]   ;;  %v6932_v14 = vld [vmem:[#allocation7 + $0x184] ss:$8 sps:$4 sm:$0xff]   ;;  %v6941_v35 = vld [vmem:[#allocation7 + $0x1b4] ss:$8 sps:$4 sm:$0xff]  }
 0x497   :  { %4503 = vmatpush1.bf16.msra.mxu0 %v6819_v45 }
 0x498   :  { %4504 = vmatprep.subr.bf16.mxu0 %v6824_v54  ;;  %v4973_v54 = vld [vmem:[%s8261_s13 + $0x40] sm:$0xff] }
 0x49b   :  { %4505 = vmatpush1.bf16.msra.mxu0 %v6822_v2  ;;  %v4974_v2 = vld [vmem:[%s8261_s13 + $0x48] sm:$0xff] }
 0x49c   :  { %4506 = vmatprep.subr.bf16.mxu0 %v6827_v33  ;;  %v6875_v33 = vld [vmem:[#allocation7 + $0x54] ss:$8 sps:$4 sm:$0xff]  }
 0x49f   :  { %4507 = vmatpush1.bf16.msra.mxu0 %v6825_v41  ;;  %v4991_v41 = vld [vmem:[%s8261_s13 + $0xd0] sm:$0xff] }
 0x4a0   :  { %4508 = vmatprep.subr.bf16.mxu0 %v6830_v24  ;;  %v4992_v24 = vld [vmem:[%s8261_s13 + $0xd8] sm:$0xff] }
 0x4a3   :  { %4509 = vmatpush1.bf16.msra.mxu0 %v6828_v62  ;;  %v5986_v62 = vpack.c.bf16 %v4974_v2, %v4973_v54  ;;  %v6948_v54 = vld [vmem:[#allocation7 + $0x1e0] ss:$8 sps:$4 sm:$0xff]   ;;  %v6953_v2 = vld [vmem:[#allocation7 + $0x1f4] ss:$8 sps:$4 sm:$0xff]  }
 0x4a4   :  { %4510 = vmatprep.subr.bf16.mxu0 %v6833_v56  ;;  %v6873_v56 = vld [vmem:[#allocation7 + $0x50] ss:$8 sps:$4 sm:$0xff]  }
 0x4a7   :  { %4511 = vmatpush1.bf16.msra.mxu0 %v6831_v8  ;;  %v5988_v8 = vpack.c.bf16 %v4992_v24, %v4991_v41  ;;  %v4977_v41 = vld [vmem:[%s8261_s13 + $0x60] sm:$0xff]  ;;  %v4978_v24 = vld [vmem:[%s8261_s13 + $0x68] sm:$0xff] }
 0x4a8   :  { %4512 = vmatprep.subr.bf16.mxu0 %v6836_v13  ;;  %v4975_v13 = vld [vmem:[%s8261_s13 + $0x50] sm:$0xff] }
 0x4ab   :  { %4513 = vmatpush1.bf16.msra.mxu0 %v6834_v47  ;;  %v4976_v47 = vld [vmem:[%s8261_s13 + $0x58] sm:$0xff] }
 0x4ac   :  { %4514 = vmatprep.subr.bf16.mxu0 %v6839_v20  ;;  %v6878_v20 = vld [vmem:[#allocation7 + $0x64] ss:$8 sps:$4 sm:$0xff]  }
 0x4af   :  { %4515 = vmatpush1.bf16.msra.mxu0 %v6837_v6  ;;  %v4993_v6 = vld [vmem:[%s8261_s13 + $0xe0] sm:$0xff] }
 0x4b0   :  { %4516 = vmatprep.subr.bf16.mxu0 %v6842_v11  ;;  %v4994_v11 = vld [vmem:[%s8261_s13 + $0xe8] sm:$0xff] }
 0x4b3   :  { %4517 = vmatpush1.bf16.msra.mxu0 %v6840_v60  ;;  %v5990_v60 = vpack.c.bf16 %v4976_v47, %v4975_v13  ;;  %v4980_v47 = vld [vmem:[%s8261_s13 + $0x78] sm:$0xff] }
 0x4b4   :  { %4518 = vmatprep.subr.bf16.mxu0 %v6845_v19  ;;  %v6876_v19 = vld [vmem:[#allocation7 + $0x60] ss:$8 sps:$4 sm:$0xff]  }
 0x4b7   :  { %4519 = vmatpush1.bf16.msra.mxu0 %v6843_v21  ;;  %v5992_v21 = vpack.c.bf16 %v4994_v11, %v4993_v6  ;;  %v5081_v6 = vld [vmem:[%s8263_s15] sm:$0xff]  ;;  %v5082_v11 = vld [vmem:[%s8263_s15 + $0x8] sm:$0xff] }
 0x4b8   :  { %4520 = vmatprep.subr.bf16.mxu0 %v6848_v50  ;;  %v6881_v50 = vld [vmem:[#allocation7 + $0x74] ss:$8 sps:$4 sm:$0xff]  }
 0x4bb   :  { %4521 = vmatpush1.bf16.msra.mxu0 %v6846_v32  ;;  %v6879_v32 = vld [vmem:[#allocation7 + $0x70] ss:$8 sps:$4 sm:$0xff]  }
 0x4bc   :  { %4522 = vmatprep.subr.bf16.mxu0 %v6851_v51  ;;  %v6884_v51 = vld [vmem:[#allocation7 + $0x84] ss:$8 sps:$4 sm:$0xff]  }
 0x4bf   :  { %4523 = vmatpush1.bf16.msra.mxu0 %v6849_v25  ;;  %v6882_v25 = vld [vmem:[#allocation7 + $0x80] ss:$8 sps:$4 sm:$0xff]  }
 0x4c0   :  { %4524 = vmatprep.subr.bf16.mxu0 %v6854_v4  ;;  %v6887_v4 = vld [vmem:[#allocation7 + $0x94] ss:$8 sps:$4 sm:$0xff]  }
 0x4c3   :  { %4525 = vmatpush1.bf16.msra.mxu0 %v6852_v23  ;;  %v6885_v23 = vld [vmem:[#allocation7 + $0x90] ss:$8 sps:$4 sm:$0xff]  }
 0x4c4   :  { %4526 = vmatprep.subr.bf16.mxu0 %v6857_v26  ;;  %v6890_v26 = vld [vmem:[#allocation7 + $0xa4] ss:$8 sps:$4 sm:$0xff]  }
 0x4c7   :  { %4527 = vmatpush1.bf16.msra.mxu0 %v6855_v27  ;;  %v6888_v27 = vld [vmem:[#allocation7 + $0xa0] ss:$8 sps:$4 sm:$0xff]  }
 0x4c8   :  { %4859 = vmatprep.subr.bf16.mxu0 %v6860_v30  ;;  %v6893_v30 = vld [vmem:[#allocation7 + $0xb4] ss:$8 sps:$4 sm:$0xff]  }
 0x4ca   :  { %4529 = vmatmul.mubr.bf16.vlgmr.msra.gmra.mrb[8].mxu0 %v8042_v38  ;;  %v4989_v38 = vld [vmem:[%s8261_s13 + $0xc0] sm:$0xff] }
 0x4cb   :  { %4860 = vmatpush1.bf16.msra.mxu0 %v6858_v31  ;;  %4891 = vmatprep.mubr.bf16.mxu0 %v7955_v17  ;;  %v4967_v17 = vld [vmem:[%s8261_s13 + $0x10] sm:$0xff]  ;;  %v5984_v45 = vpack.c.bf16 %v4990_v44, %v4989_v38  ;;  %v6891_v31 = vld [vmem:[#allocation7 + $0xb0] ss:$8 sps:$4 sm:$0xff]  }
 0x4cc   :  { %4861 = vmatprep.subr.bf16.mxu0 %v6863_v34  ;;  %v5974_v3 = vpack.c.bf16 %v4968_v61, %v4967_v17  ;;  %v6896_v34 = vld [vmem:[#allocation7 + $0xc4] ss:$8 sps:$4 sm:$0xff]   ;;  %v6912_v61 = vld [vmem:[#allocation7 + $0x120] ss:$8 sps:$4 sm:$0xff]  }
 0x4cd   :  { %v6914_v17 = vld [vmem:[#allocation7 + $0x124] ss:$8 sps:$4 sm:$0xff]   ;;  %v6942_v44 = vld [vmem:[#allocation7 + $0x1c0] ss:$8 sps:$4 sm:$0xff]  }
 0x4ce   :  { %5975 = vmatpush3.bf16.msra.mxu1 %v5974_v3  ;;  %v6920_v3 = vld [vmem:[#allocation7 + $0x144] ss:$8 sps:$4 sm:$0xff]  }
 0x4cf   :  { %4862 = vmatpush1.bf16.msra.mxu0 %v6861_v36  ;;  %5977 = vmatprep.subr.bf16.mxu1 %v5976_v9  ;;  %v6894_v36 = vld [vmem:[#allocation7 + $0xc0] ss:$8 sps:$4 sm:$0xff]   ;;  %v6923_v9 = vld [vmem:[#allocation7 + $0x154] ss:$8 sps:$4 sm:$0xff]   ;;  %v6944_v38 = vld [vmem:[#allocation7 + $0x1c4] ss:$8 sps:$4 sm:$0xff]  }
 0x4d0   :  { %4863 = vmatprep.subr.bf16.mxu0 %v6866_v37  ;;  %v6899_v37 = vld [vmem:[#allocation7 + $0xd4] ss:$8 sps:$4 sm:$0xff]  }
 0x4d2   :  { %5979 = vmatpush3.bf16.msra.mxu1 %v5978_v18  ;;  %v6935_v18 = vld [vmem:[#allocation7 + $0x194] ss:$8 sps:$4 sm:$0xff]  }
 0x4d3   :  { %4864 = vmatpush1.bf16.msra.mxu0 %v6864_v7  ;;  %5981 = vmatprep.subr.bf16.mxu1 %v5980_v5  ;;  %v6918_v7 = vld [vmem:[#allocation7 + $0x140] ss:$8 sps:$4 sm:$0xff]   ;;  %v6938_v5 = vld [vmem:[#allocation7 + $0x1a4] ss:$8 sps:$4 sm:$0xff]  }
 0x4d4   :  { %4865 = vmatprep.subr.bf16.mxu0 %v6869_v48  ;;  %v6927_v48 = vld [vmem:[#allocation7 + $0x170] ss:$8 sps:$4 sm:$0xff]  }
 0x4d6   :  { %5983 = vmatpush3.bf16.msra.mxu1 %v5982_v58  ;;  %v6947_v58 = vld [vmem:[#allocation7 + $0x1d4] ss:$8 sps:$4 sm:$0xff]  }
 0x4d7   :  { %4866 = vmatpush1.bf16.msra.mxu0 %v6867_v22  ;;  %5985 = vmatprep.subr.bf16.mxu1 %v5984_v45  ;;  %v6933_v22 = vld [vmem:[#allocation7 + $0x190] ss:$8 sps:$4 sm:$0xff]   ;;  %v6950_v45 = vld [vmem:[#allocation7 + $0x1e4] ss:$8 sps:$4 sm:$0xff]  }
 0x4d8   :  { %4867 = vmatprep.subr.bf16.mxu0 %v6872_v39  ;;  %v6939_v39 = vld [vmem:[#allocation7 + $0x1b0] ss:$8 sps:$4 sm:$0xff]  }
 0x4da   :  { %5987 = vmatpush3.bf16.msra.mxu1 %v5986_v62  ;;  %v5994_v62 = vpack.c.bf16 %v4978_v24, %v4977_v41  ;;  %v5190_v24 = vld [vmem:[%s8265_s17 + $0x50] sm:$0xff] }
 0x4db   :  { %4868 = vmatpush1.bf16.msra.mxu0 %v6870_v0  ;;  %5989 = vmatprep.subr.bf16.mxu1 %v5988_v8  ;;  %v6945_v0 = vld [vmem:[#allocation7 + $0x1d0] ss:$8 sps:$4 sm:$0xff]   ;;  %v4996_v8 = vld [vmem:[%s8261_s13 + $0xf8] sm:$0xff] }
 0x4dc   :  { %4869 = vmatprep.subr.bf16.mxu0 %v6875_v33  ;;  %v6951_v33 = vld [vmem:[#allocation7 + $0x1f0] ss:$8 sps:$4 sm:$0xff]  }
 0x4de   :  { %5991 = vmatpush3.bf16.msra.mxu1 %v5990_v60  ;;  %v6000_v60 = vpack.c.bf16 %v5082_v11, %v5081_v6  ;;  %v5844_v11 = vld [vmem:[%s8264_s16] ss:$0 sm:$0xff] }
 0x4df   :  { %4870 = vmatpush1.bf16.msra.mxu0 %v6873_v56  ;;  %5993 = vmatprep.subr.bf16.mxu1 %v5992_v21  ;;  %v4995_v56 = vld [vmem:[%s8261_s13 + $0xf0] sm:$0xff]  ;;  %v8315_v21 = vld [vmem:[#allocation24_spill] sm:$0xff] }
 0x4e0   :  { %4871 = vmatprep.subr.bf16.mxu0 %v6878_v20  ;;  %v5996_v13 = vpack.c.bf16 %v4996_v8, %v4995_v56  ;;  %v5192_v8 = vld [vmem:[%s8265_s17 + $0x60] sm:$0xff] }
 0x4e2   :  { %5995 = vmatpush3.bf16.msra.mxu1 %v5994_v62  ;;  %v5191_v62 = vld [vmem:[%s8265_s17 + $0x58] sm:$0xff] }
 0x4e3   :  { %4872 = vmatpush1.bf16.msra.mxu0 %v6876_v19  ;;  %5997 = vmatprep.subr.bf16.mxu1 %v5996_v13  ;;  %v4945_v19 = vld [vmem:[%s8260_s12] sm:$0x3]  ;;  %v6036_v56 = vpack.c.bf16 %v5191_v62, %v5190_v24  ;;  %v5193_v13 = vld [vmem:[%s8265_s17 + $0x68] sm:$0xff] }
 0x4e4   :  { %4873 = vmatprep.subr.bf16.mxu0 %v6881_v50  ;;  %v8316_v50 = vsub.s32 0, %v8315_v21 }
 0x4e7   :  { %4874 = vmatpush1.bf16.msra.mxu0 %v6879_v32  ;;  %v4950_v32 = vrot.slane %v4945_v19, %v8316_v50 }
 0x4e8   :  { %4875 = vmatprep.subr.bf16.mxu0 %v6884_v51  ;;  %v8317_v51 = vsub.s32 1, %v8315_v21 }
 0x4eb   :  { %4876 = vmatpush1.bf16.msra.mxu0 %v6882_v25  ;;  %v4954_v25 = vrot.slane %v4945_v19, %v8317_v51 }
 0x4ec   :  { %4877 = vmatprep.subr.bf16.mxu0 %v6887_v4 }
 0x4ef   :  { %4878 = vmatpush1.bf16.msra.mxu0 %v6885_v23 }
 0x4f0   :  { %4879 = vmatprep.subr.bf16.mxu0 %v6890_v26 }
 0x4f3   :  { %4880 = vmatpush1.bf16.msra.mxu0 %v6888_v27 }
 0x4f4   :  { %4881 = vmatprep.subr.bf16.mxu0 %v6893_v30 }
 0x4f7   :  { %4882 = vmatpush1.bf16.msra.mxu0 %v6891_v31 }
 0x4f8   :  { %4883 = vmatprep.subr.bf16.mxu0 %v6896_v34 }
 0x4fb   :  { %4884 = vmatpush1.bf16.msra.mxu0 %v6894_v36 }
 0x4fc   :  { %4885 = vmatprep.subr.bf16.mxu0 %v6899_v37 }
 0x4ff   :  { %4886 = vmatpush1.bf16.msra.mxu0 %v6897_v40 }
 0x500   :  { %4887 = vmatprep.subr.bf16.mxu0 %v6902_v43 }
 0x503   :  { %4888 = vmatpush1.bf16.msra.mxu0 %v6900_v46 }
 0x504   :  { %4889 = vmatprep.subr.bf16.mxu0 %v6905_v49  ;;  %v5083_v49 = vld [vmem:[%s8263_s15 + $0x10] sm:$0xff] }
 0x507   :  { %4890 = vmatpush1.bf16.msra.mxu0 %v6903_v52  ;;  %v5084_v52 = vld [vmem:[%s8263_s15 + $0x18] sm:$0xff] }
 0x508   :  { %4902 = vmatprep.subr.bf16.mxu0 %v6908_v53  ;;  %v6004_v53 = vpack.c.bf16 %v5084_v52, %v5083_v49 }
 0x50a   :  { %4892 = vmatmul.mubr.bf16.vlgmr.msra.gmra.mrb[8].mxu0 %v7953_v29  ;;  %v6921_v29 = vld [vmem:[#allocation7 + $0x150] ss:$8 sps:$4 sm:$0xff]  }
 0x50b   :  { %4903 = vmatpush1.bf16.msra.mxu0 %v6906_v55  ;;  %4934 = vmatprep.mubr.bf16.mxu0 %v7965_v42  ;;  %v6924_v42 = vld [vmem:[#allocation7 + $0x160] ss:$8 sps:$4 sm:$0xff]   ;;  %v5085_v55 = vld [vmem:[%s8263_s15 + $0x20] sm:$0xff] }
 0x50c   :  { %4904 = vmatprep.subr.bf16.mxu0 %v6911_v57  ;;  %v5086_v57 = vld [vmem:[%s8263_s15 + $0x28] sm:$0xff] }
 0x50f   :  { %4905 = vmatpush1.bf16.msra.mxu0 %v6909_v59  ;;  %v6008_v59 = vpack.c.bf16 %v5086_v57, %v5085_v55 }
 0x510   :  { %4906 = vmatprep.subr.bf16.mxu0 %v6914_v17  ;;  %v5087_v17 = vld [vmem:[%s8263_s15 + $0x30] sm:$0xff] }
 0x513   :  { %4907 = vmatpush1.bf16.msra.mxu0 %v6912_v61  ;;  %v5088_v61 = vld [vmem:[%s8263_s15 + $0x38] sm:$0xff] }
 0x514   :  { %4908 = vmatprep.subr.bf16.mxu0 %v6917_v63  ;;  %v6012_v63 = vpack.c.bf16 %v5088_v61, %v5087_v17 }
 0x517   :  { %4909 = vmatpush1.bf16.msra.mxu0 %v6915_v1  ;;  %v5180_v1 = vld [vmem:[%s8265_s17] sm:$0xff] }
 0x518   :  { %4910 = vmatprep.subr.bf16.mxu0 %v6920_v3  ;;  %v5181_v3 = vld [vmem:[%s8265_s17 + $0x8] sm:$0xff] }
 0x51b   :  { %4911 = vmatpush1.bf16.msra.mxu0 %v6918_v7  ;;  %v6016_v7 = vpack.c.bf16 %v5181_v3, %v5180_v1 }
 0x51c   :  { %4912 = vmatprep.subr.bf16.mxu0 %v6923_v9 }
 0x51f   :  { %4913 = vmatpush1.bf16.msra.mxu0 %v6921_v29  ;;  %v5843_v29 = vld [vmem:[%s8262_s14] ss:$0 sm:$0xff] }
 0x520   :  { %4914 = vmatprep.subr.bf16.mxu0 %v6926_v12 }
 0x523   :  { %4915 = vmatpush1.bf16.msra.mxu0 %v6924_v42 }
 0x524   :  { %4916 = vmatprep.subr.bf16.mxu0 %v6929_v28 }
 0x527   :  { %4917 = vmatpush1.bf16.msra.mxu0 %v6927_v48 }
 0x528   :  { %4918 = vmatprep.subr.bf16.mxu0 %v6932_v14 }
 0x52b   :  { %4919 = vmatpush1.bf16.msra.mxu0 %v6930_v16 }
 0x52c   :  { %4920 = vmatprep.subr.bf16.mxu0 %v6935_v18 }
 0x52f   :  { %4921 = vmatpush1.bf16.msra.mxu0 %v6933_v22  ;;  %v5182_v22 = vld [vmem:[%s8265_s17 + $0x10] sm:$0xff] }
 0x530   :  { %4922 = vmatprep.subr.bf16.mxu0 %v6938_v5  ;;  %v5183_v5 = vld [vmem:[%s8265_s17 + $0x18] sm:$0xff] }
 0x533   :  { %4923 = vmatpush1.bf16.msra.mxu0 %v6936_v10 }
 0x534   :  { %4924 = vmatprep.subr.bf16.mxu0 %v6941_v35 }
 0x537   :  { %4925 = vmatpush1.bf16.msra.mxu0 %v6939_v39  ;;  %v6020_v39 = vpack.c.bf16 %v5183_v5, %v5182_v22 }
 0x538   :  { %4926 = vmatprep.subr.bf16.mxu0 %v6944_v38  ;;  %v5184_v38 = vld [vmem:[%s8265_s17 + $0x20] sm:$0xff] }
 0x53b   :  { %4927 = vmatpush1.bf16.msra.mxu0 %v6942_v44  ;;  %v5185_v44 = vld [vmem:[%s8265_s17 + $0x28] sm:$0xff] }
 0x53c   :  { %4928 = vmatprep.subr.bf16.mxu0 %v6947_v58  ;;  %v6024_v58 = vpack.c.bf16 %v5185_v44, %v5184_v38 }
 0x53f   :  { %4929 = vmatpush1.bf16.msra.mxu0 %v6945_v0  ;;  %v5186_v0 = vld [vmem:[%s8265_s17 + $0x30] sm:$0xff] }
 0x540   :  { %4930 = vmatprep.subr.bf16.mxu0 %v6950_v45  ;;  %v5187_v45 = vld [vmem:[%s8265_s17 + $0x38] sm:$0xff] }
 0x543   :  { %4931 = vmatpush1.bf16.msra.mxu0 %v6948_v54  ;;  %v6028_v54 = vpack.c.bf16 %v5187_v45, %v5186_v0 }
 0x544   :  { %4932 = vmatprep.subr.bf16.mxu0 %v6953_v2  ;;  %v5188_v2 = vld [vmem:[%s8265_s17 + $0x40] sm:$0xff] }
 0x547   :  { %4933 = vmatpush1.bf16.msra.mxu0 %v6951_v33  ;;  %v5189_v33 = vld [vmem:[%s8265_s17 + $0x48] sm:$0xff] }
 0x548   :  { %v6032_v41 = vpack.c.bf16 %v5189_v33, %v5188_v2 }
 0x54a   :  { %4935 = vmatmul.mubr.bf16.vlgmr.msra.gmra.mrb[8].mxu0 %v7963_v15  ;;  %v4979_v15 = vld [vmem:[%s8261_s13 + $0x70] sm:$0xff] }
 0x54b   :  { %v5998_v20 = vpack.c.bf16 %v4980_v47, %v4979_v15  ;;  %v6040_v15 = vpack.c.bf16 %v5193_v13, %v5192_v8  ;;  %v5194_v47 = vld [vmem:[%s8265_s17 + $0x70] sm:$0xff] }
 0x54d   :  { %5999 = vmatpush3.bf16.msra.mxu1 %v5998_v20  ;;  %v5195_v20 = vld [vmem:[%s8265_s17 + $0x78] sm:$0xff]  ;;  %s7429_s17 = smov [#allocation10]  }
 0x54e   :  { %6001 = vmatprep.subr.bf16.mxu1 %v6000_v60  ;;  %v6044_v6 = vpack.c.bf16 %v5195_v20, %v5194_v47  ;;  %s5285_s12 = sshll.u32 %s7429_s17, 4  ;;  %s5286_s12 = int_to_ptr.vmem [resolvable:$true] %s5285_s12 }
 0x54f   :  { %s7390_s16 = scalar_lea.vmem %s5286_s12, 256  ;;  %p7395_p5 = scmp.lt.s32.totalorder %s5286_s12, %s5286_s12 }
 0x550   :  { %p7391_p4 = scmp.ne.s32.totalorder %s5286_s12, %s7390_s16  ;;  %p7396_p6 = scmp.lt.s32.totalorder %s7390_s16, %s7390_s16 }
 0x552   :  { %p7397_p7 = por %p7396_p6, %p7395_p5 }
 0x554   :  { %p7398_p8 = pnand %p7397_p7, %p7391_p4 }
 0x61d   :  { %v4936_v4 = vpop.f32.mrb[8].mxu0 }
 0x61e   :  { %v4957_v23 = vadd.f32 %v4950_v32, %v4936_v4  ;;  %v4938_v26 = vpop.f32.mrb[9].mxu0 }
 0x61f   :  { %v4958_v27 = vadd.f32 %v4954_v25, %v4938_v26  ;;  %v4940_v30 = vpop.f32.mrb[10].mxu0 }
 0x620   :  { %v4942_v31 = vpop.f32.mrb[11].mxu0  ;;  %v4961_v37 = vmax.f32 %v4957_v23, 0.0  ;;  %v4959_v40 = vadd.f32 %v4950_v32, %v4940_v30 }
 0x621   :  { %v4962_v34 = vmax.f32 %v4958_v27, 0.0  ;;  %v4960_v36 = vadd.f32 %v4954_v25, %v4942_v31  ;;  %v5847_v25 = vld [vmem:[%s8266_s18] ss:$0 sm:$0xff] }
 0x622   :  { %v4963_v46 = vmax.f32 %v4959_v40, 0.0 }
 0x623   :  { %v4964_v43 = vmax.f32 %v4960_v36, 0.0  ;;  %5068 = vmatprep.mubr.f32.mxu1 %v4962_v34 }
 0x624   :  { %5069 = vmatmul.mubr.f32.vlgmr.msra.gmra.mrb[28].mxu1 %v4961_v37 }
 0x625   :  { %5073 = vmatprep.mubr.f32.mxu1 %v4964_v43  ;;  %6003 = vmatpush3.bf16.msra.mxu1 %v6000_v60 }
 0x626   :  { %6005 = vmatprep.subr.bf16.mxu1 %v6004_v53 }
 0x628   :  { %5074 = vmatmul.mubr.f32.gmra.mrb[30].mxu1 %v4963_v46 }
 0x629   :  { %6007 = vmatpush3.bf16.msra.mxu1 %v6004_v53 }
 0x62a   :  { %6009 = vmatprep.subr.bf16.mxu1 %v6008_v59 }
 0x62d   :  { %6011 = vmatpush3.bf16.msra.mxu1 %v6008_v59 }
 0x62e   :  { %6013 = vmatprep.subr.bf16.mxu1 %v6012_v63 }
 0x631   :  { %6015 = vmatpush3.bf16.msra.mxu1 %v6012_v63 }
 0x632   :  { %6017 = vmatprep.subr.bf16.mxu1 %v6016_v7 }
 0x6f7   :  { %v5880_v9 = vpop.f32.mrb[28].mxu1 }
 0x6f8   :  { %v5881_v12 = vpop.f32.mrb[29].mxu1 }
 0x6f9   :  { %v5882_v42 = vadd.f32 %v5881_v12, %v5880_v9 }
 0x6fb   :  { %v5071_v28 = vadd.f32 %v5882_v42, %v5843_v29  ;;  %v5883_v48 = vpop.f32.mrb[30].mxu1 }
 0x6fc   :  { %v5884_v14 = vpop.f32.mrb[31].mxu1 }
 0x6fd   :  { %v5079_v16 = vmax.f32 %v5071_v28, 0.0  ;;  %v5885_v18 = vadd.f32 %v5884_v14, %v5883_v48 }
 0x6ff   :  { %v5076_v10 = vadd.f32 %v5885_v18, %v5843_v29  ;;  %5930 = vmatprep.mubr.msk.f32.mxu1 %vm5096_vm1, %v5079_v16 }
 0x701   :  { %v5080_v35 = vmax.f32 %v5076_v10, 0.0 }
 0x703   :  { %5931 = vmatmul.mubr.msk.f32.vlgmr.msra.gmra.mrb[32].mxu1 %vm5096_vm1, %v5080_v35 }
 0x704   :  { %6019 = vmatpush3.bf16.msra.mxu1 %v6016_v7 }
 0x705   :  { %6021 = vmatprep.subr.bf16.mxu1 %v6020_v39 }
 0x708   :  { %6023 = vmatpush3.bf16.msra.mxu1 %v6020_v39 }
 0x709   :  { %6025 = vmatprep.subr.bf16.mxu1 %v6024_v58 }
 0x70c   :  { %6027 = vmatpush3.bf16.msra.mxu1 %v6024_v58 }
 0x70d   :  { %6029 = vmatprep.subr.bf16.mxu1 %v6028_v54 }
 0x710   :  { %6031 = vmatpush3.bf16.msra.mxu1 %v6028_v54 }
 0x711   :  { %6033 = vmatprep.subr.bf16.mxu1 %v6032_v41 }
 0x714   :  { %6035 = vmatpush3.bf16.msra.mxu1 %v6032_v41 }
 0x715   :  { %6037 = vmatprep.subr.bf16.mxu1 %v6036_v56 }
 0x718   :  { %6039 = vmatpush3.bf16.msra.mxu1 %v6036_v56 }
 0x719   :  { %6041 = vmatprep.subr.bf16.mxu1 %v6040_v15 }
 0x71c   :  { %6043 = vmatpush3.bf16.msra.mxu1 %v6040_v15 }
 0x71d   :  { %6045 = vmatprep.subr.bf16.mxu1 %v6044_v6 }
 0x720   :  { %6047 = vmatpush3.bf16.msra.mxu1 %v6044_v6 }
 0x7d6   :  { %v5932_v60 = vpop.f32.mrb[32].mxu1 }
 0x7d7   :  { %v5175_v19 = vadd.f32 %v5932_v60, %v5844_v11  ;;  %v5169_v21 = vpop.f32.mrb[33].mxu1 }
 0x7d8   :  { %v5170_v50 = vadd.f32 %v5844_v11, %v5169_v21 }
 0x7d9   :  { %v5179_v51 = vmax.f32 %v5175_v19, 0.0 }
 0x7da   :  { %v5178_v32 = vmax.f32 %v5170_v50, 0.0 }
 0x7dc   :  { %5965 = vmatprep.mubr.f32.mxu1 %v5178_v32 }
 0x7dd   :  { %5966 = vmatmul.mubr.f32.vlgmr.msra.gmra.mrb[34].mxu1 %v5179_v51 }
 0x8b0   :  { %v5967_v4 = vpop.f32.mrb[34].mxu1 }
 0x8b1   :  { %v5275_v23 = vadd.f32 %v5967_v4, %v5847_v25  ;;  %v5269_v26 = vpop.f32.mrb[35].mxu1 }
 0x8b2   :  { %v5270_v27 = vadd.f32 %v5847_v25, %v5269_v26 }
 0x8b3   :  { %5279 = vst [vmem:[#allocation10 + $0x8] sm:$0xff] %v5275_v23 }
 0x8b4   :  { %5278 = vst [vmem:[#allocation10] sm:$0xff] %v5270_v27 }
 0x8b5   :  { %7401 = shalt.err (!%p7398_p8)
}
 0x8b6   :  { %s7402_s18 = scalar_lea.hbm %s8267_s19, 256 }
 0x8b7   :  { %p7403_p9 = scmp.ne.s32.totalorder %s8267_s19, %s7402_s18  ;;  %p7406_p10 = scmp.lt.u32.totalorder %s7402_s18, %s8267_s19 }
 0x8b9   :  { %p7408_p11 = pnand %p7406_p10, %p7403_p9 }
 0x8bb   :  { %7411 = shalt.err (!%p7408_p11)
}
 0x8bc   :  { %5291 = dma.vmem_to_hbm [thread:$0]  %s5286_s12, 256, %s8267_s19, [#allocation4], %s7425_s7, %s7425_s7, %s7426_s21  }
 0x8bd   :  { %7418 = dma.done.wait [#allocation4], 256  }
 0x8be   :  { %7419 = vsyncadd [#allocation4], 4294967040 }
 0x8bf   :  { %5295 = vsyncpa [#allocation3], 1 }
 0x8c0   :  { %5296 = vsyncpa [#allocation6], 1 }
 0x8c1   :  { %5297 = vsyncpa [#allocation9], 1 }
 0x8c2   :  { %5298 = vsyncpa [#allocation4], 1 }

</bundles_post_ra>
